<compile_context>
chip_gen: v7x
topology: tpu7x:2x2x1
jax: 0.10.0
libtpu: 0.0.40
codegen_flags: <defaults>
</compile_context>

<pallas_src>
import functools

import jax
import jax.numpy as jnp
from jax.experimental import pallas as pl
from jax.experimental.pallas import tpu as pltpu

ALPHA = 0.1  # LeakyReLU slope (kReluCoef)


# --------------------------------------------------------------------------
# Module configuration / params
# --------------------------------------------------------------------------
def get_padding(kernel_size, dilation=1):
    return int((kernel_size * dilation - dilation) / 2)


def make_layer_cfgs(kernel_size, stride, channels):
    """Each cfg: (c_in, c_out, K, stride, pad, apply_lrelu)."""
    cfgs = []
    for i in range(len(channels) - 1):
        cfgs.append((channels[i], channels[i + 1], kernel_size, stride,
                     get_padding(kernel_size, 1), True))
    # extra conv: channels[-2] -> channels[-1], stride 1, pad 2, with lrelu
    cfgs.append((channels[-2], channels[-1], kernel_size, 1, 2, True))
    # post conv: channels[-1] -> 1, kernel (3,1), stride 1, pad 1, NO lrelu
    cfgs.append((channels[-1], 1, 3, 1, 1, False))
    return tuple(cfgs)


def init_period_disc_params(key, cfgs):
    params = []
    for (cin, cout, K, _s, _p, _l) in cfgs:
        key, kw, kb = jax.random.split(key, 3)
        scale = 1.0 / jnp.sqrt(jnp.float32(cin * K))
        w = jax.random.normal(kw, (K, cin, cout), jnp.float32) * scale
        b = jax.random.normal(kb, (1, cout), jnp.float32) * 0.01
        params.append((w, b))
    return params


# --------------------------------------------------------------------------
# Fused Pallas kernel: all layers of one PeriodDiscriminator for a single
# (branch, column) grid step.  Activation layout: (H, C) — conv axis H on
# sublanes, channels on lanes.  Weights stay in their natural (K, cin, cout)
# shape; contraction is over cin only (Nh lives on the grid, not the lanes).
# --------------------------------------------------------------------------
def _make_fused_kernel(metas):
    """metas[l] = (K, stride, pad, H_in, H_out, cin, cout, apply_lrelu)."""
    n_layers = len(metas)

    def kernel(*refs):
        x_ref = refs[0]
        w_refs = refs[1:1 + n_layers]                     # (K, cin, cout)
        b_refs = refs[1 + n_layers:1 + 2 * n_layers]      # (1, cout)
        o_refs = refs[1 + 2 * n_layers:1 + 3 * n_layers]  # (H_out, cout)
        sc = refs[1 + 3 * n_layers]                       # shared (maxHp, maxC)

        x = x_ref[...]                                    # (H0, cin0)
        for l, (K, s, pad, H_in, H_out, cin, cout, lrelu) in enumerate(metas):
            # Stage the padded input; zero ONLY the halo rows (not the buffer).
            if pad > 0:
                zhalo = jnp.zeros((pad, cin), jnp.float32)
                sc[pl.ds(0, pad), 0:cin] = zhalo
                sc[pl.ds(H_in + pad, pad), 0:cin] = zhalo
            sc[pl.ds(pad, H_in), 0:cin] = x
            # TODO(synk): layer l+1 could read shifted windows of o_refs[l]
            # directly (masked halos) to drop this re-staging store on v5e.

            acc = jnp.zeros((H_out, cout), jnp.float32)
            for k in range(K):
                idx = pl.ds(k, H_out) if s == 1 else pl.ds(k, H_out, s)
                tap = sc[idx, 0:cin]                      # (H_out, cin)
                w_k = w_refs[l][k]                        # (cin, cout)
                if cin == 1:
                    # contraction depth 1: VPU broadcast MAC, skip the MXU
                    acc = acc + tap * w_k
                else:
                    acc = acc + jnp.dot(tap, w_k,
                                        preferred_element_type=jnp.float32)
            y = acc + b_refs[l][...]
            if lrelu:
                y = jnp.where(y >= 0.0, y, ALPHA * y)
            o_refs[l][...] = y.astype(o_refs[l].dtype)
            x = y                                         # stays on-chip

    return kernel


# --------------------------------------------------------------------------
# Per-period forward: one pallas_call handles gt AND pr and all layers.
# --------------------------------------------------------------------------
def period_disc_forward(x2, params, cfgs, period):
    """x2: (2, B, C, T) stacked (gt, pr).
    Returns (gt_feats, pr_feats): lists of torch-NCHW (B, C_out, H_out, period)."""
    two, B, C, T = x2.shape
    assert two == 2 and C == cfgs[0][0]
    for l in range(1, len(cfgs)):
        assert cfgs[l][0] == cfgs[l - 1][1], "channel chain mismatch"

    if T % period != 0:
        padding = period - T % period
        assert padding < T, "reflect pad requires (period - T % period) < T"
        x2 = jnp.pad(x2, ((0, 0), (0, 0), (0, 0), (0, padding)), mode="reflect")
        T = T + padding
    H0 = T // period
    Nh = B * period

    # per-layer shape metadata
    metas = []
    H_in = H0
    for (cin, cout, K, s, pad, lrelu) in cfgs:
        H_out = (H_in + 2 * pad - K) // s + 1
        metas.append((K, s, pad, H_in, H_out, cin, cout, lrelu))
        H_in = H_out
    metas = tuple(metas)
    n_layers = len(cfgs)

    # (branch, B, C, H, period) -> (branch, Nh, H, C); column n = b*period + p
    x = x2.reshape(2, B, C, H0, period).transpose(0, 1, 4, 3, 2)
    x = x.reshape(2, Nh, H0, C)

    ws = [w for (w, _b) in params]     # natural (K, cin, cout) — no expansion
    bs = [b for (_w, b) in params]     # (1, cout)

    out_shape = tuple(
        jax.ShapeDtypeStruct((2, Nh, m[4], m[6]), jnp.float32) for m in metas)

    in_specs = [pl.BlockSpec((pl.Squeezed(), pl.Squeezed(), H0, C),
                             lambda i, n: (i, n, 0, 0))]
    in_specs += [pl.BlockSpec(w.shape, lambda i, n: (0, 0, 0)) for w in ws]
    in_specs += [pl.BlockSpec(b.shape, lambda i, n: (0, 0)) for b in bs]
    out_specs = tuple(
        pl.BlockSpec((pl.Squeezed(), pl.Squeezed(), m[4], m[6]),
                     lambda i, n: (i, n, 0, 0))
        for m in metas)

    # ONE shared scratch, sized max over layers (not sum).
    max_hp = max(m[3] + 2 * m[2] for m in metas)
    max_ci = max(m[5] for m in metas)
    scratch_shapes = [pltpu.VMEM((max_hp, max_ci), jnp.float32)]

    outs = pl.pallas_call(
        _make_fused_kernel(metas),
        out_shape=out_shape,
        grid=(2, Nh),                               # (branch, column)
        in_specs=in_specs,
        out_specs=out_specs,
        scratch_shapes=scratch_shapes,
        compiler_params=pltpu.CompilerParams(
            dimension_semantics=("parallel", "parallel"),
            vmem_limit_bytes=32 * 1024 * 1024),
    )(x, *ws, *bs)

    gt_feats, pr_feats = [], []
    for o, m in zip(outs, metas):
        H_out, cout = m[4], m[6]
        # (2, Nh, H, cout) -> torch NCHW (B, cout, H, period) per branch
        o5 = o.reshape(2, B, period, H_out, cout).transpose(0, 1, 4, 3, 2)
        gt_feats.append(o5[0])
        pr_feats.append(o5[1])
    return gt_feats, pr_feats


# --------------------------------------------------------------------------
# MultiPeriodDiscriminator forward
# --------------------------------------------------------------------------
@functools.partial(jax.jit, static_argnames=("cfgs", "periods"))
def multi_period_discriminator(gt_audio, pr_audio, all_params, cfgs, periods):
    x2 = jnp.stack([gt_audio, pr_audio], axis=0)   # (2, B, C, T)
    gt_finals, pr_finals, gt_states, pr_states = [], [], [], []
    for period, params in zip(periods, all_params):
        gfeats, pfeats = period_disc_forward(x2, params, cfgs, period)
        gt_finals.append(gfeats[-1])
        pr_finals.append(pfeats[-1])
        gt_states.append(gfeats)
        pr_states.append(pfeats)
    return gt_finals, pr_finals, gt_states, pr_states


# --------------------------------------------------------------------------
# Pure-JAX reference (lax.conv) for a numerical sanity check
# --------------------------------------------------------------------------
def _ref_period_disc(x, params, cfgs, period):
    B, C, T = x.shape
    if T % period != 0:
        padding = period - T % period
        x = jnp.pad(x, ((0, 0), (0, 0), (0, padding)), mode="reflect")
        T += padding
    h = x.reshape(B, C, T // period, period)
    feats = []
    for (w, b), (cin, cout, K, s, pad, lrelu) in zip(params, cfgs):
        w_oihw = jnp.transpose(w, (2, 1, 0))[..., None]    # (Cout, Cin, K, 1)
        h = jax.lax.conv_general_dilated(
            h, w_oihw, window_strides=(s, 1), padding=((pad, pad), (0, 0)),
            dimension_numbers=("NCHW", "OIHW", "NCHW"))
        h = h + b[0].reshape(1, cout, 1, 1)
        if lrelu:
            h = jnp.where(h >= 0, h, ALPHA * h)
        feats.append(h)
    return feats


# --------------------------------------------------------------------------
if __name__ == "__main__":
    key = jax.random.PRNGKey(0)
    periods = (2, 3, 5)
    kernel_size = 5
    stride = 2
    # NOTE: the reference forward only type-checks if channels[-2] == channels[-1]
    # (the appended extra conv reuses them), so keep them equal.
    channels = [1, 4, 8, 8]

    B, C, T = 2, 1, 48
    k_gt, k_pr, k_params = jax.random.split(key, 3)
    gt_audio = jax.random.normal(k_gt, (B, C, T), jnp.float32)
    pr_audio = jax.random.normal(k_pr, (B, C, T), jnp.float32)

    cfgs = make_layer_cfgs(kernel_size, stride, channels)
    all_params = [init_period_disc_params(pk, cfgs)
                  for pk in jax.random.split(k_params, len(periods))]

    out = multi_period_discriminator(gt_audio, pr_audio, all_params,
                                     cfgs=cfgs, periods=periods)
    jax.block_until_ready(out)
    gt_finals, pr_finals, gt_states, pr_states = out

    # structural checks
    assert len(gt_finals) == len(periods) and len(gt_states[0]) == len(cfgs)
    assert gt_finals[0].shape[0] == B and gt_finals[0].shape[1] == 1

    # numerical check against a pure-JAX conv reference (both branches, all periods)
    for pi, period in enumerate(periods):
        ref_gt = _ref_period_disc(gt_audio, all_params[pi], cfgs, period)
        ref_pr = _ref_period_disc(pr_audio, all_params[pi], cfgs, period)
        for got, want in zip(gt_states[pi], ref_gt):
            assert got.shape == want.shape
            assert bool(jnp.allclose(got, want, atol=2e-4, rtol=2e-4))
        for got, want in zip(pr_states[pi], ref_pr):
            assert got.shape == want.shape
            assert bool(jnp.allclose(got, want, atol=2e-4, rtol=2e-4))

    print("KERNEL_OK")
</pallas_src>

<mosaic_0001>
module attributes {stable_mosaic.version = 11 : i64} {
  func.func @kernel(%arg0: i32, %arg1: i32, %arg2: memref<1x1x16x1xf32, #tpu.memory_space<vmem>>, %arg3: memref<5x1x4xf32, #tpu.memory_space<vmem>>, %arg4: memref<5x4x8xf32, #tpu.memory_space<vmem>>, %arg5: memref<5x8x8xf32, #tpu.memory_space<vmem>>, %arg6: memref<5x8x8xf32, #tpu.memory_space<vmem>>, %arg7: memref<3x8x1xf32, #tpu.memory_space<vmem>>, %arg8: memref<1x4xf32, #tpu.memory_space<vmem>>, %arg9: memref<1x8xf32, #tpu.memory_space<vmem>>, %arg10: memref<1x8xf32, #tpu.memory_space<vmem>>, %arg11: memref<1x8xf32, #tpu.memory_space<vmem>>, %arg12: memref<1x1xf32, #tpu.memory_space<vmem>>, %arg13: memref<1x1x8x4xf32, #tpu.memory_space<vmem>>, %arg14: memref<1x1x4x8xf32, #tpu.memory_space<vmem>>, %arg15: memref<1x1x2x8xf32, #tpu.memory_space<vmem>>, %arg16: memref<1x1x2x8xf32, #tpu.memory_space<vmem>>, %arg17: memref<1x1x2x1xf32, #tpu.memory_space<vmem>>, %arg18: memref<20x8xf32, #tpu.memory_space<vmem>>) attributes {dimension_semantics = [#tpu.dimension_semantics<parallel>, #tpu.dimension_semantics<parallel>], iteration_bounds = array<i64: 2, 6>, scalar_prefetch = 0 : i64, scratch_operands = 1 : i64, tpu.core_type = #tpu.core_type<tc>, window_params = [{transform_indices = @transform_0, window_bounds = array<i64: 1, 1, 16, 1>}, {pipeline_mode = #tpu.pipeline_mode<synchronous>, transform_indices = @transform_1, window_bounds = array<i64: 5, 1, 4>}, {pipeline_mode = #tpu.pipeline_mode<synchronous>, transform_indices = @transform_2, window_bounds = array<i64: 5, 4, 8>}, {pipeline_mode = #tpu.pipeline_mode<synchronous>, transform_indices = @transform_3, window_bounds = array<i64: 5, 8, 8>}, {pipeline_mode = #tpu.pipeline_mode<synchronous>, transform_indices = @transform_4, window_bounds = array<i64: 5, 8, 8>}, {pipeline_mode = #tpu.pipeline_mode<synchronous>, transform_indices = @transform_5, window_bounds = array<i64: 3, 8, 1>}, {pipeline_mode = #tpu.pipeline_mode<synchronous>, transform_indices = @transform_6, window_bounds = array<i64: 1, 4>}, {pipeline_mode = #tpu.pipeline_mode<synchronous>, transform_indices = @transform_7, window_bounds = array<i64: 1, 8>}, {pipeline_mode = #tpu.pipeline_mode<synchronous>, transform_indices = @transform_8, window_bounds = array<i64: 1, 8>}, {pipeline_mode = #tpu.pipeline_mode<synchronous>, transform_indices = @transform_9, window_bounds = array<i64: 1, 8>}, {pipeline_mode = #tpu.pipeline_mode<synchronous>, transform_indices = @transform_10, window_bounds = array<i64: 1, 1>}, {transform_indices = @transform_11, window_bounds = array<i64: 1, 1, 8, 4>}, {transform_indices = @transform_12, window_bounds = array<i64: 1, 1, 4, 8>}, {transform_indices = @transform_13, window_bounds = array<i64: 1, 1, 2, 8>}, {transform_indices = @transform_14, window_bounds = array<i64: 1, 1, 2, 8>}, {transform_indices = @transform_15, window_bounds = array<i64: 1, 1, 2, 1>}]} {
    %c0 = arith.constant 0 : index
    %c0_0 = arith.constant 0 : index
    %c0_1 = arith.constant 0 : index
    %c0_2 = arith.constant 0 : index
    %0 = vector.load %arg2[%c0, %c0_0, %c0_1, %c0_2] : memref<1x1x16x1xf32, #tpu.memory_space<vmem>>, vector<1x1x16x1xf32>
    %1 = vector.shape_cast %0 : vector<1x1x16x1xf32> to vector<16x1xf32>
    %cst = arith.constant 0.000000e+00 : f32
    %2 = vector.broadcast %cst : f32 to vector<2x1xf32>
    %c0_3 = arith.constant 0 : index
    %c0_4 = arith.constant 0 : index
    %3 = vector.load %arg18[%c0_3, %c0_4] : memref<20x8xf32, #tpu.memory_space<vmem>>, vector<2x1xf32>
    tpu.vector_store %arg18[%c0_3, %c0_4], %2 {strides = array<i32>} : memref<20x8xf32, #tpu.memory_space<vmem>>, vector<2x1xf32>,
    %c18 = arith.constant 18 : index
    %c0_5 = arith.constant 0 : index
    %4 = vector.load %arg18[%c18, %c0_5] : memref<20x8xf32, #tpu.memory_space<vmem>>, vector<2x1xf32>
    tpu.vector_store %arg18[%c18, %c0_5], %2 {strides = array<i32>} : memref<20x8xf32, #tpu.memory_space<vmem>>, vector<2x1xf32>,
    %c2 = arith.constant 2 : index
    %c0_6 = arith.constant 0 : index
    %5 = vector.load %arg18[%c2, %c0_6] : memref<20x8xf32, #tpu.memory_space<vmem>>, vector<16x1xf32>
    tpu.vector_store %arg18[%c2, %c0_6], %1 {strides = array<i32>} : memref<20x8xf32, #tpu.memory_space<vmem>>, vector<16x1xf32>,
    %cst_7 = arith.constant 0.000000e+00 : f32
    %6 = vector.broadcast %cst_7 : f32 to vector<8x4xf32>
    %c0_8 = arith.constant 0 : index
    %c0_9 = arith.constant 0 : index
    %7 = tpu.strided_load %arg18[%c0_8, %c0_9] {strides = array<i32: 2, 1>} : memref<20x8xf32, #tpu.memory_space<vmem>>, vector<8x1xf32>
    %c0_10 = arith.constant 0 : index
    %c0_11 = arith.constant 0 : index
    %c0_12 = arith.constant 0 : index
    %8 = vector.load %arg3[%c0_10, %c0_11, %c0_12] : memref<5x1x4xf32, #tpu.memory_space<vmem>>, vector<1x1x4xf32>
    %9 = vector.shape_cast %8 : vector<1x1x4xf32> to vector<1x4xf32>
    %10 = vector.broadcast %7 : vector<8x1xf32> to vector<8x4xf32>
    %11 = vector.broadcast %9 : vector<1x4xf32> to vector<8x4xf32>
    %12 = arith.mulf %10, %11 : vector<8x4xf32>
    %13 = arith.addf %6, %12 : vector<8x4xf32>
    %c1 = arith.constant 1 : index
    %c0_13 = arith.constant 0 : index
    %14 = tpu.strided_load %arg18[%c1, %c0_13] {strides = array<i32: 2, 1>} : memref<20x8xf32, #tpu.memory_space<vmem>>, vector<8x1xf32>
    %c1_14 = arith.constant 1 : index
    %c0_15 = arith.constant 0 : index
    %c0_16 = arith.constant 0 : index
    %15 = vector.load %arg3[%c1_14, %c0_15, %c0_16] : memref<5x1x4xf32, #tpu.memory_space<vmem>>, vector<1x1x4xf32>
    %16 = vector.shape_cast %15 : vector<1x1x4xf32> to vector<1x4xf32>
    %17 = vector.broadcast %14 : vector<8x1xf32> to vector<8x4xf32>
    %18 = vector.broadcast %16 : vector<1x4xf32> to vector<8x4xf32>
    %19 = arith.mulf %17, %18 : vector<8x4xf32>
    %20 = arith.addf %13, %19 : vector<8x4xf32>
    %c2_17 = arith.constant 2 : index
    %c0_18 = arith.constant 0 : index
    %21 = tpu.strided_load %arg18[%c2_17, %c0_18] {strides = array<i32: 2, 1>} : memref<20x8xf32, #tpu.memory_space<vmem>>, vector<8x1xf32>
    %c2_19 = arith.constant 2 : index
    %c0_20 = arith.constant 0 : index
    %c0_21 = arith.constant 0 : index
    %22 = vector.load %arg3[%c2_19, %c0_20, %c0_21] : memref<5x1x4xf32, #tpu.memory_space<vmem>>, vector<1x1x4xf32>
    %23 = vector.shape_cast %22 : vector<1x1x4xf32> to vector<1x4xf32>
    %24 = vector.broadcast %21 : vector<8x1xf32> to vector<8x4xf32>
    %25 = vector.broadcast %23 : vector<1x4xf32> to vector<8x4xf32>
    %26 = arith.mulf %24, %25 : vector<8x4xf32>
    %27 = arith.addf %20, %26 : vector<8x4xf32>
    %c3 = arith.constant 3 : index
    %c0_22 = arith.constant 0 : index
    %28 = tpu.strided_load %arg18[%c3, %c0_22] {strides = array<i32: 2, 1>} : memref<20x8xf32, #tpu.memory_space<vmem>>, vector<8x1xf32>
    %c3_23 = arith.constant 3 : index
    %c0_24 = arith.constant 0 : index
    %c0_25 = arith.constant 0 : index
    %29 = vector.load %arg3[%c3_23, %c0_24, %c0_25] : memref<5x1x4xf32, #tpu.memory_space<vmem>>, vector<1x1x4xf32>
    %30 = vector.shape_cast %29 : vector<1x1x4xf32> to vector<1x4xf32>
    %31 = vector.broadcast %28 : vector<8x1xf32> to vector<8x4xf32>
    %32 = vector.broadcast %30 : vector<1x4xf32> to vector<8x4xf32>
    %33 = arith.mulf %31, %32 : vector<8x4xf32>
    %34 = arith.addf %27, %33 : vector<8x4xf32>
    %c4 = arith.constant 4 : index
    %c0_26 = arith.constant 0 : index
    %35 = tpu.strided_load %arg18[%c4, %c0_26] {strides = array<i32: 2, 1>} : memref<20x8xf32, #tpu.memory_space<vmem>>, vector<8x1xf32>
    %c4_27 = arith.constant 4 : index
    %c0_28 = arith.constant 0 : index
    %c0_29 = arith.constant 0 : index
    %36 = vector.load %arg3[%c4_27, %c0_28, %c0_29] : memref<5x1x4xf32, #tpu.memory_space<vmem>>, vector<1x1x4xf32>
    %37 = vector.shape_cast %36 : vector<1x1x4xf32> to vector<1x4xf32>
    %38 = vector.broadcast %35 : vector<8x1xf32> to vector<8x4xf32>
    %39 = vector.broadcast %37 : vector<1x4xf32> to vector<8x4xf32>
    %40 = arith.mulf %38, %39 : vector<8x4xf32>
    %41 = arith.addf %34, %40 : vector<8x4xf32>
    %c0_30 = arith.constant 0 : index
    %c0_31 = arith.constant 0 : index
    %42 = vector.load %arg8[%c0_30, %c0_31] : memref<1x4xf32, #tpu.memory_space<vmem>>, vector<1x4xf32>
    %43 = vector.broadcast %42 : vector<1x4xf32> to vector<8x4xf32>
    %44 = arith.addf %41, %43 : vector<8x4xf32>
    %cst_32 = arith.constant 0.000000e+00 : f32
    %45 = vector.broadcast %cst_32 : f32 to vector<8x4xf32>
    %46 = arith.cmpf oge, %44, %45 : vector<8x4xf32>
    %cst_33 = arith.constant 1.000000e-01 : f32
    %47 = vector.broadcast %cst_33 : f32 to vector<8x4xf32>
    %48 = arith.mulf %47, %44 : vector<8x4xf32>
    %49 = arith.select %46, %44, %48 : vector<8x4xi1>, vector<8x4xf32>
    %c0_34 = arith.constant 0 : index
    %c0_35 = arith.constant 0 : index
    %c0_36 = arith.constant 0 : index
    %c0_37 = arith.constant 0 : index
    %50 = vector.load %arg13[%c0_34, %c0_35, %c0_36, %c0_37] : memref<1x1x8x4xf32, #tpu.memory_space<vmem>>, vector<1x1x8x4xf32>
    %51 = vector.shape_cast %50 : vector<1x1x8x4xf32> to vector<8x4xf32>
    %52 = vector.shape_cast %49 : vector<8x4xf32> to vector<1x1x8x4xf32>
    tpu.vector_store %arg13[%c0_34, %c0_35, %c0_36, %c0_37], %52 {strides = array<i32>} : memref<1x1x8x4xf32, #tpu.memory_space<vmem>>, vector<1x1x8x4xf32>,
    %cst_38 = arith.constant 0.000000e+00 : f32
    %53 = vector.broadcast %cst_38 : f32 to vector<2x4xf32>
    %c0_39 = arith.constant 0 : index
    %c0_40 = arith.constant 0 : index
    %54 = vector.load %arg18[%c0_39, %c0_40] : memref<20x8xf32, #tpu.memory_space<vmem>>, vector<2x4xf32>
    tpu.vector_store %arg18[%c0_39, %c0_40], %53 {strides = array<i32>} : memref<20x8xf32, #tpu.memory_space<vmem>>, vector<2x4xf32>,
    %c10 = arith.constant 10 : index
    %c0_41 = arith.constant 0 : index
    %55 = vector.load %arg18[%c10, %c0_41] : memref<20x8xf32, #tpu.memory_space<vmem>>, vector<2x4xf32>
    tpu.vector_store %arg18[%c10, %c0_41], %53 {strides = array<i32>} : memref<20x8xf32, #tpu.memory_space<vmem>>, vector<2x4xf32>,
    %c2_42 = arith.constant 2 : index
    %c0_43 = arith.constant 0 : index
    %56 = vector.load %arg18[%c2_42, %c0_43] : memref<20x8xf32, #tpu.memory_space<vmem>>, vector<8x4xf32>
    tpu.vector_store %arg18[%c2_42, %c0_43], %49 {strides = array<i32>} : memref<20x8xf32, #tpu.memory_space<vmem>>, vector<8x4xf32>,
    %cst_44 = arith.constant 0.000000e+00 : f32
    %57 = vector.broadcast %cst_44 : f32 to vector<4x8xf32>
    %c0_45 = arith.constant 0 : index
    %c0_46 = arith.constant 0 : index
    %58 = tpu.strided_load %arg18[%c0_45, %c0_46] {strides = array<i32: 2, 1>} : memref<20x8xf32, #tpu.memory_space<vmem>>, vector<4x4xf32>
    %c0_47 = arith.constant 0 : index
    %c0_48 = arith.constant 0 : index
    %c0_49 = arith.constant 0 : index
    %59 = vector.load %arg4[%c0_47, %c0_48, %c0_49] : memref<5x4x8xf32, #tpu.memory_space<vmem>>, vector<1x4x8xf32>
    %60 = vector.shape_cast %59 : vector<1x4x8xf32> to vector<4x8xf32>
    %cst_50 = arith.constant dense<0.000000e+00> : vector<4x8xf32>
    %61 = tpu.matmul %58, %60, %cst_50 {dimension_numbers = #tpu.dot_dimension_numbers<[1], [0], [0], [1], [0, 0, 1, 1], [], []>} : vector<4x4xf32>, vector<4x8xf32>, vector<4x8xf32> -> vector<4x8xf32>
    %62 = arith.addf %57, %61 : vector<4x8xf32>
    %c1_51 = arith.constant 1 : index
    %c0_52 = arith.constant 0 : index
    %63 = tpu.strided_load %arg18[%c1_51, %c0_52] {strides = array<i32: 2, 1>} : memref<20x8xf32, #tpu.memory_space<vmem>>, vector<4x4xf32>
    %c1_53 = arith.constant 1 : index
    %c0_54 = arith.constant 0 : index
    %c0_55 = arith.constant 0 : index
    %64 = vector.load %arg4[%c1_53, %c0_54, %c0_55] : memref<5x4x8xf32, #tpu.memory_space<vmem>>, vector<1x4x8xf32>
    %65 = vector.shape_cast %64 : vector<1x4x8xf32> to vector<4x8xf32>
    %cst_56 = arith.constant dense<0.000000e+00> : vector<4x8xf32>
    %66 = tpu.matmul %63, %65, %cst_56 {dimension_numbers = #tpu.dot_dimension_numbers<[1], [0], [0], [1], [0, 0, 1, 1], [], []>} : vector<4x4xf32>, vector<4x8xf32>, vector<4x8xf32> -> vector<4x8xf32>
    %67 = arith.addf %62, %66 : vector<4x8xf32>
    %c2_57 = arith.constant 2 : index
    %c0_58 = arith.constant 0 : index
    %68 = tpu.strided_load %arg18[%c2_57, %c0_58] {strides = array<i32: 2, 1>} : memref<20x8xf32, #tpu.memory_space<vmem>>, vector<4x4xf32>
    %c2_59 = arith.constant 2 : index
    %c0_60 = arith.constant 0 : index
    %c0_61 = arith.constant 0 : index
    %69 = vector.load %arg4[%c2_59, %c0_60, %c0_61] : memref<5x4x8xf32, #tpu.memory_space<vmem>>, vector<1x4x8xf32>
    %70 = vector.shape_cast %69 : vector<1x4x8xf32> to vector<4x8xf32>
    %cst_62 = arith.constant dense<0.000000e+00> : vector<4x8xf32>
    %71 = tpu.matmul %68, %70, %cst_62 {dimension_numbers = #tpu.dot_dimension_numbers<[1], [0], [0], [1], [0, 0, 1, 1], [], []>} : vector<4x4xf32>, vector<4x8xf32>, vector<4x8xf32> -> vector<4x8xf32>
    %72 = arith.addf %67, %71 : vector<4x8xf32>
    %c3_63 = arith.constant 3 : index
    %c0_64 = arith.constant 0 : index
    %73 = tpu.strided_load %arg18[%c3_63, %c0_64] {strides = array<i32: 2, 1>} : memref<20x8xf32, #tpu.memory_space<vmem>>, vector<4x4xf32>
    %c3_65 = arith.constant 3 : index
    %c0_66 = arith.constant 0 : index
    %c0_67 = arith.constant 0 : index
    %74 = vector.load %arg4[%c3_65, %c0_66, %c0_67] : memref<5x4x8xf32, #tpu.memory_space<vmem>>, vector<1x4x8xf32>
    %75 = vector.shape_cast %74 : vector<1x4x8xf32> to vector<4x8xf32>
    %cst_68 = arith.constant dense<0.000000e+00> : vector<4x8xf32>
    %76 = tpu.matmul %73, %75, %cst_68 {dimension_numbers = #tpu.dot_dimension_numbers<[1], [0], [0], [1], [0, 0, 1, 1], [], []>} : vector<4x4xf32>, vector<4x8xf32>, vector<4x8xf32> -> vector<4x8xf32>
    %77 = arith.addf %72, %76 : vector<4x8xf32>
    %c4_69 = arith.constant 4 : index
    %c0_70 = arith.constant 0 : index
    %78 = tpu.strided_load %arg18[%c4_69, %c0_70] {strides = array<i32: 2, 1>} : memref<20x8xf32, #tpu.memory_space<vmem>>, vector<4x4xf32>
    %c4_71 = arith.constant 4 : index
    %c0_72 = arith.constant 0 : index
    %c0_73 = arith.constant 0 : index
    %79 = vector.load %arg4[%c4_71, %c0_72, %c0_73] : memref<5x4x8xf32, #tpu.memory_space<vmem>>, vector<1x4x8xf32>
    %80 = vector.shape_cast %79 : vector<1x4x8xf32> to vector<4x8xf32>
    %cst_74 = arith.constant dense<0.000000e+00> : vector<4x8xf32>
    %81 = tpu.matmul %78, %80, %cst_74 {dimension_numbers = #tpu.dot_dimension_numbers<[1], [0], [0], [1], [0, 0, 1, 1], [], []>} : vector<4x4xf32>, vector<4x8xf32>, vector<4x8xf32> -> vector<4x8xf32>
    %82 = arith.addf %77, %81 : vector<4x8xf32>
    %c0_75 = arith.constant 0 : index
    %c0_76 = arith.constant 0 : index
    %83 = vector.load %arg9[%c0_75, %c0_76] : memref<1x8xf32, #tpu.memory_space<vmem>>, vector<1x8xf32>
    %84 = vector.broadcast %83 : vector<1x8xf32> to vector<4x8xf32>
    %85 = arith.addf %82, %84 : vector<4x8xf32>
    %cst_77 = arith.constant 0.000000e+00 : f32
    %86 = vector.broadcast %cst_77 : f32 to vector<4x8xf32>
    %87 = arith.cmpf oge, %85, %86 : vector<4x8xf32>
    %cst_78 = arith.constant 1.000000e-01 : f32
    %88 = vector.broadcast %cst_78 : f32 to vector<4x8xf32>
    %89 = arith.mulf %88, %85 : vector<4x8xf32>
    %90 = arith.select %87, %85, %89 : vector<4x8xi1>, vector<4x8xf32>
    %c0_79 = arith.constant 0 : index
    %c0_80 = arith.constant 0 : index
    %c0_81 = arith.constant 0 : index
    %c0_82 = arith.constant 0 : index
    %91 = vector.load %arg14[%c0_79, %c0_80, %c0_81, %c0_82] : memref<1x1x4x8xf32, #tpu.memory_space<vmem>>, vector<1x1x4x8xf32>
    %92 = vector.shape_cast %91 : vector<1x1x4x8xf32> to vector<4x8xf32>
    %93 = vector.shape_cast %90 : vector<4x8xf32> to vector<1x1x4x8xf32>
    tpu.vector_store %arg14[%c0_79, %c0_80, %c0_81, %c0_82], %93 {strides = array<i32>} : memref<1x1x4x8xf32, #tpu.memory_space<vmem>>, vector<1x1x4x8xf32>,
    %cst_83 = arith.constant 0.000000e+00 : f32
    %94 = vector.broadcast %cst_83 : f32 to vector<2x8xf32>
    %c0_84 = arith.constant 0 : index
    %c0_85 = arith.constant 0 : index
    %95 = vector.load %arg18[%c0_84, %c0_85] : memref<20x8xf32, #tpu.memory_space<vmem>>, vector<2x8xf32>
    tpu.vector_store %arg18[%c0_84, %c0_85], %94 {strides = array<i32>} : memref<20x8xf32, #tpu.memory_space<vmem>>, vector<2x8xf32>,
    %c6 = arith.constant 6 : index
    %c0_86 = arith.constant 0 : index
    %96 = vector.load %arg18[%c6, %c0_86] : memref<20x8xf32, #tpu.memory_space<vmem>>, vector<2x8xf32>
    tpu.vector_store %arg18[%c6, %c0_86], %94 {strides = array<i32>} : memref<20x8xf32, #tpu.memory_space<vmem>>, vector<2x8xf32>,
    %c2_87 = arith.constant 2 : index
    %c0_88 = arith.constant 0 : index
    %97 = vector.load %arg18[%c2_87, %c0_88] : memref<20x8xf32, #tpu.memory_space<vmem>>, vector<4x8xf32>
    tpu.vector_store %arg18[%c2_87, %c0_88], %90 {strides = array<i32>} : memref<20x8xf32, #tpu.memory_space<vmem>>, vector<4x8xf32>,
    %cst_89 = arith.constant 0.000000e+00 : f32
    %98 = vector.broadcast %cst_89 : f32 to vector<2x8xf32>
    %c0_90 = arith.constant 0 : index
    %c0_91 = arith.constant 0 : index
    %99 = tpu.strided_load %arg18[%c0_90, %c0_91] {strides = array<i32: 2, 1>} : memref<20x8xf32, #tpu.memory_space<vmem>>, vector<2x8xf32>
    %c0_92 = arith.constant 0 : index
    %c0_93 = arith.constant 0 : index
    %c0_94 = arith.constant 0 : index
    %100 = vector.load %arg5[%c0_92, %c0_93, %c0_94] : memref<5x8x8xf32, #tpu.memory_space<vmem>>, vector<1x8x8xf32>
    %101 = vector.shape_cast %100 : vector<1x8x8xf32> to vector<8x8xf32>
    %cst_95 = arith.constant dense<0.000000e+00> : vector<2x8xf32>
    %102 = tpu.matmul %99, %101, %cst_95 {dimension_numbers = #tpu.dot_dimension_numbers<[1], [0], [0], [1], [0, 0, 1, 1], [], []>} : vector<2x8xf32>, vector<8x8xf32>, vector<2x8xf32> -> vector<2x8xf32>
    %103 = arith.addf %98, %102 : vector<2x8xf32>
    %c1_96 = arith.constant 1 : index
    %c0_97 = arith.constant 0 : index
    %104 = tpu.strided_load %arg18[%c1_96, %c0_97] {strides = array<i32: 2, 1>} : memref<20x8xf32, #tpu.memory_space<vmem>>, vector<2x8xf32>
    %c1_98 = arith.constant 1 : index
    %c0_99 = arith.constant 0 : index
    %c0_100 = arith.constant 0 : index
    %105 = vector.load %arg5[%c1_98, %c0_99, %c0_100] : memref<5x8x8xf32, #tpu.memory_space<vmem>>, vector<1x8x8xf32>
    %106 = vector.shape_cast %105 : vector<1x8x8xf32> to vector<8x8xf32>
    %cst_101 = arith.constant dense<0.000000e+00> : vector<2x8xf32>
    %107 = tpu.matmul %104, %106, %cst_101 {dimension_numbers = #tpu.dot_dimension_numbers<[1], [0], [0], [1], [0, 0, 1, 1], [], []>} : vector<2x8xf32>, vector<8x8xf32>, vector<2x8xf32> -> vector<2x8xf32>
    %108 = arith.addf %103, %107 : vector<2x8xf32>
    %c2_102 = arith.constant 2 : index
    %c0_103 = arith.constant 0 : index
    %109 = tpu.strided_load %arg18[%c2_102, %c0_103] {strides = array<i32: 2, 1>} : memref<20x8xf32, #tpu.memory_space<vmem>>, vector<2x8xf32>
    %c2_104 = arith.constant 2 : index
    %c0_105 = arith.constant 0 : index
    %c0_106 = arith.constant 0 : index
    %110 = vector.load %arg5[%c2_104, %c0_105, %c0_106] : memref<5x8x8xf32, #tpu.memory_space<vmem>>, vector<1x8x8xf32>
    %111 = vector.shape_cast %110 : vector<1x8x8xf32> to vector<8x8xf32>
    %cst_107 = arith.constant dense<0.000000e+00> : vector<2x8xf32>
    %112 = tpu.matmul %109, %111, %cst_107 {dimension_numbers = #tpu.dot_dimension_numbers<[1], [0], [0], [1], [0, 0, 1, 1], [], []>} : vector<2x8xf32>, vector<8x8xf32>, vector<2x8xf32> -> vector<2x8xf32>
    %113 = arith.addf %108, %112 : vector<2x8xf32>
    %c3_108 = arith.constant 3 : index
    %c0_109 = arith.constant 0 : index
    %114 = tpu.strided_load %arg18[%c3_108, %c0_109] {strides = array<i32: 2, 1>} : memref<20x8xf32, #tpu.memory_space<vmem>>, vector<2x8xf32>
    %c3_110 = arith.constant 3 : index
    %c0_111 = arith.constant 0 : index
    %c0_112 = arith.constant 0 : index
    %115 = vector.load %arg5[%c3_110, %c0_111, %c0_112] : memref<5x8x8xf32, #tpu.memory_space<vmem>>, vector<1x8x8xf32>
    %116 = vector.shape_cast %115 : vector<1x8x8xf32> to vector<8x8xf32>
    %cst_113 = arith.constant dense<0.000000e+00> : vector<2x8xf32>
    %117 = tpu.matmul %114, %116, %cst_113 {dimension_numbers = #tpu.dot_dimension_numbers<[1], [0], [0], [1], [0, 0, 1, 1], [], []>} : vector<2x8xf32>, vector<8x8xf32>, vector<2x8xf32> -> vector<2x8xf32>
    %118 = arith.addf %113, %117 : vector<2x8xf32>
    %c4_114 = arith.constant 4 : index
    %c0_115 = arith.constant 0 : index
    %119 = tpu.strided_load %arg18[%c4_114, %c0_115] {strides = array<i32: 2, 1>} : memref<20x8xf32, #tpu.memory_space<vmem>>, vector<2x8xf32>
    %c4_116 = arith.constant 4 : index
    %c0_117 = arith.constant 0 : index
    %c0_118 = arith.constant 0 : index
    %120 = vector.load %arg5[%c4_116, %c0_117, %c0_118] : memref<5x8x8xf32, #tpu.memory_space<vmem>>, vector<1x8x8xf32>
    %121 = vector.shape_cast %120 : vector<1x8x8xf32> to vector<8x8xf32>
    %cst_119 = arith.constant dense<0.000000e+00> : vector<2x8xf32>
    %122 = tpu.matmul %119, %121, %cst_119 {dimension_numbers = #tpu.dot_dimension_numbers<[1], [0], [0], [1], [0, 0, 1, 1], [], []>} : vector<2x8xf32>, vector<8x8xf32>, vector<2x8xf32> -> vector<2x8xf32>
    %123 = arith.addf %118, %122 : vector<2x8xf32>
    %c0_120 = arith.constant 0 : index
    %c0_121 = arith.constant 0 : index
    %124 = vector.load %arg10[%c0_120, %c0_121] : memref<1x8xf32, #tpu.memory_space<vmem>>, vector<1x8xf32>
    %125 = vector.broadcast %124 : vector<1x8xf32> to vector<2x8xf32>
    %126 = arith.addf %123, %125 : vector<2x8xf32>
    %cst_122 = arith.constant 0.000000e+00 : f32
    %127 = vector.broadcast %cst_122 : f32 to vector<2x8xf32>
    %128 = arith.cmpf oge, %126, %127 : vector<2x8xf32>
    %cst_123 = arith.constant 1.000000e-01 : f32
    %129 = vector.broadcast %cst_123 : f32 to vector<2x8xf32>
    %130 = arith.mulf %129, %126 : vector<2x8xf32>
    %131 = arith.select %128, %126, %130 : vector<2x8xi1>, vector<2x8xf32>
    %c0_124 = arith.constant 0 : index
    %c0_125 = arith.constant 0 : index
    %c0_126 = arith.constant 0 : index
    %c0_127 = arith.constant 0 : index
    %132 = vector.load %arg15[%c0_124, %c0_125, %c0_126, %c0_127] : memref<1x1x2x8xf32, #tpu.memory_space<vmem>>, vector<1x1x2x8xf32>
    %133 = vector.shape_cast %132 : vector<1x1x2x8xf32> to vector<2x8xf32>
    %134 = vector.shape_cast %131 : vector<2x8xf32> to vector<1x1x2x8xf32>
    tpu.vector_store %arg15[%c0_124, %c0_125, %c0_126, %c0_127], %134 {strides = array<i32>} : memref<1x1x2x8xf32, #tpu.memory_space<vmem>>, vector<1x1x2x8xf32>,
    %cst_128 = arith.constant 0.000000e+00 : f32
    %135 = vector.broadcast %cst_128 : f32 to vector<2x8xf32>
    %c0_129 = arith.constant 0 : index
    %c0_130 = arith.constant 0 : index
    %136 = vector.load %arg18[%c0_129, %c0_130] : memref<20x8xf32, #tpu.memory_space<vmem>>, vector<2x8xf32>
    tpu.vector_store %arg18[%c0_129, %c0_130], %135 {strides = array<i32>} : memref<20x8xf32, #tpu.memory_space<vmem>>, vector<2x8xf32>,
    %c4_131 = arith.constant 4 : index
    %c0_132 = arith.constant 0 : index
    %137 = vector.load %arg18[%c4_131, %c0_132] : memref<20x8xf32, #tpu.memory_space<vmem>>, vector<2x8xf32>
    tpu.vector_store %arg18[%c4_131, %c0_132], %135 {strides = array<i32>} : memref<20x8xf32, #tpu.memory_space<vmem>>, vector<2x8xf32>,
    %c2_133 = arith.constant 2 : index
    %c0_134 = arith.constant 0 : index
    %138 = vector.load %arg18[%c2_133, %c0_134] : memref<20x8xf32, #tpu.memory_space<vmem>>, vector<2x8xf32>
    tpu.vector_store %arg18[%c2_133, %c0_134], %131 {strides = array<i32>} : memref<20x8xf32, #tpu.memory_space<vmem>>, vector<2x8xf32>,
    %cst_135 = arith.constant 0.000000e+00 : f32
    %139 = vector.broadcast %cst_135 : f32 to vector<2x8xf32>
    %c0_136 = arith.constant 0 : index
    %c0_137 = arith.constant 0 : index
    %140 = vector.load %arg18[%c0_136, %c0_137] : memref<20x8xf32, #tpu.memory_space<vmem>>, vector<2x8xf32>
    %c0_138 = arith.constant 0 : index
    %c0_139 = arith.constant 0 : index
    %c0_140 = arith.constant 0 : index
    %141 = vector.load %arg6[%c0_138, %c0_139, %c0_140] : memref<5x8x8xf32, #tpu.memory_space<vmem>>, vector<1x8x8xf32>
    %142 = vector.shape_cast %141 : vector<1x8x8xf32> to vector<8x8xf32>
    %cst_141 = arith.constant dense<0.000000e+00> : vector<2x8xf32>
    %143 = tpu.matmul %140, %142, %cst_141 {dimension_numbers = #tpu.dot_dimension_numbers<[1], [0], [0], [1], [0, 0, 1, 1], [], []>} : vector<2x8xf32>, vector<8x8xf32>, vector<2x8xf32> -> vector<2x8xf32>
    %144 = arith.addf %139, %143 : vector<2x8xf32>
    %c1_142 = arith.constant 1 : index
    %c0_143 = arith.constant 0 : index
    %145 = vector.load %arg18[%c1_142, %c0_143] : memref<20x8xf32, #tpu.memory_space<vmem>>, vector<2x8xf32>
    %c1_144 = arith.constant 1 : index
    %c0_145 = arith.constant 0 : index
    %c0_146 = arith.constant 0 : index
    %146 = vector.load %arg6[%c1_144, %c0_145, %c0_146] : memref<5x8x8xf32, #tpu.memory_space<vmem>>, vector<1x8x8xf32>
    %147 = vector.shape_cast %146 : vector<1x8x8xf32> to vector<8x8xf32>
    %cst_147 = arith.constant dense<0.000000e+00> : vector<2x8xf32>
    %148 = tpu.matmul %145, %147, %cst_147 {dimension_numbers = #tpu.dot_dimension_numbers<[1], [0], [0], [1], [0, 0, 1, 1], [], []>} : vector<2x8xf32>, vector<8x8xf32>, vector<2x8xf32> -> vector<2x8xf32>
    %149 = arith.addf %144, %148 : vector<2x8xf32>
    %c2_148 = arith.constant 2 : index
    %c0_149 = arith.constant 0 : index
    %150 = vector.load %arg18[%c2_148, %c0_149] : memref<20x8xf32, #tpu.memory_space<vmem>>, vector<2x8xf32>
    %c2_150 = arith.constant 2 : index
    %c0_151 = arith.constant 0 : index
    %c0_152 = arith.constant 0 : index
    %151 = vector.load %arg6[%c2_150, %c0_151, %c0_152] : memref<5x8x8xf32, #tpu.memory_space<vmem>>, vector<1x8x8xf32>
    %152 = vector.shape_cast %151 : vector<1x8x8xf32> to vector<8x8xf32>
    %cst_153 = arith.constant dense<0.000000e+00> : vector<2x8xf32>
    %153 = tpu.matmul %150, %152, %cst_153 {dimension_numbers = #tpu.dot_dimension_numbers<[1], [0], [0], [1], [0, 0, 1, 1], [], []>} : vector<2x8xf32>, vector<8x8xf32>, vector<2x8xf32> -> vector<2x8xf32>
    %154 = arith.addf %149, %153 : vector<2x8xf32>
    %c3_154 = arith.constant 3 : index
    %c0_155 = arith.constant 0 : index
    %155 = vector.load %arg18[%c3_154, %c0_155] : memref<20x8xf32, #tpu.memory_space<vmem>>, vector<2x8xf32>
    %c3_156 = arith.constant 3 : index
    %c0_157 = arith.constant 0 : index
    %c0_158 = arith.constant 0 : index
    %156 = vector.load %arg6[%c3_156, %c0_157, %c0_158] : memref<5x8x8xf32, #tpu.memory_space<vmem>>, vector<1x8x8xf32>
    %157 = vector.shape_cast %156 : vector<1x8x8xf32> to vector<8x8xf32>
    %cst_159 = arith.constant dense<0.000000e+00> : vector<2x8xf32>
    %158 = tpu.matmul %155, %157, %cst_159 {dimension_numbers = #tpu.dot_dimension_numbers<[1], [0], [0], [1], [0, 0, 1, 1], [], []>} : vector<2x8xf32>, vector<8x8xf32>, vector<2x8xf32> -> vector<2x8xf32>
    %159 = arith.addf %154, %158 : vector<2x8xf32>
    %c4_160 = arith.constant 4 : index
    %c0_161 = arith.constant 0 : index
    %160 = vector.load %arg18[%c4_160, %c0_161] : memref<20x8xf32, #tpu.memory_space<vmem>>, vector<2x8xf32>
    %c4_162 = arith.constant 4 : index
    %c0_163 = arith.constant 0 : index
    %c0_164 = arith.constant 0 : index
    %161 = vector.load %arg6[%c4_162, %c0_163, %c0_164] : memref<5x8x8xf32, #tpu.memory_space<vmem>>, vector<1x8x8xf32>
    %162 = vector.shape_cast %161 : vector<1x8x8xf32> to vector<8x8xf32>
    %cst_165 = arith.constant dense<0.000000e+00> : vector<2x8xf32>
    %163 = tpu.matmul %160, %162, %cst_165 {dimension_numbers = #tpu.dot_dimension_numbers<[1], [0], [0], [1], [0, 0, 1, 1], [], []>} : vector<2x8xf32>, vector<8x8xf32>, vector<2x8xf32> -> vector<2x8xf32>
    %164 = arith.addf %159, %163 : vector<2x8xf32>
    %c0_166 = arith.constant 0 : index
    %c0_167 = arith.constant 0 : index
    %165 = vector.load %arg11[%c0_166, %c0_167] : memref<1x8xf32, #tpu.memory_space<vmem>>, vector<1x8xf32>
    %166 = vector.broadcast %165 : vector<1x8xf32> to vector<2x8xf32>
    %167 = arith.addf %164, %166 : vector<2x8xf32>
    %cst_168 = arith.constant 0.000000e+00 : f32
    %168 = vector.broadcast %cst_168 : f32 to vector<2x8xf32>
    %169 = arith.cmpf oge, %167, %168 : vector<2x8xf32>
    %cst_169 = arith.constant 1.000000e-01 : f32
    %170 = vector.broadcast %cst_169 : f32 to vector<2x8xf32>
    %171 = arith.mulf %170, %167 : vector<2x8xf32>
    %172 = arith.select %169, %167, %171 : vector<2x8xi1>, vector<2x8xf32>
    %c0_170 = arith.constant 0 : index
    %c0_171 = arith.constant 0 : index
    %c0_172 = arith.constant 0 : index
    %c0_173 = arith.constant 0 : index
    %173 = vector.load %arg16[%c0_170, %c0_171, %c0_172, %c0_173] : memref<1x1x2x8xf32, #tpu.memory_space<vmem>>, vector<1x1x2x8xf32>
    %174 = vector.shape_cast %173 : vector<1x1x2x8xf32> to vector<2x8xf32>
    %175 = vector.shape_cast %172 : vector<2x8xf32> to vector<1x1x2x8xf32>
    tpu.vector_store %arg16[%c0_170, %c0_171, %c0_172, %c0_173], %175 {strides = array<i32>} : memref<1x1x2x8xf32, #tpu.memory_space<vmem>>, vector<1x1x2x8xf32>,
    %cst_174 = arith.constant 0.000000e+00 : f32
    %176 = vector.broadcast %cst_174 : f32 to vector<1x8xf32>
    %c0_175 = arith.constant 0 : index
    %c0_176 = arith.constant 0 : index
    %177 = vector.load %arg18[%c0_175, %c0_176] : memref<20x8xf32, #tpu.memory_space<vmem>>, vector<1x8xf32>
    tpu.vector_store %arg18[%c0_175, %c0_176], %176 {strides = array<i32>} : memref<20x8xf32, #tpu.memory_space<vmem>>, vector<1x8xf32>,
    %c3_177 = arith.constant 3 : index
    %c0_178 = arith.constant 0 : index
    %178 = vector.load %arg18[%c3_177, %c0_178] : memref<20x8xf32, #tpu.memory_space<vmem>>, vector<1x8xf32>
    tpu.vector_store %arg18[%c3_177, %c0_178], %176 {strides = array<i32>} : memref<20x8xf32, #tpu.memory_space<vmem>>, vector<1x8xf32>,
    %c1_179 = arith.constant 1 : index
    %c0_180 = arith.constant 0 : index
    %179 = vector.load %arg18[%c1_179, %c0_180] : memref<20x8xf32, #tpu.memory_space<vmem>>, vector<2x8xf32>
    tpu.vector_store %arg18[%c1_179, %c0_180], %172 {strides = array<i32>} : memref<20x8xf32, #tpu.memory_space<vmem>>, vector<2x8xf32>,
    %cst_181 = arith.constant 0.000000e+00 : f32
    %180 = vector.broadcast %cst_181 : f32 to vector<2x1xf32>
    %c0_182 = arith.constant 0 : index
    %c0_183 = arith.constant 0 : index
    %181 = vector.load %arg18[%c0_182, %c0_183] : memref<20x8xf32, #tpu.memory_space<vmem>>, vector<2x8xf32>
    %c0_184 = arith.constant 0 : index
    %c0_185 = arith.constant 0 : index
    %c0_186 = arith.constant 0 : index
    %182 = vector.load %arg7[%c0_184, %c0_185, %c0_186] : memref<3x8x1xf32, #tpu.memory_space<vmem>>, vector<1x8x1xf32>
    %183 = vector.shape_cast %182 : vector<1x8x1xf32> to vector<8x1xf32>
    %cst_187 = arith.constant dense<0.000000e+00> : vector<2x1xf32>
    %184 = tpu.matmul %181, %183, %cst_187 {dimension_numbers = #tpu.dot_dimension_numbers<[1], [0], [0], [1], [0, 0, 1, 1], [], []>} : vector<2x8xf32>, vector<8x1xf32>, vector<2x1xf32> -> vector<2x1xf32>
    %185 = arith.addf %180, %184 : vector<2x1xf32>
    %c1_188 = arith.constant 1 : index
    %c0_189 = arith.constant 0 : index
    %186 = vector.load %arg18[%c1_188, %c0_189] : memref<20x8xf32, #tpu.memory_space<vmem>>, vector<2x8xf32>
    %c1_190 = arith.constant 1 : index
    %c0_191 = arith.constant 0 : index
    %c0_192 = arith.constant 0 : index
    %187 = vector.load %arg7[%c1_190, %c0_191, %c0_192] : memref<3x8x1xf32, #tpu.memory_space<vmem>>, vector<1x8x1xf32>
    %188 = vector.shape_cast %187 : vector<1x8x1xf32> to vector<8x1xf32>
    %cst_193 = arith.constant dense<0.000000e+00> : vector<2x1xf32>
    %189 = tpu.matmul %186, %188, %cst_193 {dimension_numbers = #tpu.dot_dimension_numbers<[1], [0], [0], [1], [0, 0, 1, 1], [], []>} : vector<2x8xf32>, vector<8x1xf32>, vector<2x1xf32> -> vector<2x1xf32>
    %190 = arith.addf %185, %189 : vector<2x1xf32>
    %c2_194 = arith.constant 2 : index
    %c0_195 = arith.constant 0 : index
    %191 = vector.load %arg18[%c2_194, %c0_195] : memref<20x8xf32, #tpu.memory_space<vmem>>, vector<2x8xf32>
    %c2_196 = arith.constant 2 : index
    %c0_197 = arith.constant 0 : index
    %c0_198 = arith.constant 0 : index
    %192 = vector.load %arg7[%c2_196, %c0_197, %c0_198] : memref<3x8x1xf32, #tpu.memory_space<vmem>>, vector<1x8x1xf32>
    %193 = vector.shape_cast %192 : vector<1x8x1xf32> to vector<8x1xf32>
    %cst_199 = arith.constant dense<0.000000e+00> : vector<2x1xf32>
    %194 = tpu.matmul %191, %193, %cst_199 {dimension_numbers = #tpu.dot_dimension_numbers<[1], [0], [0], [1], [0, 0, 1, 1], [], []>} : vector<2x8xf32>, vector<8x1xf32>, vector<2x1xf32> -> vector<2x1xf32>
    %195 = arith.addf %190, %194 : vector<2x1xf32>
    %c0_200 = arith.constant 0 : index
    %c0_201 = arith.constant 0 : index
    %196 = vector.load %arg12[%c0_200, %c0_201] : memref<1x1xf32, #tpu.memory_space<vmem>>, vector<1x1xf32>
    %197 = vector.broadcast %196 : vector<1x1xf32> to vector<2x1xf32>
    %198 = arith.addf %195, %197 : vector<2x1xf32>
    %c0_202 = arith.constant 0 : index
    %c0_203 = arith.constant 0 : index
    %c0_204 = arith.constant 0 : index
    %c0_205 = arith.constant 0 : index
    %199 = vector.load %arg17[%c0_202, %c0_203, %c0_204, %c0_205] : memref<1x1x2x1xf32, #tpu.memory_space<vmem>>, vector<1x1x2x1xf32>
    %200 = vector.shape_cast %199 : vector<1x1x2x1xf32> to vector<2x1xf32>
    %201 = vector.shape_cast %198 : vector<2x1xf32> to vector<1x1x2x1xf32>
    tpu.vector_store %arg17[%c0_202, %c0_203, %c0_204, %c0_205], %201 {strides = array<i32>} : memref<1x1x2x1xf32, #tpu.memory_space<vmem>>, vector<1x1x2x1xf32>,
    return
  }
  func.func @transform_0(%arg0: i32, %arg1: i32) -> (i32, i32, i32, i32) {
    %c0_i32 = arith.constant 0 : i32
    %c0_i32_0 = arith.constant 0 : i32
    %c0_i32_1 = arith.constant 0 : i32
    return %arg0, %arg1, %c0_i32, %c0_i32_0 : i32, i32, i32, i32
  }
  func.func @transform_1(%arg0: i32, %arg1: i32) -> (i32, i32, i32) {
    %c0_i32 = arith.constant 0 : i32
    %c0_i32_0 = arith.constant 0 : i32
    %c0_i32_1 = arith.constant 0 : i32
    %c0_i32_2 = arith.constant 0 : i32
    return %c0_i32, %c0_i32_0, %c0_i32_1 : i32, i32, i32
  }
  func.func @transform_2(%arg0: i32, %arg1: i32) -> (i32, i32, i32) {
    %c0_i32 = arith.constant 0 : i32
    %c0_i32_0 = arith.constant 0 : i32
    %c0_i32_1 = arith.constant 0 : i32
    %c0_i32_2 = arith.constant 0 : i32
    return %c0_i32, %c0_i32_0, %c0_i32_1 : i32, i32, i32
  }
  func.func @transform_3(%arg0: i32, %arg1: i32) -> (i32, i32, i32) {
    %c0_i32 = arith.constant 0 : i32
    %c0_i32_0 = arith.constant 0 : i32
    %c0_i32_1 = arith.constant 0 : i32
    %c0_i32_2 = arith.constant 0 : i32
    return %c0_i32, %c0_i32_0, %c0_i32_1 : i32, i32, i32
  }
  func.func @transform_4(%arg0: i32, %arg1: i32) -> (i32, i32, i32) {
    %c0_i32 = arith.constant 0 : i32
    %c0_i32_0 = arith.constant 0 : i32
    %c0_i32_1 = arith.constant 0 : i32
    %c0_i32_2 = arith.constant 0 : i32
    return %c0_i32, %c0_i32_0, %c0_i32_1 : i32, i32, i32
  }
  func.func @transform_5(%arg0: i32, %arg1: i32) -> (i32, i32, i32) {
    %c0_i32 = arith.constant 0 : i32
    %c0_i32_0 = arith.constant 0 : i32
    %c0_i32_1 = arith.constant 0 : i32
    %c0_i32_2 = arith.constant 0 : i32
    return %c0_i32, %c0_i32_0, %c0_i32_1 : i32, i32, i32
  }
  func.func @transform_6(%arg0: i32, %arg1: i32) -> (i32, i32) {
    %c0_i32 = arith.constant 0 : i32
    %c0_i32_0 = arith.constant 0 : i32
    %c0_i32_1 = arith.constant 0 : i32
    return %c0_i32, %c0_i32_0 : i32, i32
  }
  func.func @transform_7(%arg0: i32, %arg1: i32) -> (i32, i32) {
    %c0_i32 = arith.constant 0 : i32
    %c0_i32_0 = arith.constant 0 : i32
    %c0_i32_1 = arith.constant 0 : i32
    return %c0_i32, %c0_i32_0 : i32, i32
  }
  func.func @transform_8(%arg0: i32, %arg1: i32) -> (i32, i32) {
    %c0_i32 = arith.constant 0 : i32
    %c0_i32_0 = arith.constant 0 : i32
    %c0_i32_1 = arith.constant 0 : i32
    return %c0_i32, %c0_i32_0 : i32, i32
  }
  func.func @transform_9(%arg0: i32, %arg1: i32) -> (i32, i32) {
    %c0_i32 = arith.constant 0 : i32
    %c0_i32_0 = arith.constant 0 : i32
    %c0_i32_1 = arith.constant 0 : i32
    return %c0_i32, %c0_i32_0 : i32, i32
  }
  func.func @transform_10(%arg0: i32, %arg1: i32) -> (i32, i32) {
    %c0_i32 = arith.constant 0 : i32
    %c0_i32_0 = arith.constant 0 : i32
    %c0_i32_1 = arith.constant 0 : i32
    return %c0_i32, %c0_i32_0 : i32, i32
  }
  func.func @transform_11(%arg0: i32, %arg1: i32) -> (i32, i32, i32, i32) {
    %c0_i32 = arith.constant 0 : i32
    %c0_i32_0 = arith.constant 0 : i32
    %c0_i32_1 = arith.constant 0 : i32
    return %arg0, %arg1, %c0_i32, %c0_i32_0 : i32, i32, i32, i32
  }
  func.func @transform_12(%arg0: i32, %arg1: i32) -> (i32, i32, i32, i32) {
    %c0_i32 = arith.constant 0 : i32
    %c0_i32_0 = arith.constant 0 : i32
    %c0_i32_1 = arith.constant 0 : i32
    return %arg0, %arg1, %c0_i32, %c0_i32_0 : i32, i32, i32, i32
  }
  func.func @transform_13(%arg0: i32, %arg1: i32) -> (i32, i32, i32, i32) {
    %c0_i32 = arith.constant 0 : i32
    %c0_i32_0 = arith.constant 0 : i32
    %c0_i32_1 = arith.constant 0 : i32
    return %arg0, %arg1, %c0_i32, %c0_i32_0 : i32, i32, i32, i32
  }
  func.func @transform_14(%arg0: i32, %arg1: i32) -> (i32, i32, i32, i32) {
    %c0_i32 = arith.constant 0 : i32
    %c0_i32_0 = arith.constant 0 : i32
    %c0_i32_1 = arith.constant 0 : i32
    return %arg0, %arg1, %c0_i32, %c0_i32_0 : i32, i32, i32, i32
  }
  func.func @transform_15(%arg0: i32, %arg1: i32) -> (i32, i32, i32, i32) {
    %c0_i32 = arith.constant 0 : i32
    %c0_i32_0 = arith.constant 0 : i32
    %c0_i32_1 = arith.constant 0 : i32
    return %arg0, %arg1, %c0_i32, %c0_i32_0 : i32, i32, i32, i32
  }
}

module attributes {stable_mosaic.version = 11 : i64} {
  func.func @kernel(%arg0: i32, %arg1: i32, %arg2: memref<1x1x24x1xf32, #tpu.memory_space<vmem>>, %arg3: memref<5x1x4xf32, #tpu.memory_space<vmem>>, %arg4: memref<5x4x8xf32, #tpu.memory_space<vmem>>, %arg5: memref<5x8x8xf32, #tpu.memory_space<vmem>>, %arg6: memref<5x8x8xf32, #tpu.memory_space<vmem>>, %arg7: memref<3x8x1xf32, #tpu.memory_space<vmem>>, %arg8: memref<1x4xf32, #tpu.memory_space<vmem>>, %arg9: memref<1x8xf32, #tpu.memory_space<vmem>>, %arg10: memref<1x8xf32, #tpu.memory_space<vmem>>, %arg11: memref<1x8xf32, #tpu.memory_space<vmem>>, %arg12: memref<1x1xf32, #tpu.memory_space<vmem>>, %arg13: memref<1x1x12x4xf32, #tpu.memory_space<vmem>>, %arg14: memref<1x1x6x8xf32, #tpu.memory_space<vmem>>, %arg15: memref<1x1x3x8xf32, #tpu.memory_space<vmem>>, %arg16: memref<1x1x3x8xf32, #tpu.memory_space<vmem>>, %arg17: memref<1x1x3x1xf32, #tpu.memory_space<vmem>>, %arg18: memref<28x8xf32, #tpu.memory_space<vmem>>) attributes {dimension_semantics = [#tpu.dimension_semantics<parallel>, #tpu.dimension_semantics<parallel>], iteration_bounds = array<i64: 2, 4>, scalar_prefetch = 0 : i64, scratch_operands = 1 : i64, tpu.core_type = #tpu.core_type<tc>, window_params = [{transform_indices = @transform_0, window_bounds = array<i64: 1, 1, 24, 1>}, {pipeline_mode = #tpu.pipeline_mode<synchronous>, transform_indices = @transform_1, window_bounds = array<i64: 5, 1, 4>}, {pipeline_mode = #tpu.pipeline_mode<synchronous>, transform_indices = @transform_2, window_bounds = array<i64: 5, 4, 8>}, {pipeline_mode = #tpu.pipeline_mode<synchronous>, transform_indices = @transform_3, window_bounds = array<i64: 5, 8, 8>}, {pipeline_mode = #tpu.pipeline_mode<synchronous>, transform_indices = @transform_4, window_bounds = array<i64: 5, 8, 8>}, {pipeline_mode = #tpu.pipeline_mode<synchronous>, transform_indices = @transform_5, window_bounds = array<i64: 3, 8, 1>}, {pipeline_mode = #tpu.pipeline_mode<synchronous>, transform_indices = @transform_6, window_bounds = array<i64: 1, 4>}, {pipeline_mode = #tpu.pipeline_mode<synchronous>, transform_indices = @transform_7, window_bounds = array<i64: 1, 8>}, {pipeline_mode = #tpu.pipeline_mode<synchronous>, transform_indices = @transform_8, window_bounds = array<i64: 1, 8>}, {pipeline_mode = #tpu.pipeline_mode<synchronous>, transform_indices = @transform_9, window_bounds = array<i64: 1, 8>}, {pipeline_mode = #tpu.pipeline_mode<synchronous>, transform_indices = @transform_10, window_bounds = array<i64: 1, 1>}, {transform_indices = @transform_11, window_bounds = array<i64: 1, 1, 12, 4>}, {transform_indices = @transform_12, window_bounds = array<i64: 1, 1, 6, 8>}, {transform_indices = @transform_13, window_bounds = array<i64: 1, 1, 3, 8>}, {transform_indices = @transform_14, window_bounds = array<i64: 1, 1, 3, 8>}, {transform_indices = @transform_15, window_bounds = array<i64: 1, 1, 3, 1>}]} {
    %c0 = arith.constant 0 : index
    %c0_0 = arith.constant 0 : index
    %c0_1 = arith.constant 0 : index
    %c0_2 = arith.constant 0 : index
    %0 = vector.load %arg2[%c0, %c0_0, %c0_1, %c0_2] : memref<1x1x24x1xf32, #tpu.memory_space<vmem>>, vector<1x1x24x1xf32>
    %1 = vector.shape_cast %0 : vector<1x1x24x1xf32> to vector<24x1xf32>
    %cst = arith.constant 0.000000e+00 : f32
    %2 = vector.broadcast %cst : f32 to vector<2x1xf32>
    %c0_3 = arith.constant 0 : index
    %c0_4 = arith.constant 0 : index
    %3 = vector.load %arg18[%c0_3, %c0_4] : memref<28x8xf32, #tpu.memory_space<vmem>>, vector<2x1xf32>
    tpu.vector_store %arg18[%c0_3, %c0_4], %2 {strides = array<i32>} : memref<28x8xf32, #tpu.memory_space<vmem>>, vector<2x1xf32>,
    %c26 = arith.constant 26 : index
    %c0_5 = arith.constant 0 : index
    %4 = vector.load %arg18[%c26, %c0_5] : memref<28x8xf32, #tpu.memory_space<vmem>>, vector<2x1xf32>
    tpu.vector_store %arg18[%c26, %c0_5], %2 {strides = array<i32>} : memref<28x8xf32, #tpu.memory_space<vmem>>, vector<2x1xf32>,
    %c2 = arith.constant 2 : index
    %c0_6 = arith.constant 0 : index
    %5 = vector.load %arg18[%c2, %c0_6] : memref<28x8xf32, #tpu.memory_space<vmem>>, vector<24x1xf32>
    tpu.vector_store %arg18[%c2, %c0_6], %1 {strides = array<i32>} : memref<28x8xf32, #tpu.memory_space<vmem>>, vector<24x1xf32>,
    %cst_7 = arith.constant 0.000000e+00 : f32
    %6 = vector.broadcast %cst_7 : f32 to vector<12x4xf32>
    %c0_8 = arith.constant 0 : index
    %c0_9 = arith.constant 0 : index
    %7 = tpu.strided_load %arg18[%c0_8, %c0_9] {strides = array<i32: 2, 1>} : memref<28x8xf32, #tpu.memory_space<vmem>>, vector<12x1xf32>
    %c0_10 = arith.constant 0 : index
    %c0_11 = arith.constant 0 : index
    %c0_12 = arith.constant 0 : index
    %8 = vector.load %arg3[%c0_10, %c0_11, %c0_12] : memref<5x1x4xf32, #tpu.memory_space<vmem>>, vector<1x1x4xf32>
    %9 = vector.shape_cast %8 : vector<1x1x4xf32> to vector<1x4xf32>
    %10 = vector.broadcast %7 : vector<12x1xf32> to vector<12x4xf32>
    %11 = vector.broadcast %9 : vector<1x4xf32> to vector<12x4xf32>
    %12 = arith.mulf %10, %11 : vector<12x4xf32>
    %13 = arith.addf %6, %12 : vector<12x4xf32>
    %c1 = arith.constant 1 : index
    %c0_13 = arith.constant 0 : index
    %14 = tpu.strided_load %arg18[%c1, %c0_13] {strides = array<i32: 2, 1>} : memref<28x8xf32, #tpu.memory_space<vmem>>, vector<12x1xf32>
    %c1_14 = arith.constant 1 : index
    %c0_15 = arith.constant 0 : index
    %c0_16 = arith.constant 0 : index
    %15 = vector.load %arg3[%c1_14, %c0_15, %c0_16] : memref<5x1x4xf32, #tpu.memory_space<vmem>>, vector<1x1x4xf32>
    %16 = vector.shape_cast %15 : vector<1x1x4xf32> to vector<1x4xf32>
    %17 = vector.broadcast %14 : vector<12x1xf32> to vector<12x4xf32>
    %18 = vector.broadcast %16 : vector<1x4xf32> to vector<12x4xf32>
    %19 = arith.mulf %17, %18 : vector<12x4xf32>
    %20 = arith.addf %13, %19 : vector<12x4xf32>
    %c2_17 = arith.constant 2 : index
    %c0_18 = arith.constant 0 : index
    %21 = tpu.strided_load %arg18[%c2_17, %c0_18] {strides = array<i32: 2, 1>} : memref<28x8xf32, #tpu.memory_space<vmem>>, vector<12x1xf32>
    %c2_19 = arith.constant 2 : index
    %c0_20 = arith.constant 0 : index
    %c0_21 = arith.constant 0 : index
    %22 = vector.load %arg3[%c2_19, %c0_20, %c0_21] : memref<5x1x4xf32, #tpu.memory_space<vmem>>, vector<1x1x4xf32>
    %23 = vector.shape_cast %22 : vector<1x1x4xf32> to vector<1x4xf32>
    %24 = vector.broadcast %21 : vector<12x1xf32> to vector<12x4xf32>
    %25 = vector.broadcast %23 : vector<1x4xf32> to vector<12x4xf32>
    %26 = arith.mulf %24, %25 : vector<12x4xf32>
    %27 = arith.addf %20, %26 : vector<12x4xf32>
    %c3 = arith.constant 3 : index
    %c0_22 = arith.constant 0 : index
    %28 = tpu.strided_load %arg18[%c3, %c0_22] {strides = array<i32: 2, 1>} : memref<28x8xf32, #tpu.memory_space<vmem>>, vector<12x1xf32>
    %c3_23 = arith.constant 3 : index
    %c0_24 = arith.constant 0 : index
    %c0_25 = arith.constant 0 : index
    %29 = vector.load %arg3[%c3_23, %c0_24, %c0_25] : memref<5x1x4xf32, #tpu.memory_space<vmem>>, vector<1x1x4xf32>
    %30 = vector.shape_cast %29 : vector<1x1x4xf32> to vector<1x4xf32>
    %31 = vector.broadcast %28 : vector<12x1xf32> to vector<12x4xf32>
    %32 = vector.broadcast %30 : vector<1x4xf32> to vector<12x4xf32>
    %33 = arith.mulf %31, %32 : vector<12x4xf32>
    %34 = arith.addf %27, %33 : vector<12x4xf32>
    %c4 = arith.constant 4 : index
    %c0_26 = arith.constant 0 : index
    %35 = tpu.strided_load %arg18[%c4, %c0_26] {strides = array<i32: 2, 1>} : memref<28x8xf32, #tpu.memory_space<vmem>>, vector<12x1xf32>
    %c4_27 = arith.constant 4 : index
    %c0_28 = arith.constant 0 : index
    %c0_29 = arith.constant 0 : index
    %36 = vector.load %arg3[%c4_27, %c0_28, %c0_29] : memref<5x1x4xf32, #tpu.memory_space<vmem>>, vector<1x1x4xf32>
    %37 = vector.shape_cast %36 : vector<1x1x4xf32> to vector<1x4xf32>
    %38 = vector.broadcast %35 : vector<12x1xf32> to vector<12x4xf32>
    %39 = vector.broadcast %37 : vector<1x4xf32> to vector<12x4xf32>
    %40 = arith.mulf %38, %39 : vector<12x4xf32>
    %41 = arith.addf %34, %40 : vector<12x4xf32>
    %c0_30 = arith.constant 0 : index
    %c0_31 = arith.constant 0 : index
    %42 = vector.load %arg8[%c0_30, %c0_31] : memref<1x4xf32, #tpu.memory_space<vmem>>, vector<1x4xf32>
    %43 = vector.broadcast %42 : vector<1x4xf32> to vector<12x4xf32>
    %44 = arith.addf %41, %43 : vector<12x4xf32>
    %cst_32 = arith.constant 0.000000e+00 : f32
    %45 = vector.broadcast %cst_32 : f32 to vector<12x4xf32>
    %46 = arith.cmpf oge, %44, %45 : vector<12x4xf32>
    %cst_33 = arith.constant 1.000000e-01 : f32
    %47 = vector.broadcast %cst_33 : f32 to vector<12x4xf32>
    %48 = arith.mulf %47, %44 : vector<12x4xf32>
    %49 = arith.select %46, %44, %48 : vector<12x4xi1>, vector<12x4xf32>
    %c0_34 = arith.constant 0 : index
    %c0_35 = arith.constant 0 : index
    %c0_36 = arith.constant 0 : index
    %c0_37 = arith.constant 0 : index
    %50 = vector.load %arg13[%c0_34, %c0_35, %c0_36, %c0_37] : memref<1x1x12x4xf32, #tpu.memory_space<vmem>>, vector<1x1x12x4xf32>
    %51 = vector.shape_cast %50 : vector<1x1x12x4xf32> to vector<12x4xf32>
    %52 = vector.shape_cast %49 : vector<12x4xf32> to vector<1x1x12x4xf32>
    tpu.vector_store %arg13[%c0_34, %c0_35, %c0_36, %c0_37], %52 {strides = array<i32>} : memref<1x1x12x4xf32, #tpu.memory_space<vmem>>, vector<1x1x12x4xf32>,
    %cst_38 = arith.constant 0.000000e+00 : f32
    %53 = vector.broadcast %cst_38 : f32 to vector<2x4xf32>
    %c0_39 = arith.constant 0 : index
    %c0_40 = arith.constant 0 : index
    %54 = vector.load %arg18[%c0_39, %c0_40] : memref<28x8xf32, #tpu.memory_space<vmem>>, vector<2x4xf32>
    tpu.vector_store %arg18[%c0_39, %c0_40], %53 {strides = array<i32>} : memref<28x8xf32, #tpu.memory_space<vmem>>, vector<2x4xf32>,
    %c14 = arith.constant 14 : index
    %c0_41 = arith.constant 0 : index
    %55 = vector.load %arg18[%c14, %c0_41] : memref<28x8xf32, #tpu.memory_space<vmem>>, vector<2x4xf32>
    tpu.vector_store %arg18[%c14, %c0_41], %53 {strides = array<i32>} : memref<28x8xf32, #tpu.memory_space<vmem>>, vector<2x4xf32>,
    %c2_42 = arith.constant 2 : index
    %c0_43 = arith.constant 0 : index
    %56 = vector.load %arg18[%c2_42, %c0_43] : memref<28x8xf32, #tpu.memory_space<vmem>>, vector<12x4xf32>
    tpu.vector_store %arg18[%c2_42, %c0_43], %49 {strides = array<i32>} : memref<28x8xf32, #tpu.memory_space<vmem>>, vector<12x4xf32>,
    %cst_44 = arith.constant 0.000000e+00 : f32
    %57 = vector.broadcast %cst_44 : f32 to vector<6x8xf32>
    %c0_45 = arith.constant 0 : index
    %c0_46 = arith.constant 0 : index
    %58 = tpu.strided_load %arg18[%c0_45, %c0_46] {strides = array<i32: 2, 1>} : memref<28x8xf32, #tpu.memory_space<vmem>>, vector<6x4xf32>
    %c0_47 = arith.constant 0 : index
    %c0_48 = arith.constant 0 : index
    %c0_49 = arith.constant 0 : index
    %59 = vector.load %arg4[%c0_47, %c0_48, %c0_49] : memref<5x4x8xf32, #tpu.memory_space<vmem>>, vector<1x4x8xf32>
    %60 = vector.shape_cast %59 : vector<1x4x8xf32> to vector<4x8xf32>
    %cst_50 = arith.constant dense<0.000000e+00> : vector<6x8xf32>
    %61 = tpu.matmul %58, %60, %cst_50 {dimension_numbers = #tpu.dot_dimension_numbers<[1], [0], [0], [1], [0, 0, 1, 1], [], []>} : vector<6x4xf32>, vector<4x8xf32>, vector<6x8xf32> -> vector<6x8xf32>
    %62 = arith.addf %57, %61 : vector<6x8xf32>
    %c1_51 = arith.constant 1 : index
    %c0_52 = arith.constant 0 : index
    %63 = tpu.strided_load %arg18[%c1_51, %c0_52] {strides = array<i32: 2, 1>} : memref<28x8xf32, #tpu.memory_space<vmem>>, vector<6x4xf32>
    %c1_53 = arith.constant 1 : index
    %c0_54 = arith.constant 0 : index
    %c0_55 = arith.constant 0 : index
    %64 = vector.load %arg4[%c1_53, %c0_54, %c0_55] : memref<5x4x8xf32, #tpu.memory_space<vmem>>, vector<1x4x8xf32>
    %65 = vector.shape_cast %64 : vector<1x4x8xf32> to vector<4x8xf32>
    %cst_56 = arith.constant dense<0.000000e+00> : vector<6x8xf32>
    %66 = tpu.matmul %63, %65, %cst_56 {dimension_numbers = #tpu.dot_dimension_numbers<[1], [0], [0], [1], [0, 0, 1, 1], [], []>} : vector<6x4xf32>, vector<4x8xf32>, vector<6x8xf32> -> vector<6x8xf32>
    %67 = arith.addf %62, %66 : vector<6x8xf32>
    %c2_57 = arith.constant 2 : index
    %c0_58 = arith.constant 0 : index
    %68 = tpu.strided_load %arg18[%c2_57, %c0_58] {strides = array<i32: 2, 1>} : memref<28x8xf32, #tpu.memory_space<vmem>>, vector<6x4xf32>
    %c2_59 = arith.constant 2 : index
    %c0_60 = arith.constant 0 : index
    %c0_61 = arith.constant 0 : index
    %69 = vector.load %arg4[%c2_59, %c0_60, %c0_61] : memref<5x4x8xf32, #tpu.memory_space<vmem>>, vector<1x4x8xf32>
    %70 = vector.shape_cast %69 : vector<1x4x8xf32> to vector<4x8xf32>
    %cst_62 = arith.constant dense<0.000000e+00> : vector<6x8xf32>
    %71 = tpu.matmul %68, %70, %cst_62 {dimension_numbers = #tpu.dot_dimension_numbers<[1], [0], [0], [1], [0, 0, 1, 1], [], []>} : vector<6x4xf32>, vector<4x8xf32>, vector<6x8xf32> -> vector<6x8xf32>
    %72 = arith.addf %67, %71 : vector<6x8xf32>
    %c3_63 = arith.constant 3 : index
    %c0_64 = arith.constant 0 : index
    %73 = tpu.strided_load %arg18[%c3_63, %c0_64] {strides = array<i32: 2, 1>} : memref<28x8xf32, #tpu.memory_space<vmem>>, vector<6x4xf32>
    %c3_65 = arith.constant 3 : index
    %c0_66 = arith.constant 0 : index
    %c0_67 = arith.constant 0 : index
    %74 = vector.load %arg4[%c3_65, %c0_66, %c0_67] : memref<5x4x8xf32, #tpu.memory_space<vmem>>, vector<1x4x8xf32>
    %75 = vector.shape_cast %74 : vector<1x4x8xf32> to vector<4x8xf32>
    %cst_68 = arith.constant dense<0.000000e+00> : vector<6x8xf32>
    %76 = tpu.matmul %73, %75, %cst_68 {dimension_numbers = #tpu.dot_dimension_numbers<[1], [0], [0], [1], [0, 0, 1, 1], [], []>} : vector<6x4xf32>, vector<4x8xf32>, vector<6x8xf32> -> vector<6x8xf32>
    %77 = arith.addf %72, %76 : vector<6x8xf32>
    %c4_69 = arith.constant 4 : index
    %c0_70 = arith.constant 0 : index
    %78 = tpu.strided_load %arg18[%c4_69, %c0_70] {strides = array<i32: 2, 1>} : memref<28x8xf32, #tpu.memory_space<vmem>>, vector<6x4xf32>
    %c4_71 = arith.constant 4 : index
    %c0_72 = arith.constant 0 : index
    %c0_73 = arith.constant 0 : index
    %79 = vector.load %arg4[%c4_71, %c0_72, %c0_73] : memref<5x4x8xf32, #tpu.memory_space<vmem>>, vector<1x4x8xf32>
    %80 = vector.shape_cast %79 : vector<1x4x8xf32> to vector<4x8xf32>
    %cst_74 = arith.constant dense<0.000000e+00> : vector<6x8xf32>
    %81 = tpu.matmul %78, %80, %cst_74 {dimension_numbers = #tpu.dot_dimension_numbers<[1], [0], [0], [1], [0, 0, 1, 1], [], []>} : vector<6x4xf32>, vector<4x8xf32>, vector<6x8xf32> -> vector<6x8xf32>
    %82 = arith.addf %77, %81 : vector<6x8xf32>
    %c0_75 = arith.constant 0 : index
    %c0_76 = arith.constant 0 : index
    %83 = vector.load %arg9[%c0_75, %c0_76] : memref<1x8xf32, #tpu.memory_space<vmem>>, vector<1x8xf32>
    %84 = vector.broadcast %83 : vector<1x8xf32> to vector<6x8xf32>
    %85 = arith.addf %82, %84 : vector<6x8xf32>
    %cst_77 = arith.constant 0.000000e+00 : f32
    %86 = vector.broadcast %cst_77 : f32 to vector<6x8xf32>
    %87 = arith.cmpf oge, %85, %86 : vector<6x8xf32>
    %cst_78 = arith.constant 1.000000e-01 : f32
    %88 = vector.broadcast %cst_78 : f32 to vector<6x8xf32>
    %89 = arith.mulf %88, %85 : vector<6x8xf32>
    %90 = arith.select %87, %85, %89 : vector<6x8xi1>, vector<6x8xf32>
    %c0_79 = arith.constant 0 : index
    %c0_80 = arith.constant 0 : index
    %c0_81 = arith.constant 0 : index
    %c0_82 = arith.constant 0 : index
    %91 = vector.load %arg14[%c0_79, %c0_80, %c0_81, %c0_82] : memref<1x1x6x8xf32, #tpu.memory_space<vmem>>, vector<1x1x6x8xf32>
    %92 = vector.shape_cast %91 : vector<1x1x6x8xf32> to vector<6x8xf32>
    %93 = vector.shape_cast %90 : vector<6x8xf32> to vector<1x1x6x8xf32>
    tpu.vector_store %arg14[%c0_79, %c0_80, %c0_81, %c0_82], %93 {strides = array<i32>} : memref<1x1x6x8xf32, #tpu.memory_space<vmem>>, vector<1x1x6x8xf32>,
    %cst_83 = arith.constant 0.000000e+00 : f32
    %94 = vector.broadcast %cst_83 : f32 to vector<2x8xf32>
    %c0_84 = arith.constant 0 : index
    %c0_85 = arith.constant 0 : index
    %95 = vector.load %arg18[%c0_84, %c0_85] : memref<28x8xf32, #tpu.memory_space<vmem>>, vector<2x8xf32>
    tpu.vector_store %arg18[%c0_84, %c0_85], %94 {strides = array<i32>} : memref<28x8xf32, #tpu.memory_space<vmem>>, vector<2x8xf32>,
    %c8 = arith.constant 8 : index
    %c0_86 = arith.constant 0 : index
    %96 = vector.load %arg18[%c8, %c0_86] : memref<28x8xf32, #tpu.memory_space<vmem>>, vector<2x8xf32>
    tpu.vector_store %arg18[%c8, %c0_86], %94 {strides = array<i32>} : memref<28x8xf32, #tpu.memory_space<vmem>>, vector<2x8xf32>,
    %c2_87 = arith.constant 2 : index
    %c0_88 = arith.constant 0 : index
    %97 = vector.load %arg18[%c2_87, %c0_88] : memref<28x8xf32, #tpu.memory_space<vmem>>, vector<6x8xf32>
    tpu.vector_store %arg18[%c2_87, %c0_88], %90 {strides = array<i32>} : memref<28x8xf32, #tpu.memory_space<vmem>>, vector<6x8xf32>,
    %cst_89 = arith.constant 0.000000e+00 : f32
    %98 = vector.broadcast %cst_89 : f32 to vector<3x8xf32>
    %c0_90 = arith.constant 0 : index
    %c0_91 = arith.constant 0 : index
    %99 = tpu.strided_load %arg18[%c0_90, %c0_91] {strides = array<i32: 2, 1>} : memref<28x8xf32, #tpu.memory_space<vmem>>, vector<3x8xf32>
    %c0_92 = arith.constant 0 : index
    %c0_93 = arith.constant 0 : index
    %c0_94 = arith.constant 0 : index
    %100 = vector.load %arg5[%c0_92, %c0_93, %c0_94] : memref<5x8x8xf32, #tpu.memory_space<vmem>>, vector<1x8x8xf32>
    %101 = vector.shape_cast %100 : vector<1x8x8xf32> to vector<8x8xf32>
    %cst_95 = arith.constant dense<0.000000e+00> : vector<3x8xf32>
    %102 = tpu.matmul %99, %101, %cst_95 {dimension_numbers = #tpu.dot_dimension_numbers<[1], [0], [0], [1], [0, 0, 1, 1], [], []>} : vector<3x8xf32>, vector<8x8xf32>, vector<3x8xf32> -> vector<3x8xf32>
    %103 = arith.addf %98, %102 : vector<3x8xf32>
    %c1_96 = arith.constant 1 : index
    %c0_97 = arith.constant 0 : index
    %104 = tpu.strided_load %arg18[%c1_96, %c0_97] {strides = array<i32: 2, 1>} : memref<28x8xf32, #tpu.memory_space<vmem>>, vector<3x8xf32>
    %c1_98 = arith.constant 1 : index
    %c0_99 = arith.constant 0 : index
    %c0_100 = arith.constant 0 : index
    %105 = vector.load %arg5[%c1_98, %c0_99, %c0_100] : memref<5x8x8xf32, #tpu.memory_space<vmem>>, vector<1x8x8xf32>
    %106 = vector.shape_cast %105 : vector<1x8x8xf32> to vector<8x8xf32>
    %cst_101 = arith.constant dense<0.000000e+00> : vector<3x8xf32>
    %107 = tpu.matmul %104, %106, %cst_101 {dimension_numbers = #tpu.dot_dimension_numbers<[1], [0], [0], [1], [0, 0, 1, 1], [], []>} : vector<3x8xf32>, vector<8x8xf32>, vector<3x8xf32> -> vector<3x8xf32>
    %108 = arith.addf %103, %107 : vector<3x8xf32>
    %c2_102 = arith.constant 2 : index
    %c0_103 = arith.constant 0 : index
    %109 = tpu.strided_load %arg18[%c2_102, %c0_103] {strides = array<i32: 2, 1>} : memref<28x8xf32, #tpu.memory_space<vmem>>, vector<3x8xf32>
    %c2_104 = arith.constant 2 : index
    %c0_105 = arith.constant 0 : index
    %c0_106 = arith.constant 0 : index
    %110 = vector.load %arg5[%c2_104, %c0_105, %c0_106] : memref<5x8x8xf32, #tpu.memory_space<vmem>>, vector<1x8x8xf32>
    %111 = vector.shape_cast %110 : vector<1x8x8xf32> to vector<8x8xf32>
    %cst_107 = arith.constant dense<0.000000e+00> : vector<3x8xf32>
    %112 = tpu.matmul %109, %111, %cst_107 {dimension_numbers = #tpu.dot_dimension_numbers<[1], [0], [0], [1], [0, 0, 1, 1], [], []>} : vector<3x8xf32>, vector<8x8xf32>, vector<3x8xf32> -> vector<3x8xf32>
    %113 = arith.addf %108, %112 : vector<3x8xf32>
    %c3_108 = arith.constant 3 : index
    %c0_109 = arith.constant 0 : index
    %114 = tpu.strided_load %arg18[%c3_108, %c0_109] {strides = array<i32: 2, 1>} : memref<28x8xf32, #tpu.memory_space<vmem>>, vector<3x8xf32>
    %c3_110 = arith.constant 3 : index
    %c0_111 = arith.constant 0 : index
    %c0_112 = arith.constant 0 : index
    %115 = vector.load %arg5[%c3_110, %c0_111, %c0_112] : memref<5x8x8xf32, #tpu.memory_space<vmem>>, vector<1x8x8xf32>
    %116 = vector.shape_cast %115 : vector<1x8x8xf32> to vector<8x8xf32>
    %cst_113 = arith.constant dense<0.000000e+00> : vector<3x8xf32>
    %117 = tpu.matmul %114, %116, %cst_113 {dimension_numbers = #tpu.dot_dimension_numbers<[1], [0], [0], [1], [0, 0, 1, 1], [], []>} : vector<3x8xf32>, vector<8x8xf32>, vector<3x8xf32> -> vector<3x8xf32>
    %118 = arith.addf %113, %117 : vector<3x8xf32>
    %c4_114 = arith.constant 4 : index
    %c0_115 = arith.constant 0 : index
    %119 = tpu.strided_load %arg18[%c4_114, %c0_115] {strides = array<i32: 2, 1>} : memref<28x8xf32, #tpu.memory_space<vmem>>, vector<3x8xf32>
    %c4_116 = arith.constant 4 : index
    %c0_117 = arith.constant 0 : index
    %c0_118 = arith.constant 0 : index
    %120 = vector.load %arg5[%c4_116, %c0_117, %c0_118] : memref<5x8x8xf32, #tpu.memory_space<vmem>>, vector<1x8x8xf32>
    %121 = vector.shape_cast %120 : vector<1x8x8xf32> to vector<8x8xf32>
    %cst_119 = arith.constant dense<0.000000e+00> : vector<3x8xf32>
    %122 = tpu.matmul %119, %121, %cst_119 {dimension_numbers = #tpu.dot_dimension_numbers<[1], [0], [0], [1], [0, 0, 1, 1], [], []>} : vector<3x8xf32>, vector<8x8xf32>, vector<3x8xf32> -> vector<3x8xf32>
    %123 = arith.addf %118, %122 : vector<3x8xf32>
    %c0_120 = arith.constant 0 : index
    %c0_121 = arith.constant 0 : index
    %124 = vector.load %arg10[%c0_120, %c0_121] : memref<1x8xf32, #tpu.memory_space<vmem>>, vector<1x8xf32>
    %125 = vector.broadcast %124 : vector<1x8xf32> to vector<3x8xf32>
    %126 = arith.addf %123, %125 : vector<3x8xf32>
    %cst_122 = arith.constant 0.000000e+00 : f32
    %127 = vector.broadcast %cst_122 : f32 to vector<3x8xf32>
    %128 = arith.cmpf oge, %126, %127 : vector<3x8xf32>
    %cst_123 = arith.constant 1.000000e-01 : f32
    %129 = vector.broadcast %cst_123 : f32 to vector<3x8xf32>
    %130 = arith.mulf %129, %126 : vector<3x8xf32>
    %131 = arith.select %128, %126, %130 : vector<3x8xi1>, vector<3x8xf32>
    %c0_124 = arith.constant 0 : index
    %c0_125 = arith.constant 0 : index
    %c0_126 = arith.constant 0 : index
    %c0_127 = arith.constant 0 : index
    %132 = vector.load %arg15[%c0_124, %c0_125, %c0_126, %c0_127] : memref<1x1x3x8xf32, #tpu.memory_space<vmem>>, vector<1x1x3x8xf32>
    %133 = vector.shape_cast %132 : vector<1x1x3x8xf32> to vector<3x8xf32>
    %134 = vector.shape_cast %131 : vector<3x8xf32> to vector<1x1x3x8xf32>
    tpu.vector_store %arg15[%c0_124, %c0_125, %c0_126, %c0_127], %134 {strides = array<i32>} : memref<1x1x3x8xf32, #tpu.memory_space<vmem>>, vector<1x1x3x8xf32>,
    %cst_128 = arith.constant 0.000000e+00 : f32
    %135 = vector.broadcast %cst_128 : f32 to vector<2x8xf32>
    %c0_129 = arith.constant 0 : index
    %c0_130 = arith.constant 0 : index
    %136 = vector.load %arg18[%c0_129, %c0_130] : memref<28x8xf32, #tpu.memory_space<vmem>>, vector<2x8xf32>
    tpu.vector_store %arg18[%c0_129, %c0_130], %135 {strides = array<i32>} : memref<28x8xf32, #tpu.memory_space<vmem>>, vector<2x8xf32>,
    %c5 = arith.constant 5 : index
    %c0_131 = arith.constant 0 : index
    %137 = vector.load %arg18[%c5, %c0_131] : memref<28x8xf32, #tpu.memory_space<vmem>>, vector<2x8xf32>
    tpu.vector_store %arg18[%c5, %c0_131], %135 {strides = array<i32>} : memref<28x8xf32, #tpu.memory_space<vmem>>, vector<2x8xf32>,
    %c2_132 = arith.constant 2 : index
    %c0_133 = arith.constant 0 : index
    %138 = vector.load %arg18[%c2_132, %c0_133] : memref<28x8xf32, #tpu.memory_space<vmem>>, vector<3x8xf32>
    tpu.vector_store %arg18[%c2_132, %c0_133], %131 {strides = array<i32>} : memref<28x8xf32, #tpu.memory_space<vmem>>, vector<3x8xf32>,
    %cst_134 = arith.constant 0.000000e+00 : f32
    %139 = vector.broadcast %cst_134 : f32 to vector<3x8xf32>
    %c0_135 = arith.constant 0 : index
    %c0_136 = arith.constant 0 : index
    %140 = vector.load %arg18[%c0_135, %c0_136] : memref<28x8xf32, #tpu.memory_space<vmem>>, vector<3x8xf32>
    %c0_137 = arith.constant 0 : index
    %c0_138 = arith.constant 0 : index
    %c0_139 = arith.constant 0 : index
    %141 = vector.load %arg6[%c0_137, %c0_138, %c0_139] : memref<5x8x8xf32, #tpu.memory_space<vmem>>, vector<1x8x8xf32>
    %142 = vector.shape_cast %141 : vector<1x8x8xf32> to vector<8x8xf32>
    %cst_140 = arith.constant dense<0.000000e+00> : vector<3x8xf32>
    %143 = tpu.matmul %140, %142, %cst_140 {dimension_numbers = #tpu.dot_dimension_numbers<[1], [0], [0], [1], [0, 0, 1, 1], [], []>} : vector<3x8xf32>, vector<8x8xf32>, vector<3x8xf32> -> vector<3x8xf32>
    %144 = arith.addf %139, %143 : vector<3x8xf32>
    %c1_141 = arith.constant 1 : index
    %c0_142 = arith.constant 0 : index
    %145 = vector.load %arg18[%c1_141, %c0_142] : memref<28x8xf32, #tpu.memory_space<vmem>>, vector<3x8xf32>
    %c1_143 = arith.constant 1 : index
    %c0_144 = arith.constant 0 : index
    %c0_145 = arith.constant 0 : index
    %146 = vector.load %arg6[%c1_143, %c0_144, %c0_145] : memref<5x8x8xf32, #tpu.memory_space<vmem>>, vector<1x8x8xf32>
    %147 = vector.shape_cast %146 : vector<1x8x8xf32> to vector<8x8xf32>
    %cst_146 = arith.constant dense<0.000000e+00> : vector<3x8xf32>
    %148 = tpu.matmul %145, %147, %cst_146 {dimension_numbers = #tpu.dot_dimension_numbers<[1], [0], [0], [1], [0, 0, 1, 1], [], []>} : vector<3x8xf32>, vector<8x8xf32>, vector<3x8xf32> -> vector<3x8xf32>
    %149 = arith.addf %144, %148 : vector<3x8xf32>
    %c2_147 = arith.constant 2 : index
    %c0_148 = arith.constant 0 : index
    %150 = vector.load %arg18[%c2_147, %c0_148] : memref<28x8xf32, #tpu.memory_space<vmem>>, vector<3x8xf32>
    %c2_149 = arith.constant 2 : index
    %c0_150 = arith.constant 0 : index
    %c0_151 = arith.constant 0 : index
    %151 = vector.load %arg6[%c2_149, %c0_150, %c0_151] : memref<5x8x8xf32, #tpu.memory_space<vmem>>, vector<1x8x8xf32>
    %152 = vector.shape_cast %151 : vector<1x8x8xf32> to vector<8x8xf32>
    %cst_152 = arith.constant dense<0.000000e+00> : vector<3x8xf32>
    %153 = tpu.matmul %150, %152, %cst_152 {dimension_numbers = #tpu.dot_dimension_numbers<[1], [0], [0], [1], [0, 0, 1, 1], [], []>} : vector<3x8xf32>, vector<8x8xf32>, vector<3x8xf32> -> vector<3x8xf32>
    %154 = arith.addf %149, %153 : vector<3x8xf32>
    %c3_153 = arith.constant 3 : index
    %c0_154 = arith.constant 0 : index
    %155 = vector.load %arg18[%c3_153, %c0_154] : memref<28x8xf32, #tpu.memory_space<vmem>>, vector<3x8xf32>
    %c3_155 = arith.constant 3 : index
    %c0_156 = arith.constant 0 : index
    %c0_157 = arith.constant 0 : index
    %156 = vector.load %arg6[%c3_155, %c0_156, %c0_157] : memref<5x8x8xf32, #tpu.memory_space<vmem>>, vector<1x8x8xf32>
    %157 = vector.shape_cast %156 : vector<1x8x8xf32> to vector<8x8xf32>
    %cst_158 = arith.constant dense<0.000000e+00> : vector<3x8xf32>
    %158 = tpu.matmul %155, %157, %cst_158 {dimension_numbers = #tpu.dot_dimension_numbers<[1], [0], [0], [1], [0, 0, 1, 1], [], []>} : vector<3x8xf32>, vector<8x8xf32>, vector<3x8xf32> -> vector<3x8xf32>
    %159 = arith.addf %154, %158 : vector<3x8xf32>
    %c4_159 = arith.constant 4 : index
    %c0_160 = arith.constant 0 : index
    %160 = vector.load %arg18[%c4_159, %c0_160] : memref<28x8xf32, #tpu.memory_space<vmem>>, vector<3x8xf32>
    %c4_161 = arith.constant 4 : index
    %c0_162 = arith.constant 0 : index
    %c0_163 = arith.constant 0 : index
    %161 = vector.load %arg6[%c4_161, %c0_162, %c0_163] : memref<5x8x8xf32, #tpu.memory_space<vmem>>, vector<1x8x8xf32>
    %162 = vector.shape_cast %161 : vector<1x8x8xf32> to vector<8x8xf32>
    %cst_164 = arith.constant dense<0.000000e+00> : vector<3x8xf32>
    %163 = tpu.matmul %160, %162, %cst_164 {dimension_numbers = #tpu.dot_dimension_numbers<[1], [0], [0], [1], [0, 0, 1, 1], [], []>} : vector<3x8xf32>, vector<8x8xf32>, vector<3x8xf32> -> vector<3x8xf32>
    %164 = arith.addf %159, %163 : vector<3x8xf32>
    %c0_165 = arith.constant 0 : index
    %c0_166 = arith.constant 0 : index
    %165 = vector.load %arg11[%c0_165, %c0_166] : memref<1x8xf32, #tpu.memory_space<vmem>>, vector<1x8xf32>
    %166 = vector.broadcast %165 : vector<1x8xf32> to vector<3x8xf32>
    %167 = arith.addf %164, %166 : vector<3x8xf32>
    %cst_167 = arith.constant 0.000000e+00 : f32
    %168 = vector.broadcast %cst_167 : f32 to vector<3x8xf32>
    %169 = arith.cmpf oge, %167, %168 : vector<3x8xf32>
    %cst_168 = arith.constant 1.000000e-01 : f32
    %170 = vector.broadcast %cst_168 : f32 to vector<3x8xf32>
    %171 = arith.mulf %170, %167 : vector<3x8xf32>
    %172 = arith.select %169, %167, %171 : vector<3x8xi1>, vector<3x8xf32>
    %c0_169 = arith.constant 0 : index
    %c0_170 = arith.constant 0 : index
    %c0_171 = arith.constant 0 : index
    %c0_172 = arith.constant 0 : index
    %173 = vector.load %arg16[%c0_169, %c0_170, %c0_171, %c0_172] : memref<1x1x3x8xf32, #tpu.memory_space<vmem>>, vector<1x1x3x8xf32>
    %174 = vector.shape_cast %173 : vector<1x1x3x8xf32> to vector<3x8xf32>
    %175 = vector.shape_cast %172 : vector<3x8xf32> to vector<1x1x3x8xf32>
    tpu.vector_store %arg16[%c0_169, %c0_170, %c0_171, %c0_172], %175 {strides = array<i32>} : memref<1x1x3x8xf32, #tpu.memory_space<vmem>>, vector<1x1x3x8xf32>,
    %cst_173 = arith.constant 0.000000e+00 : f32
    %176 = vector.broadcast %cst_173 : f32 to vector<1x8xf32>
    %c0_174 = arith.constant 0 : index
    %c0_175 = arith.constant 0 : index
    %177 = vector.load %arg18[%c0_174, %c0_175] : memref<28x8xf32, #tpu.memory_space<vmem>>, vector<1x8xf32>
    tpu.vector_store %arg18[%c0_174, %c0_175], %176 {strides = array<i32>} : memref<28x8xf32, #tpu.memory_space<vmem>>, vector<1x8xf32>,
    %c4_176 = arith.constant 4 : index
    %c0_177 = arith.constant 0 : index
    %178 = vector.load %arg18[%c4_176, %c0_177] : memref<28x8xf32, #tpu.memory_space<vmem>>, vector<1x8xf32>
    tpu.vector_store %arg18[%c4_176, %c0_177], %176 {strides = array<i32>} : memref<28x8xf32, #tpu.memory_space<vmem>>, vector<1x8xf32>,
    %c1_178 = arith.constant 1 : index
    %c0_179 = arith.constant 0 : index
    %179 = vector.load %arg18[%c1_178, %c0_179] : memref<28x8xf32, #tpu.memory_space<vmem>>, vector<3x8xf32>
    tpu.vector_store %arg18[%c1_178, %c0_179], %172 {strides = array<i32>} : memref<28x8xf32, #tpu.memory_space<vmem>>, vector<3x8xf32>,
    %cst_180 = arith.constant 0.000000e+00 : f32
    %180 = vector.broadcast %cst_180 : f32 to vector<3x1xf32>
    %c0_181 = arith.constant 0 : index
    %c0_182 = arith.constant 0 : index
    %181 = vector.load %arg18[%c0_181, %c0_182] : memref<28x8xf32, #tpu.memory_space<vmem>>, vector<3x8xf32>
    %c0_183 = arith.constant 0 : index
    %c0_184 = arith.constant 0 : index
    %c0_185 = arith.constant 0 : index
    %182 = vector.load %arg7[%c0_183, %c0_184, %c0_185] : memref<3x8x1xf32, #tpu.memory_space<vmem>>, vector<1x8x1xf32>
    %183 = vector.shape_cast %182 : vector<1x8x1xf32> to vector<8x1xf32>
    %cst_186 = arith.constant dense<0.000000e+00> : vector<3x1xf32>
    %184 = tpu.matmul %181, %183, %cst_186 {dimension_numbers = #tpu.dot_dimension_numbers<[1], [0], [0], [1], [0, 0, 1, 1], [], []>} : vector<3x8xf32>, vector<8x1xf32>, vector<3x1xf32> -> vector<3x1xf32>
    %185 = arith.addf %180, %184 : vector<3x1xf32>
    %c1_187 = arith.constant 1 : index
    %c0_188 = arith.constant 0 : index
    %186 = vector.load %arg18[%c1_187, %c0_188] : memref<28x8xf32, #tpu.memory_space<vmem>>, vector<3x8xf32>
    %c1_189 = arith.constant 1 : index
    %c0_190 = arith.constant 0 : index
    %c0_191 = arith.constant 0 : index
    %187 = vector.load %arg7[%c1_189, %c0_190, %c0_191] : memref<3x8x1xf32, #tpu.memory_space<vmem>>, vector<1x8x1xf32>
    %188 = vector.shape_cast %187 : vector<1x8x1xf32> to vector<8x1xf32>
    %cst_192 = arith.constant dense<0.000000e+00> : vector<3x1xf32>
    %189 = tpu.matmul %186, %188, %cst_192 {dimension_numbers = #tpu.dot_dimension_numbers<[1], [0], [0], [1], [0, 0, 1, 1], [], []>} : vector<3x8xf32>, vector<8x1xf32>, vector<3x1xf32> -> vector<3x1xf32>
    %190 = arith.addf %185, %189 : vector<3x1xf32>
    %c2_193 = arith.constant 2 : index
    %c0_194 = arith.constant 0 : index
    %191 = vector.load %arg18[%c2_193, %c0_194] : memref<28x8xf32, #tpu.memory_space<vmem>>, vector<3x8xf32>
    %c2_195 = arith.constant 2 : index
    %c0_196 = arith.constant 0 : index
    %c0_197 = arith.constant 0 : index
    %192 = vector.load %arg7[%c2_195, %c0_196, %c0_197] : memref<3x8x1xf32, #tpu.memory_space<vmem>>, vector<1x8x1xf32>
    %193 = vector.shape_cast %192 : vector<1x8x1xf32> to vector<8x1xf32>
    %cst_198 = arith.constant dense<0.000000e+00> : vector<3x1xf32>
    %194 = tpu.matmul %191, %193, %cst_198 {dimension_numbers = #tpu.dot_dimension_numbers<[1], [0], [0], [1], [0, 0, 1, 1], [], []>} : vector<3x8xf32>, vector<8x1xf32>, vector<3x1xf32> -> vector<3x1xf32>
    %195 = arith.addf %190, %194 : vector<3x1xf32>
    %c0_199 = arith.constant 0 : index
    %c0_200 = arith.constant 0 : index
    %196 = vector.load %arg12[%c0_199, %c0_200] : memref<1x1xf32, #tpu.memory_space<vmem>>, vector<1x1xf32>
    %197 = vector.broadcast %196 : vector<1x1xf32> to vector<3x1xf32>
    %198 = arith.addf %195, %197 : vector<3x1xf32>
    %c0_201 = arith.constant 0 : index
    %c0_202 = arith.constant 0 : index
    %c0_203 = arith.constant 0 : index
    %c0_204 = arith.constant 0 : index
    %199 = vector.load %arg17[%c0_201, %c0_202, %c0_203, %c0_204] : memref<1x1x3x1xf32, #tpu.memory_space<vmem>>, vector<1x1x3x1xf32>
    %200 = vector.shape_cast %199 : vector<1x1x3x1xf32> to vector<3x1xf32>
    %201 = vector.shape_cast %198 : vector<3x1xf32> to vector<1x1x3x1xf32>
    tpu.vector_store %arg17[%c0_201, %c0_202, %c0_203, %c0_204], %201 {strides = array<i32>} : memref<1x1x3x1xf32, #tpu.memory_space<vmem>>, vector<1x1x3x1xf32>,
    return
  }
  func.func @transform_0(%arg0: i32, %arg1: i32) -> (i32, i32, i32, i32) {
    %c0_i32 = arith.constant 0 : i32
    %c0_i32_0 = arith.constant 0 : i32
    %c0_i32_1 = arith.constant 0 : i32
    return %arg0, %arg1, %c0_i32, %c0_i32_0 : i32, i32, i32, i32
  }
  func.func @transform_1(%arg0: i32, %arg1: i32) -> (i32, i32, i32) {
    %c0_i32 = arith.constant 0 : i32
    %c0_i32_0 = arith.constant 0 : i32
    %c0_i32_1 = arith.constant 0 : i32
    %c0_i32_2 = arith.constant 0 : i32
    return %c0_i32, %c0_i32_0, %c0_i32_1 : i32, i32, i32
  }
  func.func @transform_2(%arg0: i32, %arg1: i32) -> (i32, i32, i32) {
    %c0_i32 = arith.constant 0 : i32
    %c0_i32_0 = arith.constant 0 : i32
    %c0_i32_1 = arith.constant 0 : i32
    %c0_i32_2 = arith.constant 0 : i32
    return %c0_i32, %c0_i32_0, %c0_i32_1 : i32, i32, i32
  }
  func.func @transform_3(%arg0: i32, %arg1: i32) -> (i32, i32, i32) {
    %c0_i32 = arith.constant 0 : i32
    %c0_i32_0 = arith.constant 0 : i32
    %c0_i32_1 = arith.constant 0 : i32
    %c0_i32_2 = arith.constant 0 : i32
    return %c0_i32, %c0_i32_0, %c0_i32_1 : i32, i32, i32
  }
  func.func @transform_4(%arg0: i32, %arg1: i32) -> (i32, i32, i32) {
    %c0_i32 = arith.constant 0 : i32
    %c0_i32_0 = arith.constant 0 : i32
    %c0_i32_1 = arith.constant 0 : i32
    %c0_i32_2 = arith.constant 0 : i32
    return %c0_i32, %c0_i32_0, %c0_i32_1 : i32, i32, i32
  }
  func.func @transform_5(%arg0: i32, %arg1: i32) -> (i32, i32, i32) {
    %c0_i32 = arith.constant 0 : i32
    %c0_i32_0 = arith.constant 0 : i32
    %c0_i32_1 = arith.constant 0 : i32
    %c0_i32_2 = arith.constant 0 : i32
    return %c0_i32, %c0_i32_0, %c0_i32_1 : i32, i32, i32
  }
  func.func @transform_6(%arg0: i32, %arg1: i32) -> (i32, i32) {
    %c0_i32 = arith.constant 0 : i32
    %c0_i32_0 = arith.constant 0 : i32
    %c0_i32_1 = arith.constant 0 : i32
    return %c0_i32, %c0_i32_0 : i32, i32
  }
  func.func @transform_7(%arg0: i32, %arg1: i32) -> (i32, i32) {
    %c0_i32 = arith.constant 0 : i32
    %c0_i32_0 = arith.constant 0 : i32
    %c0_i32_1 = arith.constant 0 : i32
    return %c0_i32, %c0_i32_0 : i32, i32
  }
  func.func @transform_8(%arg0: i32, %arg1: i32) -> (i32, i32) {
    %c0_i32 = arith.constant 0 : i32
    %c0_i32_0 = arith.constant 0 : i32
    %c0_i32_1 = arith.constant 0 : i32
    return %c0_i32, %c0_i32_0 : i32, i32
  }
  func.func @transform_9(%arg0: i32, %arg1: i32) -> (i32, i32) {
    %c0_i32 = arith.constant 0 : i32
    %c0_i32_0 = arith.constant 0 : i32
    %c0_i32_1 = arith.constant 0 : i32
    return %c0_i32, %c0_i32_0 : i32, i32
  }
  func.func @transform_10(%arg0: i32, %arg1: i32) -> (i32, i32) {
    %c0_i32 = arith.constant 0 : i32
    %c0_i32_0 = arith.constant 0 : i32
    %c0_i32_1 = arith.constant 0 : i32
    return %c0_i32, %c0_i32_0 : i32, i32
  }
  func.func @transform_11(%arg0: i32, %arg1: i32) -> (i32, i32, i32, i32) {
    %c0_i32 = arith.constant 0 : i32
    %c0_i32_0 = arith.constant 0 : i32
    %c0_i32_1 = arith.constant 0 : i32
    return %arg0, %arg1, %c0_i32, %c0_i32_0 : i32, i32, i32, i32
  }
  func.func @transform_12(%arg0: i32, %arg1: i32) -> (i32, i32, i32, i32) {
    %c0_i32 = arith.constant 0 : i32
    %c0_i32_0 = arith.constant 0 : i32
    %c0_i32_1 = arith.constant 0 : i32
    return %arg0, %arg1, %c0_i32, %c0_i32_0 : i32, i32, i32, i32
  }
  func.func @transform_13(%arg0: i32, %arg1: i32) -> (i32, i32, i32, i32) {
    %c0_i32 = arith.constant 0 : i32
    %c0_i32_0 = arith.constant 0 : i32
    %c0_i32_1 = arith.constant 0 : i32
    return %arg0, %arg1, %c0_i32, %c0_i32_0 : i32, i32, i32, i32
  }
  func.func @transform_14(%arg0: i32, %arg1: i32) -> (i32, i32, i32, i32) {
    %c0_i32 = arith.constant 0 : i32
    %c0_i32_0 = arith.constant 0 : i32
    %c0_i32_1 = arith.constant 0 : i32
    return %arg0, %arg1, %c0_i32, %c0_i32_0 : i32, i32, i32, i32
  }
  func.func @transform_15(%arg0: i32, %arg1: i32) -> (i32, i32, i32, i32) {
    %c0_i32 = arith.constant 0 : i32
    %c0_i32_0 = arith.constant 0 : i32
    %c0_i32_1 = arith.constant 0 : i32
    return %arg0, %arg1, %c0_i32, %c0_i32_0 : i32, i32, i32, i32
  }
}

module attributes {stable_mosaic.version = 11 : i64} {
  func.func @kernel(%arg0: i32, %arg1: i32, %arg2: memref<1x1x10x1xf32, #tpu.memory_space<vmem>>, %arg3: memref<5x1x4xf32, #tpu.memory_space<vmem>>, %arg4: memref<5x4x8xf32, #tpu.memory_space<vmem>>, %arg5: memref<5x8x8xf32, #tpu.memory_space<vmem>>, %arg6: memref<5x8x8xf32, #tpu.memory_space<vmem>>, %arg7: memref<3x8x1xf32, #tpu.memory_space<vmem>>, %arg8: memref<1x4xf32, #tpu.memory_space<vmem>>, %arg9: memref<1x8xf32, #tpu.memory_space<vmem>>, %arg10: memref<1x8xf32, #tpu.memory_space<vmem>>, %arg11: memref<1x8xf32, #tpu.memory_space<vmem>>, %arg12: memref<1x1xf32, #tpu.memory_space<vmem>>, %arg13: memref<1x1x5x4xf32, #tpu.memory_space<vmem>>, %arg14: memref<1x1x3x8xf32, #tpu.memory_space<vmem>>, %arg15: memref<1x1x2x8xf32, #tpu.memory_space<vmem>>, %arg16: memref<1x1x2x8xf32, #tpu.memory_space<vmem>>, %arg17: memref<1x1x2x1xf32, #tpu.memory_space<vmem>>, %arg18: memref<14x8xf32, #tpu.memory_space<vmem>>) attributes {dimension_semantics = [#tpu.dimension_semantics<parallel>, #tpu.dimension_semantics<parallel>], iteration_bounds = array<i64: 2, 10>, scalar_prefetch = 0 : i64, scratch_operands = 1 : i64, tpu.core_type = #tpu.core_type<tc>, window_params = [{transform_indices = @transform_0, window_bounds = array<i64: 1, 1, 10, 1>}, {pipeline_mode = #tpu.pipeline_mode<synchronous>, transform_indices = @transform_1, window_bounds = array<i64: 5, 1, 4>}, {pipeline_mode = #tpu.pipeline_mode<synchronous>, transform_indices = @transform_2, window_bounds = array<i64: 5, 4, 8>}, {pipeline_mode = #tpu.pipeline_mode<synchronous>, transform_indices = @transform_3, window_bounds = array<i64: 5, 8, 8>}, {pipeline_mode = #tpu.pipeline_mode<synchronous>, transform_indices = @transform_4, window_bounds = array<i64: 5, 8, 8>}, {pipeline_mode = #tpu.pipeline_mode<synchronous>, transform_indices = @transform_5, window_bounds = array<i64: 3, 8, 1>}, {pipeline_mode = #tpu.pipeline_mode<synchronous>, transform_indices = @transform_6, window_bounds = array<i64: 1, 4>}, {pipeline_mode = #tpu.pipeline_mode<synchronous>, transform_indices = @transform_7, window_bounds = array<i64: 1, 8>}, {pipeline_mode = #tpu.pipeline_mode<synchronous>, transform_indices = @transform_8, window_bounds = array<i64: 1, 8>}, {pipeline_mode = #tpu.pipeline_mode<synchronous>, transform_indices = @transform_9, window_bounds = array<i64: 1, 8>}, {pipeline_mode = #tpu.pipeline_mode<synchronous>, transform_indices = @transform_10, window_bounds = array<i64: 1, 1>}, {transform_indices = @transform_11, window_bounds = array<i64: 1, 1, 5, 4>}, {transform_indices = @transform_12, window_bounds = array<i64: 1, 1, 3, 8>}, {transform_indices = @transform_13, window_bounds = array<i64: 1, 1, 2, 8>}, {transform_indices = @transform_14, window_bounds = array<i64: 1, 1, 2, 8>}, {transform_indices = @transform_15, window_bounds = array<i64: 1, 1, 2, 1>}]} {
    %c0 = arith.constant 0 : index
    %c0_0 = arith.constant 0 : index
    %c0_1 = arith.constant 0 : index
    %c0_2 = arith.constant 0 : index
    %0 = vector.load %arg2[%c0, %c0_0, %c0_1, %c0_2] : memref<1x1x10x1xf32, #tpu.memory_space<vmem>>, vector<1x1x10x1xf32>
    %1 = vector.shape_cast %0 : vector<1x1x10x1xf32> to vector<10x1xf32>
    %cst = arith.constant 0.000000e+00 : f32
    %2 = vector.broadcast %cst : f32 to vector<2x1xf32>
    %c0_3 = arith.constant 0 : index
    %c0_4 = arith.constant 0 : index
    %3 = vector.load %arg18[%c0_3, %c0_4] : memref<14x8xf32, #tpu.memory_space<vmem>>, vector<2x1xf32>
    tpu.vector_store %arg18[%c0_3, %c0_4], %2 {strides = array<i32>} : memref<14x8xf32, #tpu.memory_space<vmem>>, vector<2x1xf32>,
    %c12 = arith.constant 12 : index
    %c0_5 = arith.constant 0 : index
    %4 = vector.load %arg18[%c12, %c0_5] : memref<14x8xf32, #tpu.memory_space<vmem>>, vector<2x1xf32>
    tpu.vector_store %arg18[%c12, %c0_5], %2 {strides = array<i32>} : memref<14x8xf32, #tpu.memory_space<vmem>>, vector<2x1xf32>,
    %c2 = arith.constant 2 : index
    %c0_6 = arith.constant 0 : index
    %5 = vector.load %arg18[%c2, %c0_6] : memref<14x8xf32, #tpu.memory_space<vmem>>, vector<10x1xf32>
    tpu.vector_store %arg18[%c2, %c0_6], %1 {strides = array<i32>} : memref<14x8xf32, #tpu.memory_space<vmem>>, vector<10x1xf32>,
    %cst_7 = arith.constant 0.000000e+00 : f32
    %6 = vector.broadcast %cst_7 : f32 to vector<5x4xf32>
    %c0_8 = arith.constant 0 : index
    %c0_9 = arith.constant 0 : index
    %7 = tpu.strided_load %arg18[%c0_8, %c0_9] {strides = array<i32: 2, 1>} : memref<14x8xf32, #tpu.memory_space<vmem>>, vector<5x1xf32>
    %c0_10 = arith.constant 0 : index
    %c0_11 = arith.constant 0 : index
    %c0_12 = arith.constant 0 : index
    %8 = vector.load %arg3[%c0_10, %c0_11, %c0_12] : memref<5x1x4xf32, #tpu.memory_space<vmem>>, vector<1x1x4xf32>
    %9 = vector.shape_cast %8 : vector<1x1x4xf32> to vector<1x4xf32>
    %10 = vector.broadcast %7 : vector<5x1xf32> to vector<5x4xf32>
    %11 = vector.broadcast %9 : vector<1x4xf32> to vector<5x4xf32>
    %12 = arith.mulf %10, %11 : vector<5x4xf32>
    %13 = arith.addf %6, %12 : vector<5x4xf32>
    %c1 = arith.constant 1 : index
    %c0_13 = arith.constant 0 : index
    %14 = tpu.strided_load %arg18[%c1, %c0_13] {strides = array<i32: 2, 1>} : memref<14x8xf32, #tpu.memory_space<vmem>>, vector<5x1xf32>
    %c1_14 = arith.constant 1 : index
    %c0_15 = arith.constant 0 : index
    %c0_16 = arith.constant 0 : index
    %15 = vector.load %arg3[%c1_14, %c0_15, %c0_16] : memref<5x1x4xf32, #tpu.memory_space<vmem>>, vector<1x1x4xf32>
    %16 = vector.shape_cast %15 : vector<1x1x4xf32> to vector<1x4xf32>
    %17 = vector.broadcast %14 : vector<5x1xf32> to vector<5x4xf32>
    %18 = vector.broadcast %16 : vector<1x4xf32> to vector<5x4xf32>
    %19 = arith.mulf %17, %18 : vector<5x4xf32>
    %20 = arith.addf %13, %19 : vector<5x4xf32>
    %c2_17 = arith.constant 2 : index
    %c0_18 = arith.constant 0 : index
    %21 = tpu.strided_load %arg18[%c2_17, %c0_18] {strides = array<i32: 2, 1>} : memref<14x8xf32, #tpu.memory_space<vmem>>, vector<5x1xf32>
    %c2_19 = arith.constant 2 : index
    %c0_20 = arith.constant 0 : index
    %c0_21 = arith.constant 0 : index
    %22 = vector.load %arg3[%c2_19, %c0_20, %c0_21] : memref<5x1x4xf32, #tpu.memory_space<vmem>>, vector<1x1x4xf32>
    %23 = vector.shape_cast %22 : vector<1x1x4xf32> to vector<1x4xf32>
    %24 = vector.broadcast %21 : vector<5x1xf32> to vector<5x4xf32>
    %25 = vector.broadcast %23 : vector<1x4xf32> to vector<5x4xf32>
    %26 = arith.mulf %24, %25 : vector<5x4xf32>
    %27 = arith.addf %20, %26 : vector<5x4xf32>
    %c3 = arith.constant 3 : index
    %c0_22 = arith.constant 0 : index
    %28 = tpu.strided_load %arg18[%c3, %c0_22] {strides = array<i32: 2, 1>} : memref<14x8xf32, #tpu.memory_space<vmem>>, vector<5x1xf32>
    %c3_23 = arith.constant 3 : index
    %c0_24 = arith.constant 0 : index
    %c0_25 = arith.constant 0 : index
    %29 = vector.load %arg3[%c3_23, %c0_24, %c0_25] : memref<5x1x4xf32, #tpu.memory_space<vmem>>, vector<1x1x4xf32>
    %30 = vector.shape_cast %29 : vector<1x1x4xf32> to vector<1x4xf32>
    %31 = vector.broadcast %28 : vector<5x1xf32> to vector<5x4xf32>
    %32 = vector.broadcast %30 : vector<1x4xf32> to vector<5x4xf32>
    %33 = arith.mulf %31, %32 : vector<5x4xf32>
    %34 = arith.addf %27, %33 : vector<5x4xf32>
    %c4 = arith.constant 4 : index
    %c0_26 = arith.constant 0 : index
    %35 = tpu.strided_load %arg18[%c4, %c0_26] {strides = array<i32: 2, 1>} : memref<14x8xf32, #tpu.memory_space<vmem>>, vector<5x1xf32>
    %c4_27 = arith.constant 4 : index
    %c0_28 = arith.constant 0 : index
    %c0_29 = arith.constant 0 : index
    %36 = vector.load %arg3[%c4_27, %c0_28, %c0_29] : memref<5x1x4xf32, #tpu.memory_space<vmem>>, vector<1x1x4xf32>
    %37 = vector.shape_cast %36 : vector<1x1x4xf32> to vector<1x4xf32>
    %38 = vector.broadcast %35 : vector<5x1xf32> to vector<5x4xf32>
    %39 = vector.broadcast %37 : vector<1x4xf32> to vector<5x4xf32>
    %40 = arith.mulf %38, %39 : vector<5x4xf32>
    %41 = arith.addf %34, %40 : vector<5x4xf32>
    %c0_30 = arith.constant 0 : index
    %c0_31 = arith.constant 0 : index
    %42 = vector.load %arg8[%c0_30, %c0_31] : memref<1x4xf32, #tpu.memory_space<vmem>>, vector<1x4xf32>
    %43 = vector.broadcast %42 : vector<1x4xf32> to vector<5x4xf32>
    %44 = arith.addf %41, %43 : vector<5x4xf32>
    %cst_32 = arith.constant 0.000000e+00 : f32
    %45 = vector.broadcast %cst_32 : f32 to vector<5x4xf32>
    %46 = arith.cmpf oge, %44, %45 : vector<5x4xf32>
    %cst_33 = arith.constant 1.000000e-01 : f32
    %47 = vector.broadcast %cst_33 : f32 to vector<5x4xf32>
    %48 = arith.mulf %47, %44 : vector<5x4xf32>
    %49 = arith.select %46, %44, %48 : vector<5x4xi1>, vector<5x4xf32>
    %c0_34 = arith.constant 0 : index
    %c0_35 = arith.constant 0 : index
    %c0_36 = arith.constant 0 : index
    %c0_37 = arith.constant 0 : index
    %50 = vector.load %arg13[%c0_34, %c0_35, %c0_36, %c0_37] : memref<1x1x5x4xf32, #tpu.memory_space<vmem>>, vector<1x1x5x4xf32>
    %51 = vector.shape_cast %50 : vector<1x1x5x4xf32> to vector<5x4xf32>
    %52 = vector.shape_cast %49 : vector<5x4xf32> to vector<1x1x5x4xf32>
    tpu.vector_store %arg13[%c0_34, %c0_35, %c0_36, %c0_37], %52 {strides = array<i32>} : memref<1x1x5x4xf32, #tpu.memory_space<vmem>>, vector<1x1x5x4xf32>,
    %cst_38 = arith.constant 0.000000e+00 : f32
    %53 = vector.broadcast %cst_38 : f32 to vector<2x4xf32>
    %c0_39 = arith.constant 0 : index
    %c0_40 = arith.constant 0 : index
    %54 = vector.load %arg18[%c0_39, %c0_40] : memref<14x8xf32, #tpu.memory_space<vmem>>, vector<2x4xf32>
    tpu.vector_store %arg18[%c0_39, %c0_40], %53 {strides = array<i32>} : memref<14x8xf32, #tpu.memory_space<vmem>>, vector<2x4xf32>,
    %c7 = arith.constant 7 : index
    %c0_41 = arith.constant 0 : index
    %55 = vector.load %arg18[%c7, %c0_41] : memref<14x8xf32, #tpu.memory_space<vmem>>, vector<2x4xf32>
    tpu.vector_store %arg18[%c7, %c0_41], %53 {strides = array<i32>} : memref<14x8xf32, #tpu.memory_space<vmem>>, vector<2x4xf32>,
    %c2_42 = arith.constant 2 : index
    %c0_43 = arith.constant 0 : index
    %56 = vector.load %arg18[%c2_42, %c0_43] : memref<14x8xf32, #tpu.memory_space<vmem>>, vector<5x4xf32>
    tpu.vector_store %arg18[%c2_42, %c0_43], %49 {strides = array<i32>} : memref<14x8xf32, #tpu.memory_space<vmem>>, vector<5x4xf32>,
    %cst_44 = arith.constant 0.000000e+00 : f32
    %57 = vector.broadcast %cst_44 : f32 to vector<3x8xf32>
    %c0_45 = arith.constant 0 : index
    %c0_46 = arith.constant 0 : index
    %58 = tpu.strided_load %arg18[%c0_45, %c0_46] {strides = array<i32: 2, 1>} : memref<14x8xf32, #tpu.memory_space<vmem>>, vector<3x4xf32>
    %c0_47 = arith.constant 0 : index
    %c0_48 = arith.constant 0 : index
    %c0_49 = arith.constant 0 : index
    %59 = vector.load %arg4[%c0_47, %c0_48, %c0_49] : memref<5x4x8xf32, #tpu.memory_space<vmem>>, vector<1x4x8xf32>
    %60 = vector.shape_cast %59 : vector<1x4x8xf32> to vector<4x8xf32>
    %cst_50 = arith.constant dense<0.000000e+00> : vector<3x8xf32>
    %61 = tpu.matmul %58, %60, %cst_50 {dimension_numbers = #tpu.dot_dimension_numbers<[1], [0], [0], [1], [0, 0, 1, 1], [], []>} : vector<3x4xf32>, vector<4x8xf32>, vector<3x8xf32> -> vector<3x8xf32>
    %62 = arith.addf %57, %61 : vector<3x8xf32>
    %c1_51 = arith.constant 1 : index
    %c0_52 = arith.constant 0 : index
    %63 = tpu.strided_load %arg18[%c1_51, %c0_52] {strides = array<i32: 2, 1>} : memref<14x8xf32, #tpu.memory_space<vmem>>, vector<3x4xf32>
    %c1_53 = arith.constant 1 : index
    %c0_54 = arith.constant 0 : index
    %c0_55 = arith.constant 0 : index
    %64 = vector.load %arg4[%c1_53, %c0_54, %c0_55] : memref<5x4x8xf32, #tpu.memory_space<vmem>>, vector<1x4x8xf32>
    %65 = vector.shape_cast %64 : vector<1x4x8xf32> to vector<4x8xf32>
    %cst_56 = arith.constant dense<0.000000e+00> : vector<3x8xf32>
    %66 = tpu.matmul %63, %65, %cst_56 {dimension_numbers = #tpu.dot_dimension_numbers<[1], [0], [0], [1], [0, 0, 1, 1], [], []>} : vector<3x4xf32>, vector<4x8xf32>, vector<3x8xf32> -> vector<3x8xf32>
    %67 = arith.addf %62, %66 : vector<3x8xf32>
    %c2_57 = arith.constant 2 : index
    %c0_58 = arith.constant 0 : index
    %68 = tpu.strided_load %arg18[%c2_57, %c0_58] {strides = array<i32: 2, 1>} : memref<14x8xf32, #tpu.memory_space<vmem>>, vector<3x4xf32>
    %c2_59 = arith.constant 2 : index
    %c0_60 = arith.constant 0 : index
    %c0_61 = arith.constant 0 : index
    %69 = vector.load %arg4[%c2_59, %c0_60, %c0_61] : memref<5x4x8xf32, #tpu.memory_space<vmem>>, vector<1x4x8xf32>
    %70 = vector.shape_cast %69 : vector<1x4x8xf32> to vector<4x8xf32>
    %cst_62 = arith.constant dense<0.000000e+00> : vector<3x8xf32>
    %71 = tpu.matmul %68, %70, %cst_62 {dimension_numbers = #tpu.dot_dimension_numbers<[1], [0], [0], [1], [0, 0, 1, 1], [], []>} : vector<3x4xf32>, vector<4x8xf32>, vector<3x8xf32> -> vector<3x8xf32>
    %72 = arith.addf %67, %71 : vector<3x8xf32>
    %c3_63 = arith.constant 3 : index
    %c0_64 = arith.constant 0 : index
    %73 = tpu.strided_load %arg18[%c3_63, %c0_64] {strides = array<i32: 2, 1>} : memref<14x8xf32, #tpu.memory_space<vmem>>, vector<3x4xf32>
    %c3_65 = arith.constant 3 : index
    %c0_66 = arith.constant 0 : index
    %c0_67 = arith.constant 0 : index
    %74 = vector.load %arg4[%c3_65, %c0_66, %c0_67] : memref<5x4x8xf32, #tpu.memory_space<vmem>>, vector<1x4x8xf32>
    %75 = vector.shape_cast %74 : vector<1x4x8xf32> to vector<4x8xf32>
    %cst_68 = arith.constant dense<0.000000e+00> : vector<3x8xf32>
    %76 = tpu.matmul %73, %75, %cst_68 {dimension_numbers = #tpu.dot_dimension_numbers<[1], [0], [0], [1], [0, 0, 1, 1], [], []>} : vector<3x4xf32>, vector<4x8xf32>, vector<3x8xf32> -> vector<3x8xf32>
    %77 = arith.addf %72, %76 : vector<3x8xf32>
    %c4_69 = arith.constant 4 : index
    %c0_70 = arith.constant 0 : index
    %78 = tpu.strided_load %arg18[%c4_69, %c0_70] {strides = array<i32: 2, 1>} : memref<14x8xf32, #tpu.memory_space<vmem>>, vector<3x4xf32>
    %c4_71 = arith.constant 4 : index
    %c0_72 = arith.constant 0 : index
    %c0_73 = arith.constant 0 : index
    %79 = vector.load %arg4[%c4_71, %c0_72, %c0_73] : memref<5x4x8xf32, #tpu.memory_space<vmem>>, vector<1x4x8xf32>
    %80 = vector.shape_cast %79 : vector<1x4x8xf32> to vector<4x8xf32>
    %cst_74 = arith.constant dense<0.000000e+00> : vector<3x8xf32>
    %81 = tpu.matmul %78, %80, %cst_74 {dimension_numbers = #tpu.dot_dimension_numbers<[1], [0], [0], [1], [0, 0, 1, 1], [], []>} : vector<3x4xf32>, vector<4x8xf32>, vector<3x8xf32> -> vector<3x8xf32>
    %82 = arith.addf %77, %81 : vector<3x8xf32>
    %c0_75 = arith.constant 0 : index
    %c0_76 = arith.constant 0 : index
    %83 = vector.load %arg9[%c0_75, %c0_76] : memref<1x8xf32, #tpu.memory_space<vmem>>, vector<1x8xf32>
    %84 = vector.broadcast %83 : vector<1x8xf32> to vector<3x8xf32>
    %85 = arith.addf %82, %84 : vector<3x8xf32>
    %cst_77 = arith.constant 0.000000e+00 : f32
    %86 = vector.broadcast %cst_77 : f32 to vector<3x8xf32>
    %87 = arith.cmpf oge, %85, %86 : vector<3x8xf32>
    %cst_78 = arith.constant 1.000000e-01 : f32
    %88 = vector.broadcast %cst_78 : f32 to vector<3x8xf32>
    %89 = arith.mulf %88, %85 : vector<3x8xf32>
    %90 = arith.select %87, %85, %89 : vector<3x8xi1>, vector<3x8xf32>
    %c0_79 = arith.constant 0 : index
    %c0_80 = arith.constant 0 : index
    %c0_81 = arith.constant 0 : index
    %c0_82 = arith.constant 0 : index
    %91 = vector.load %arg14[%c0_79, %c0_80, %c0_81, %c0_82] : memref<1x1x3x8xf32, #tpu.memory_space<vmem>>, vector<1x1x3x8xf32>
    %92 = vector.shape_cast %91 : vector<1x1x3x8xf32> to vector<3x8xf32>
    %93 = vector.shape_cast %90 : vector<3x8xf32> to vector<1x1x3x8xf32>
    tpu.vector_store %arg14[%c0_79, %c0_80, %c0_81, %c0_82], %93 {strides = array<i32>} : memref<1x1x3x8xf32, #tpu.memory_space<vmem>>, vector<1x1x3x8xf32>,
    %cst_83 = arith.constant 0.000000e+00 : f32
    %94 = vector.broadcast %cst_83 : f32 to vector<2x8xf32>
    %c0_84 = arith.constant 0 : index
    %c0_85 = arith.constant 0 : index
    %95 = vector.load %arg18[%c0_84, %c0_85] : memref<14x8xf32, #tpu.memory_space<vmem>>, vector<2x8xf32>
    tpu.vector_store %arg18[%c0_84, %c0_85], %94 {strides = array<i32>} : memref<14x8xf32, #tpu.memory_space<vmem>>, vector<2x8xf32>,
    %c5 = arith.constant 5 : index
    %c0_86 = arith.constant 0 : index
    %96 = vector.load %arg18[%c5, %c0_86] : memref<14x8xf32, #tpu.memory_space<vmem>>, vector<2x8xf32>
    tpu.vector_store %arg18[%c5, %c0_86], %94 {strides = array<i32>} : memref<14x8xf32, #tpu.memory_space<vmem>>, vector<2x8xf32>,
    %c2_87 = arith.constant 2 : index
    %c0_88 = arith.constant 0 : index
    %97 = vector.load %arg18[%c2_87, %c0_88] : memref<14x8xf32, #tpu.memory_space<vmem>>, vector<3x8xf32>
    tpu.vector_store %arg18[%c2_87, %c0_88], %90 {strides = array<i32>} : memref<14x8xf32, #tpu.memory_space<vmem>>, vector<3x8xf32>,
    %cst_89 = arith.constant 0.000000e+00 : f32
    %98 = vector.broadcast %cst_89 : f32 to vector<2x8xf32>
    %c0_90 = arith.constant 0 : index
    %c0_91 = arith.constant 0 : index
    %99 = tpu.strided_load %arg18[%c0_90, %c0_91] {strides = array<i32: 2, 1>} : memref<14x8xf32, #tpu.memory_space<vmem>>, vector<2x8xf32>
    %c0_92 = arith.constant 0 : index
    %c0_93 = arith.constant 0 : index
    %c0_94 = arith.constant 0 : index
    %100 = vector.load %arg5[%c0_92, %c0_93, %c0_94] : memref<5x8x8xf32, #tpu.memory_space<vmem>>, vector<1x8x8xf32>
    %101 = vector.shape_cast %100 : vector<1x8x8xf32> to vector<8x8xf32>
    %cst_95 = arith.constant dense<0.000000e+00> : vector<2x8xf32>
    %102 = tpu.matmul %99, %101, %cst_95 {dimension_numbers = #tpu.dot_dimension_numbers<[1], [0], [0], [1], [0, 0, 1, 1], [], []>} : vector<2x8xf32>, vector<8x8xf32>, vector<2x8xf32> -> vector<2x8xf32>
    %103 = arith.addf %98, %102 : vector<2x8xf32>
    %c1_96 = arith.constant 1 : index
    %c0_97 = arith.constant 0 : index
    %104 = tpu.strided_load %arg18[%c1_96, %c0_97] {strides = array<i32: 2, 1>} : memref<14x8xf32, #tpu.memory_space<vmem>>, vector<2x8xf32>
    %c1_98 = arith.constant 1 : index
    %c0_99 = arith.constant 0 : index
    %c0_100 = arith.constant 0 : index
    %105 = vector.load %arg5[%c1_98, %c0_99, %c0_100] : memref<5x8x8xf32, #tpu.memory_space<vmem>>, vector<1x8x8xf32>
    %106 = vector.shape_cast %105 : vector<1x8x8xf32> to vector<8x8xf32>
    %cst_101 = arith.constant dense<0.000000e+00> : vector<2x8xf32>
    %107 = tpu.matmul %104, %106, %cst_101 {dimension_numbers = #tpu.dot_dimension_numbers<[1], [0], [0], [1], [0, 0, 1, 1], [], []>} : vector<2x8xf32>, vector<8x8xf32>, vector<2x8xf32> -> vector<2x8xf32>
    %108 = arith.addf %103, %107 : vector<2x8xf32>
    %c2_102 = arith.constant 2 : index
    %c0_103 = arith.constant 0 : index
    %109 = tpu.strided_load %arg18[%c2_102, %c0_103] {strides = array<i32: 2, 1>} : memref<14x8xf32, #tpu.memory_space<vmem>>, vector<2x8xf32>
    %c2_104 = arith.constant 2 : index
    %c0_105 = arith.constant 0 : index
    %c0_106 = arith.constant 0 : index
    %110 = vector.load %arg5[%c2_104, %c0_105, %c0_106] : memref<5x8x8xf32, #tpu.memory_space<vmem>>, vector<1x8x8xf32>
    %111 = vector.shape_cast %110 : vector<1x8x8xf32> to vector<8x8xf32>
    %cst_107 = arith.constant dense<0.000000e+00> : vector<2x8xf32>
    %112 = tpu.matmul %109, %111, %cst_107 {dimension_numbers = #tpu.dot_dimension_numbers<[1], [0], [0], [1], [0, 0, 1, 1], [], []>} : vector<2x8xf32>, vector<8x8xf32>, vector<2x8xf32> -> vector<2x8xf32>
    %113 = arith.addf %108, %112 : vector<2x8xf32>
    %c3_108 = arith.constant 3 : index
    %c0_109 = arith.constant 0 : index
    %114 = tpu.strided_load %arg18[%c3_108, %c0_109] {strides = array<i32: 2, 1>} : memref<14x8xf32, #tpu.memory_space<vmem>>, vector<2x8xf32>
    %c3_110 = arith.constant 3 : index
    %c0_111 = arith.constant 0 : index
    %c0_112 = arith.constant 0 : index
    %115 = vector.load %arg5[%c3_110, %c0_111, %c0_112] : memref<5x8x8xf32, #tpu.memory_space<vmem>>, vector<1x8x8xf32>
    %116 = vector.shape_cast %115 : vector<1x8x8xf32> to vector<8x8xf32>
    %cst_113 = arith.constant dense<0.000000e+00> : vector<2x8xf32>
    %117 = tpu.matmul %114, %116, %cst_113 {dimension_numbers = #tpu.dot_dimension_numbers<[1], [0], [0], [1], [0, 0, 1, 1], [], []>} : vector<2x8xf32>, vector<8x8xf32>, vector<2x8xf32> -> vector<2x8xf32>
    %118 = arith.addf %113, %117 : vector<2x8xf32>
    %c4_114 = arith.constant 4 : index
    %c0_115 = arith.constant 0 : index
    %119 = tpu.strided_load %arg18[%c4_114, %c0_115] {strides = array<i32: 2, 1>} : memref<14x8xf32, #tpu.memory_space<vmem>>, vector<2x8xf32>
    %c4_116 = arith.constant 4 : index
    %c0_117 = arith.constant 0 : index
    %c0_118 = arith.constant 0 : index
    %120 = vector.load %arg5[%c4_116, %c0_117, %c0_118] : memref<5x8x8xf32, #tpu.memory_space<vmem>>, vector<1x8x8xf32>
    %121 = vector.shape_cast %120 : vector<1x8x8xf32> to vector<8x8xf32>
    %cst_119 = arith.constant dense<0.000000e+00> : vector<2x8xf32>
    %122 = tpu.matmul %119, %121, %cst_119 {dimension_numbers = #tpu.dot_dimension_numbers<[1], [0], [0], [1], [0, 0, 1, 1], [], []>} : vector<2x8xf32>, vector<8x8xf32>, vector<2x8xf32> -> vector<2x8xf32>
    %123 = arith.addf %118, %122 : vector<2x8xf32>
    %c0_120 = arith.constant 0 : index
    %c0_121 = arith.constant 0 : index
    %124 = vector.load %arg10[%c0_120, %c0_121] : memref<1x8xf32, #tpu.memory_space<vmem>>, vector<1x8xf32>
    %125 = vector.broadcast %124 : vector<1x8xf32> to vector<2x8xf32>
    %126 = arith.addf %123, %125 : vector<2x8xf32>
    %cst_122 = arith.constant 0.000000e+00 : f32
    %127 = vector.broadcast %cst_122 : f32 to vector<2x8xf32>
    %128 = arith.cmpf oge, %126, %127 : vector<2x8xf32>
    %cst_123 = arith.constant 1.000000e-01 : f32
    %129 = vector.broadcast %cst_123 : f32 to vector<2x8xf32>
    %130 = arith.mulf %129, %126 : vector<2x8xf32>
    %131 = arith.select %128, %126, %130 : vector<2x8xi1>, vector<2x8xf32>
    %c0_124 = arith.constant 0 : index
    %c0_125 = arith.constant 0 : index
    %c0_126 = arith.constant 0 : index
    %c0_127 = arith.constant 0 : index
    %132 = vector.load %arg15[%c0_124, %c0_125, %c0_126, %c0_127] : memref<1x1x2x8xf32, #tpu.memory_space<vmem>>, vector<1x1x2x8xf32>
    %133 = vector.shape_cast %132 : vector<1x1x2x8xf32> to vector<2x8xf32>
    %134 = vector.shape_cast %131 : vector<2x8xf32> to vector<1x1x2x8xf32>
    tpu.vector_store %arg15[%c0_124, %c0_125, %c0_126, %c0_127], %134 {strides = array<i32>} : memref<1x1x2x8xf32, #tpu.memory_space<vmem>>, vector<1x1x2x8xf32>,
    %cst_128 = arith.constant 0.000000e+00 : f32
    %135 = vector.broadcast %cst_128 : f32 to vector<2x8xf32>
    %c0_129 = arith.constant 0 : index
    %c0_130 = arith.constant 0 : index
    %136 = vector.load %arg18[%c0_129, %c0_130] : memref<14x8xf32, #tpu.memory_space<vmem>>, vector<2x8xf32>
    tpu.vector_store %arg18[%c0_129, %c0_130], %135 {strides = array<i32>} : memref<14x8xf32, #tpu.memory_space<vmem>>, vector<2x8xf32>,
    %c4_131 = arith.constant 4 : index
    %c0_132 = arith.constant 0 : index
    %137 = vector.load %arg18[%c4_131, %c0_132] : memref<14x8xf32, #tpu.memory_space<vmem>>, vector<2x8xf32>
    tpu.vector_store %arg18[%c4_131, %c0_132], %135 {strides = array<i32>} : memref<14x8xf32, #tpu.memory_space<vmem>>, vector<2x8xf32>,
    %c2_133 = arith.constant 2 : index
    %c0_134 = arith.constant 0 : index
    %138 = vector.load %arg18[%c2_133, %c0_134] : memref<14x8xf32, #tpu.memory_space<vmem>>, vector<2x8xf32>
    tpu.vector_store %arg18[%c2_133, %c0_134], %131 {strides = array<i32>} : memref<14x8xf32, #tpu.memory_space<vmem>>, vector<2x8xf32>,
    %cst_135 = arith.constant 0.000000e+00 : f32
    %139 = vector.broadcast %cst_135 : f32 to vector<2x8xf32>
    %c0_136 = arith.constant 0 : index
    %c0_137 = arith.constant 0 : index
    %140 = vector.load %arg18[%c0_136, %c0_137] : memref<14x8xf32, #tpu.memory_space<vmem>>, vector<2x8xf32>
    %c0_138 = arith.constant 0 : index
    %c0_139 = arith.constant 0 : index
    %c0_140 = arith.constant 0 : index
    %141 = vector.load %arg6[%c0_138, %c0_139, %c0_140] : memref<5x8x8xf32, #tpu.memory_space<vmem>>, vector<1x8x8xf32>
    %142 = vector.shape_cast %141 : vector<1x8x8xf32> to vector<8x8xf32>
    %cst_141 = arith.constant dense<0.000000e+00> : vector<2x8xf32>
    %143 = tpu.matmul %140, %142, %cst_141 {dimension_numbers = #tpu.dot_dimension_numbers<[1], [0], [0], [1], [0, 0, 1, 1], [], []>} : vector<2x8xf32>, vector<8x8xf32>, vector<2x8xf32> -> vector<2x8xf32>
    %144 = arith.addf %139, %143 : vector<2x8xf32>
    %c1_142 = arith.constant 1 : index
    %c0_143 = arith.constant 0 : index
    %145 = vector.load %arg18[%c1_142, %c0_143] : memref<14x8xf32, #tpu.memory_space<vmem>>, vector<2x8xf32>
    %c1_144 = arith.constant 1 : index
    %c0_145 = arith.constant 0 : index
    %c0_146 = arith.constant 0 : index
    %146 = vector.load %arg6[%c1_144, %c0_145, %c0_146] : memref<5x8x8xf32, #tpu.memory_space<vmem>>, vector<1x8x8xf32>
    %147 = vector.shape_cast %146 : vector<1x8x8xf32> to vector<8x8xf32>
    %cst_147 = arith.constant dense<0.000000e+00> : vector<2x8xf32>
    %148 = tpu.matmul %145, %147, %cst_147 {dimension_numbers = #tpu.dot_dimension_numbers<[1], [0], [0], [1], [0, 0, 1, 1], [], []>} : vector<2x8xf32>, vector<8x8xf32>, vector<2x8xf32> -> vector<2x8xf32>
    %149 = arith.addf %144, %148 : vector<2x8xf32>
    %c2_148 = arith.constant 2 : index
    %c0_149 = arith.constant 0 : index
    %150 = vector.load %arg18[%c2_148, %c0_149] : memref<14x8xf32, #tpu.memory_space<vmem>>, vector<2x8xf32>
    %c2_150 = arith.constant 2 : index
    %c0_151 = arith.constant 0 : index
    %c0_152 = arith.constant 0 : index
    %151 = vector.load %arg6[%c2_150, %c0_151, %c0_152] : memref<5x8x8xf32, #tpu.memory_space<vmem>>, vector<1x8x8xf32>
    %152 = vector.shape_cast %151 : vector<1x8x8xf32> to vector<8x8xf32>
    %cst_153 = arith.constant dense<0.000000e+00> : vector<2x8xf32>
    %153 = tpu.matmul %150, %152, %cst_153 {dimension_numbers = #tpu.dot_dimension_numbers<[1], [0], [0], [1], [0, 0, 1, 1], [], []>} : vector<2x8xf32>, vector<8x8xf32>, vector<2x8xf32> -> vector<2x8xf32>
    %154 = arith.addf %149, %153 : vector<2x8xf32>
    %c3_154 = arith.constant 3 : index
    %c0_155 = arith.constant 0 : index
    %155 = vector.load %arg18[%c3_154, %c0_155] : memref<14x8xf32, #tpu.memory_space<vmem>>, vector<2x8xf32>
    %c3_156 = arith.constant 3 : index
    %c0_157 = arith.constant 0 : index
    %c0_158 = arith.constant 0 : index
    %156 = vector.load %arg6[%c3_156, %c0_157, %c0_158] : memref<5x8x8xf32, #tpu.memory_space<vmem>>, vector<1x8x8xf32>
    %157 = vector.shape_cast %156 : vector<1x8x8xf32> to vector<8x8xf32>
    %cst_159 = arith.constant dense<0.000000e+00> : vector<2x8xf32>
    %158 = tpu.matmul %155, %157, %cst_159 {dimension_numbers = #tpu.dot_dimension_numbers<[1], [0], [0], [1], [0, 0, 1, 1], [], []>} : vector<2x8xf32>, vector<8x8xf32>, vector<2x8xf32> -> vector<2x8xf32>
    %159 = arith.addf %154, %158 : vector<2x8xf32>
    %c4_160 = arith.constant 4 : index
    %c0_161 = arith.constant 0 : index
    %160 = vector.load %arg18[%c4_160, %c0_161] : memref<14x8xf32, #tpu.memory_space<vmem>>, vector<2x8xf32>
    %c4_162 = arith.constant 4 : index
    %c0_163 = arith.constant 0 : index
    %c0_164 = arith.constant 0 : index
    %161 = vector.load %arg6[%c4_162, %c0_163, %c0_164] : memref<5x8x8xf32, #tpu.memory_space<vmem>>, vector<1x8x8xf32>
    %162 = vector.shape_cast %161 : vector<1x8x8xf32> to vector<8x8xf32>
    %cst_165 = arith.constant dense<0.000000e+00> : vector<2x8xf32>
    %163 = tpu.matmul %160, %162, %cst_165 {dimension_numbers = #tpu.dot_dimension_numbers<[1], [0], [0], [1], [0, 0, 1, 1], [], []>} : vector<2x8xf32>, vector<8x8xf32>, vector<2x8xf32> -> vector<2x8xf32>
    %164 = arith.addf %159, %163 : vector<2x8xf32>
    %c0_166 = arith.constant 0 : index
    %c0_167 = arith.constant 0 : index
    %165 = vector.load %arg11[%c0_166, %c0_167] : memref<1x8xf32, #tpu.memory_space<vmem>>, vector<1x8xf32>
    %166 = vector.broadcast %165 : vector<1x8xf32> to vector<2x8xf32>
    %167 = arith.addf %164, %166 : vector<2x8xf32>
    %cst_168 = arith.constant 0.000000e+00 : f32
    %168 = vector.broadcast %cst_168 : f32 to vector<2x8xf32>
    %169 = arith.cmpf oge, %167, %168 : vector<2x8xf32>
    %cst_169 = arith.constant 1.000000e-01 : f32
    %170 = vector.broadcast %cst_169 : f32 to vector<2x8xf32>
    %171 = arith.mulf %170, %167 : vector<2x8xf32>
    %172 = arith.select %169, %167, %171 : vector<2x8xi1>, vector<2x8xf32>
    %c0_170 = arith.constant 0 : index
    %c0_171 = arith.constant 0 : index
    %c0_172 = arith.constant 0 : index
    %c0_173 = arith.constant 0 : index
    %173 = vector.load %arg16[%c0_170, %c0_171, %c0_172, %c0_173] : memref<1x1x2x8xf32, #tpu.memory_space<vmem>>, vector<1x1x2x8xf32>
    %174 = vector.shape_cast %173 : vector<1x1x2x8xf32> to vector<2x8xf32>
    %175 = vector.shape_cast %172 : vector<2x8xf32> to vector<1x1x2x8xf32>
    tpu.vector_store %arg16[%c0_170, %c0_171, %c0_172, %c0_173], %175 {strides = array<i32>} : memref<1x1x2x8xf32, #tpu.memory_space<vmem>>, vector<1x1x2x8xf32>,
    %cst_174 = arith.constant 0.000000e+00 : f32
    %176 = vector.broadcast %cst_174 : f32 to vector<1x8xf32>
    %c0_175 = arith.constant 0 : index
    %c0_176 = arith.constant 0 : index
    %177 = vector.load %arg18[%c0_175, %c0_176] : memref<14x8xf32, #tpu.memory_space<vmem>>, vector<1x8xf32>
    tpu.vector_store %arg18[%c0_175, %c0_176], %176 {strides = array<i32>} : memref<14x8xf32, #tpu.memory_space<vmem>>, vector<1x8xf32>,
    %c3_177 = arith.constant 3 : index
    %c0_178 = arith.constant 0 : index
    %178 = vector.load %arg18[%c3_177, %c0_178] : memref<14x8xf32, #tpu.memory_space<vmem>>, vector<1x8xf32>
    tpu.vector_store %arg18[%c3_177, %c0_178], %176 {strides = array<i32>} : memref<14x8xf32, #tpu.memory_space<vmem>>, vector<1x8xf32>,
    %c1_179 = arith.constant 1 : index
    %c0_180 = arith.constant 0 : index
    %179 = vector.load %arg18[%c1_179, %c0_180] : memref<14x8xf32, #tpu.memory_space<vmem>>, vector<2x8xf32>
    tpu.vector_store %arg18[%c1_179, %c0_180], %172 {strides = array<i32>} : memref<14x8xf32, #tpu.memory_space<vmem>>, vector<2x8xf32>,
    %cst_181 = arith.constant 0.000000e+00 : f32
    %180 = vector.broadcast %cst_181 : f32 to vector<2x1xf32>
    %c0_182 = arith.constant 0 : index
    %c0_183 = arith.constant 0 : index
    %181 = vector.load %arg18[%c0_182, %c0_183] : memref<14x8xf32, #tpu.memory_space<vmem>>, vector<2x8xf32>
    %c0_184 = arith.constant 0 : index
    %c0_185 = arith.constant 0 : index
    %c0_186 = arith.constant 0 : index
    %182 = vector.load %arg7[%c0_184, %c0_185, %c0_186] : memref<3x8x1xf32, #tpu.memory_space<vmem>>, vector<1x8x1xf32>
    %183 = vector.shape_cast %182 : vector<1x8x1xf32> to vector<8x1xf32>
    %cst_187 = arith.constant dense<0.000000e+00> : vector<2x1xf32>
    %184 = tpu.matmul %181, %183, %cst_187 {dimension_numbers = #tpu.dot_dimension_numbers<[1], [0], [0], [1], [0, 0, 1, 1], [], []>} : vector<2x8xf32>, vector<8x1xf32>, vector<2x1xf32> -> vector<2x1xf32>
    %185 = arith.addf %180, %184 : vector<2x1xf32>
    %c1_188 = arith.constant 1 : index
    %c0_189 = arith.constant 0 : index
    %186 = vector.load %arg18[%c1_188, %c0_189] : memref<14x8xf32, #tpu.memory_space<vmem>>, vector<2x8xf32>
    %c1_190 = arith.constant 1 : index
    %c0_191 = arith.constant 0 : index
    %c0_192 = arith.constant 0 : index
    %187 = vector.load %arg7[%c1_190, %c0_191, %c0_192] : memref<3x8x1xf32, #tpu.memory_space<vmem>>, vector<1x8x1xf32>
    %188 = vector.shape_cast %187 : vector<1x8x1xf32> to vector<8x1xf32>
    %cst_193 = arith.constant dense<0.000000e+00> : vector<2x1xf32>
    %189 = tpu.matmul %186, %188, %cst_193 {dimension_numbers = #tpu.dot_dimension_numbers<[1], [0], [0], [1], [0, 0, 1, 1], [], []>} : vector<2x8xf32>, vector<8x1xf32>, vector<2x1xf32> -> vector<2x1xf32>
    %190 = arith.addf %185, %189 : vector<2x1xf32>
    %c2_194 = arith.constant 2 : index
    %c0_195 = arith.constant 0 : index
    %191 = vector.load %arg18[%c2_194, %c0_195] : memref<14x8xf32, #tpu.memory_space<vmem>>, vector<2x8xf32>
    %c2_196 = arith.constant 2 : index
    %c0_197 = arith.constant 0 : index
    %c0_198 = arith.constant 0 : index
    %192 = vector.load %arg7[%c2_196, %c0_197, %c0_198] : memref<3x8x1xf32, #tpu.memory_space<vmem>>, vector<1x8x1xf32>
    %193 = vector.shape_cast %192 : vector<1x8x1xf32> to vector<8x1xf32>
    %cst_199 = arith.constant dense<0.000000e+00> : vector<2x1xf32>
    %194 = tpu.matmul %191, %193, %cst_199 {dimension_numbers = #tpu.dot_dimension_numbers<[1], [0], [0], [1], [0, 0, 1, 1], [], []>} : vector<2x8xf32>, vector<8x1xf32>, vector<2x1xf32> -> vector<2x1xf32>
    %195 = arith.addf %190, %194 : vector<2x1xf32>
    %c0_200 = arith.constant 0 : index
    %c0_201 = arith.constant 0 : index
    %196 = vector.load %arg12[%c0_200, %c0_201] : memref<1x1xf32, #tpu.memory_space<vmem>>, vector<1x1xf32>
    %197 = vector.broadcast %196 : vector<1x1xf32> to vector<2x1xf32>
    %198 = arith.addf %195, %197 : vector<2x1xf32>
    %c0_202 = arith.constant 0 : index
    %c0_203 = arith.constant 0 : index
    %c0_204 = arith.constant 0 : index
    %c0_205 = arith.constant 0 : index
    %199 = vector.load %arg17[%c0_202, %c0_203, %c0_204, %c0_205] : memref<1x1x2x1xf32, #tpu.memory_space<vmem>>, vector<1x1x2x1xf32>
    %200 = vector.shape_cast %199 : vector<1x1x2x1xf32> to vector<2x1xf32>
    %201 = vector.shape_cast %198 : vector<2x1xf32> to vector<1x1x2x1xf32>
    tpu.vector_store %arg17[%c0_202, %c0_203, %c0_204, %c0_205], %201 {strides = array<i32>} : memref<1x1x2x1xf32, #tpu.memory_space<vmem>>, vector<1x1x2x1xf32>,
    return
  }
  func.func @transform_0(%arg0: i32, %arg1: i32) -> (i32, i32, i32, i32) {
    %c0_i32 = arith.constant 0 : i32
    %c0_i32_0 = arith.constant 0 : i32
    %c0_i32_1 = arith.constant 0 : i32
    return %arg0, %arg1, %c0_i32, %c0_i32_0 : i32, i32, i32, i32
  }
  func.func @transform_1(%arg0: i32, %arg1: i32) -> (i32, i32, i32) {
    %c0_i32 = arith.constant 0 : i32
    %c0_i32_0 = arith.constant 0 : i32
    %c0_i32_1 = arith.constant 0 : i32
    %c0_i32_2 = arith.constant 0 : i32
    return %c0_i32, %c0_i32_0, %c0_i32_1 : i32, i32, i32
  }
  func.func @transform_2(%arg0: i32, %arg1: i32) -> (i32, i32, i32) {
    %c0_i32 = arith.constant 0 : i32
    %c0_i32_0 = arith.constant 0 : i32
    %c0_i32_1 = arith.constant 0 : i32
    %c0_i32_2 = arith.constant 0 : i32
    return %c0_i32, %c0_i32_0, %c0_i32_1 : i32, i32, i32
  }
  func.func @transform_3(%arg0: i32, %arg1: i32) -> (i32, i32, i32) {
    %c0_i32 = arith.constant 0 : i32
    %c0_i32_0 = arith.constant 0 : i32
    %c0_i32_1 = arith.constant 0 : i32
    %c0_i32_2 = arith.constant 0 : i32
    return %c0_i32, %c0_i32_0, %c0_i32_1 : i32, i32, i32
  }
  func.func @transform_4(%arg0: i32, %arg1: i32) -> (i32, i32, i32) {
    %c0_i32 = arith.constant 0 : i32
    %c0_i32_0 = arith.constant 0 : i32
    %c0_i32_1 = arith.constant 0 : i32
    %c0_i32_2 = arith.constant 0 : i32
    return %c0_i32, %c0_i32_0, %c0_i32_1 : i32, i32, i32
  }
  func.func @transform_5(%arg0: i32, %arg1: i32) -> (i32, i32, i32) {
    %c0_i32 = arith.constant 0 : i32
    %c0_i32_0 = arith.constant 0 : i32
    %c0_i32_1 = arith.constant 0 : i32
    %c0_i32_2 = arith.constant 0 : i32
    return %c0_i32, %c0_i32_0, %c0_i32_1 : i32, i32, i32
  }
  func.func @transform_6(%arg0: i32, %arg1: i32) -> (i32, i32) {
    %c0_i32 = arith.constant 0 : i32
    %c0_i32_0 = arith.constant 0 : i32
    %c0_i32_1 = arith.constant 0 : i32
    return %c0_i32, %c0_i32_0 : i32, i32
  }
  func.func @transform_7(%arg0: i32, %arg1: i32) -> (i32, i32) {
    %c0_i32 = arith.constant 0 : i32
    %c0_i32_0 = arith.constant 0 : i32
    %c0_i32_1 = arith.constant 0 : i32
    return %c0_i32, %c0_i32_0 : i32, i32
  }
  func.func @transform_8(%arg0: i32, %arg1: i32) -> (i32, i32) {
    %c0_i32 = arith.constant 0 : i32
    %c0_i32_0 = arith.constant 0 : i32
    %c0_i32_1 = arith.constant 0 : i32
    return %c0_i32, %c0_i32_0 : i32, i32
  }
  func.func @transform_9(%arg0: i32, %arg1: i32) -> (i32, i32) {
    %c0_i32 = arith.constant 0 : i32
    %c0_i32_0 = arith.constant 0 : i32
    %c0_i32_1 = arith.constant 0 : i32
    return %c0_i32, %c0_i32_0 : i32, i32
  }
  func.func @transform_10(%arg0: i32, %arg1: i32) -> (i32, i32) {
    %c0_i32 = arith.constant 0 : i32
    %c0_i32_0 = arith.constant 0 : i32
    %c0_i32_1 = arith.constant 0 : i32
    return %c0_i32, %c0_i32_0 : i32, i32
  }
  func.func @transform_11(%arg0: i32, %arg1: i32) -> (i32, i32, i32, i32) {
    %c0_i32 = arith.constant 0 : i32
    %c0_i32_0 = arith.constant 0 : i32
    %c0_i32_1 = arith.constant 0 : i32
    return %arg0, %arg1, %c0_i32, %c0_i32_0 : i32, i32, i32, i32
  }
  func.func @transform_12(%arg0: i32, %arg1: i32) -> (i32, i32, i32, i32) {
    %c0_i32 = arith.constant 0 : i32
    %c0_i32_0 = arith.constant 0 : i32
    %c0_i32_1 = arith.constant 0 : i32
    return %arg0, %arg1, %c0_i32, %c0_i32_0 : i32, i32, i32, i32
  }
  func.func @transform_13(%arg0: i32, %arg1: i32) -> (i32, i32, i32, i32) {
    %c0_i32 = arith.constant 0 : i32
    %c0_i32_0 = arith.constant 0 : i32
    %c0_i32_1 = arith.constant 0 : i32
    return %arg0, %arg1, %c0_i32, %c0_i32_0 : i32, i32, i32, i32
  }
  func.func @transform_14(%arg0: i32, %arg1: i32) -> (i32, i32, i32, i32) {
    %c0_i32 = arith.constant 0 : i32
    %c0_i32_0 = arith.constant 0 : i32
    %c0_i32_1 = arith.constant 0 : i32
    return %arg0, %arg1, %c0_i32, %c0_i32_0 : i32, i32, i32, i32
  }
  func.func @transform_15(%arg0: i32, %arg1: i32) -> (i32, i32, i32, i32) {
    %c0_i32 = arith.constant 0 : i32
    %c0_i32_0 = arith.constant 0 : i32
    %c0_i32_1 = arith.constant 0 : i32
    return %arg0, %arg1, %c0_i32, %c0_i32_0 : i32, i32, i32, i32
  }
}

</mosaic_0001>

<bundles_post_ra>
// kernel: multi_period_discriminator.3
= control target key start
LH: loop header
LB: loop body
LE: loop exit
PB: predicated region body
PF: predicated region fallthrough
CT: control target
= control target key end

     0   :  { %s2878_s20 = smov 0   ;;  %s2880_s21 = smov 0   ;;  %s3138_s0 = inlined_call_operand.vmem [shape: f32[2,4,24,1], index: 0, kind: input, shape index: {}]   ;;  %s3139_s1 = inlined_call_operand.vmem [shape: f32[5,1,4], index: 1, kind: input, shape index: {}]   ;;  %s3140_s2 = inlined_call_operand.vmem [shape: f32[5,4,8], index: 2, kind: input, shape index: {}]   ;;  %s3141_s3 = inlined_call_operand.vmem [shape: f32[5,8,8], index: 3, kind: input, shape index: {}]   ;;  %s3142_s4 = inlined_call_operand.vmem [shape: f32[5,8,8], index: 4, kind: input, shape index: {}]   ;;  %s3143_s5 = inlined_call_operand.vmem [shape: f32[3,8,1], index: 5, kind: input, shape index: {}]   ;;  %s3144_s6 = inlined_call_operand.vmem [shape: f32[1,4], index: 6, kind: input, shape index: {}]   ;;  %s3145_s7 = inlined_call_operand.vmem [shape: f32[1,8], index: 7, kind: input, shape index: {}]   ;;  %s3146_s8 = inlined_call_operand.vmem [shape: f32[1,8], index: 8, kind: input, shape index: {}]   ;;  %s3147_s9 = inlined_call_operand.vmem [shape: f32[1,8], index: 9, kind: input, shape index: {}]   ;;  %s3148_s10 = inlined_call_operand.<no memory space> [shape: f32[1,1], index: 10, kind: input, shape index: {}]   ;;  %s3149_s11 = inlined_call_operand.vmem [shape: f32[2,4,12,4], index: 11, kind: output, shape index: {0}]   ;;  %s3150_s12 = inlined_call_operand.vmem [shape: f32[2,4,6,8], index: 12, kind: output, shape index: {1}]   ;;  %s3151_s13 = inlined_call_operand.vmem [shape: f32[2,4,3,8], index: 13, kind: output, shape index: {2}]   ;;  %s3152_s14 = inlined_call_operand.vmem [shape: f32[2,4,3,8], index: 14, kind: output, shape index: {3}]   ;;  %s3153_s15 = inlined_call_operand.vmem [shape: f32[2,4,3,1], index: 15, kind: output, shape index: {4}]  }
   0x1   :  { %v21_v0 = vstv %s3148_s10  ;;  %s2882_s22 = smov 0   ;;  %s2884_s23 = smov 0  }
   0x2   :  { %22 = vst [vmem:[#allocation3] sm:$0x1] %v21_v0  ;;  %s2886_s24 = smov 0  }
   0x3 LB: > { %s37_s10 = sadd.s32 1, %s2782_s22  ;;  %s40_s25 = sadd.s32 1, %s2786_s23  ;;  %s2790_s24 = sphi %s2886_s24, %s28_s24   ;;  %s2786_s23 = sphi %s2884_s23, %s3157_s23   ;;  %s2782_s22 = sphi %s2882_s22, %s3156_s22   ;;  %s2778_s21 = sphi %s2880_s21, %s3155_s21   ;;  %s2774_s20 = sphi %s2878_s20, %s3154_s20  }
   0x4   : > { %p38_p0 = scmp.ge.s32.totalorder %s37_s10, 4  ;;  %p2513_p1 = scmp.ge.s32.totalorder %s2790_s24, 1 }
   0x5   : > { %p476_p2 = scmp.lt.s32.totalorder %s2790_s24, 9 }
   0x6   : > { %s3159_s10 = smov (%p38_p0, %s37_s10), 0  ;;  %s3161_s25 = smov (!%p38_p0, %s40_s25), %s2786_s23 }
   0x7   : > { %p477_p3 = pnand %p2513_p1, %p476_p2  ;;  %p42_p4 = scmp.ge.s32.totalorder %s3161_s25, 2 }
   0x8   : > { %p564_p5 = scmp.lt.s32.totalorder (!%p477_p3), %s2778_s21, 1  ;;  %p566_p6 = scmp.lt.s32.totalorder (!%p477_p3), %s2774_s20, 3  ;;  %vm617_vm0 = vcmask (!%p477_p3), 1024   ;;  %v2792_v1 = vmov (!%p477_p3), 0   ;;  %v2793_v2 = vmov (!%p477_p3), 0.0   ;;  %vm620_vm1 = vcmask (!%p477_p3), 7168  }
   0x9   : > { %s3163_s25 = smov (%p42_p4, %s3161_s25), 0  ;;  %480 = sbr.rel (%p477_p3) target bundleno = 1120 (0x460), region = 64 }
   0xa   : > { %2751 = vset.pattern.permute.xlu1 (!%p477_p3), %v2792_v1  ;;  %2750 = vset.pattern.permute.xlu0 (!%p477_p3), %v2792_v1  ;;  %618 = vst.msk [vmem:[#allocation2] sm:$0x3] (!%p477_p3), %vm617_vm0, %v2793_v2  ;;  %619 = vst.msk [vmem:[#allocation2 + $0x1a] sm:$0x3] (!%p477_p3), %vm617_vm0, %v2793_v2  ;;  %vm771_vm2 = vcmask (!%p477_p3), 25600   ;;  %vm784_vm3 = vcmask (!%p477_p3), 1043456  }
   0xb   : > { %2615 = vmatprep.subr.mxu0 (!%p477_p3), %v2793_v2  ;;  %2620 = vmatprep.subr.mxu1 (!%p477_p3), %v2793_v2  ;;  %v2536_v16 = vld [vmem:[%s3140_s2 + $0x4] sm:$0xf] (!%p477_p3)  ;;  %v777_v17 = vld [vmem:[%s3140_s2] sm:$0xf] (!%p477_p3)  ;;  %vm2794_vm4 = vmmov (!%p477_p3), 0   ;;  %vm769_vm5 = vcmask (!%p477_p3), 27648  }
   0xc   : > { %2616 = vmatpush3.msk.msra.mxu0 (!%p477_p3), %vm784_vm3, %v2536_v16  ;;  %2617 = vmatprep.mubr.msk.f32.mxu0 (!%p477_p3), %vm2794_vm4, %v2793_v2  ;;  %v2528_v22 = vld [vmem:[%s3139_s1 + $0x1] ss:$0 sm:$0xff] (!%p477_p3)  ;;  %v2526_v23 = vld [vmem:[%s3139_s1] ss:$0 sm:$0xff] (!%p477_p3)  ;;  %v2530_v24 = vld [vmem:[%s3139_s1 + $0x2] ss:$0 sm:$0xff] (!%p477_p3) }
   0xd   : > { %2621 = vmatpush3.msk.msra.mxu1 (!%p477_p3), %vm784_vm3, %v777_v17  ;;  %2622 = vmatprep.mubr.msk.f32.mxu1 (!%p477_p3), %vm2794_vm4, %v2793_v2  ;;  %v2532_v31 = vld [vmem:[%s3139_s1 + $0x3] ss:$0 sm:$0xff] (!%p477_p3)  ;;  %v2534_v40 = vld [vmem:[%s3139_s1 + $0x4] ss:$0 sm:$0xff] (!%p477_p3)  ;;  %v2535_v49 = vld [vmem:[%s3144_s6] ss:$0 sm:$0xff] (!%p477_p3) }
   0xe   : > { %2625 = vmatprep.subr.mxu0 (!%p477_p3), %v2793_v2  ;;  %2630 = vmatprep.subr.mxu1 (!%p477_p3), %v2793_v2  ;;  %vm767_vm6 = vcmask (!%p477_p3), 31744   ;;  %v2541_v58 = vld [vmem:[%s3140_s2 + $0x8] sm:$0xf] (!%p477_p3)  ;;  %v2544_v59 = vld [vmem:[%s3140_s2 + $0xc] sm:$0xf] (!%p477_p3)  ;;  %vm1187_vm9 = vcmask (!%p477_p3), 58368  }
   0xf   : > { %v2547_v62 = vld [vmem:[%s3140_s2 + $0x10] sm:$0xf] (!%p477_p3)  ;;  %v2550_v17 = vld [vmem:[%s3145_s7] ss:$0 sm:$0xff] (!%p477_p3)  ;;  %vm1185_vm11 = vcmask (!%p477_p3), 62464   ;;  %vm1196_vm12 = vcmask (!%p477_p3), 64512  }
  0x10   : > { %s3165_s21 = smov (!%p564_p5, %s2778_s21), 1  ;;  %s3167_s20 = smov (!%p566_p6, %s2774_s20), 3  ;;  %vm1585_vm14 = vcmask 59392   ;;  %vm1984_vm15 = vcmask 57344  }
  0x11   : > { %s2706_s26 = smul.u32 12, %s3165_s21 }
  0x12   : > { %s2705_s27 = smul.u32 3, %s3167_s20 }
  0x14   : > { %s570_s28 = sadd.s32 %s2706_s26, %s2705_s27  ;;  %s2515_s27 = sshll.u32 %s3167_s20, 1 }
  0x15   : > { %s2514_s29 = sshll.u32 %s570_s28, 3  ;;  %s2516_s28 = sshll.u32 %s3165_s21, 3 }
  0x16   : > { %s572_s17 = scalar_lea.vmem %s3138_s0, %s2514_s29  ;;  %s579_s16 = sadd.s32 %s2516_s28, %s2515_s27 }
  0x17   : > { %v614_v3 = vld [vmem:[%s572_s17] sm:$0xff]  ;;  %v615_v4 = vld [vmem:[%s572_s17 + $0x8] sm:$0xff]  ;;  %v616_v5 = vld [vmem:[%s572_s17 + $0x10] sm:$0xff]  ;;  %s2517_s19 = sshll.u32 %s579_s16, 3  ;;  %s2518_s28 = sshll.u32 %s3165_s21, 2 }
  0x18   : > { %621 = vst.msk [vmem:[#allocation2 + $0x2] sm:$0xff] %vm620_vm1, %v614_v3  ;;  %622 = vst.msk [vmem:[#allocation2 + $0xa] sm:$0xff] %vm620_vm1, %v615_v4  ;;  %s581_s30 = scalar_lea.vmem %s3149_s11, %s2517_s19  ;;  %v2551_v3 = vld [vmem:[%s3141_s3 + $0x8] sm:$0xff]  ;;  %v1192_v4 = vld [vmem:[%s3141_s3] sm:$0xff]  ;;  %s3006_s16 = sadd.s32 %s2518_s28, %s3167_s20 }
  0x19   : > { %623 = vst.msk [vmem:[#allocation2 + $0x12] sm:$0xff] %vm620_vm1, %v616_v5  ;;  %s2519_s19 = sshll.u32 %s3006_s16, 3  ;;  %s3058_s27 = sshll.u32 %s3006_s16, 2  ;;  %vm2224_vm1 = vcmask 2048  }
  0x1a   : > { %s589_s21 = scalar_lea.vmem %s3150_s12, %s2519_s19  ;;  %s597_s18 = scalar_lea.vmem %s3151_s13, %s3058_s27 }
  0x1f   : > { %v649_v6 = vld [vmem:[#allocation2 + $0x1] ss:$2 sm:$0xff]  ;;  %v624_v7 = vld [vmem:[#allocation2] ss:$2 sm:$0xff] }
  0x20   : > { %656 = vperm.xlu1 %2751, %v649_v6   ;;  %630 = vperm.xlu0 %2750, %v624_v7   ;;  %772 = vst.msk [vmem:[#allocation2] sm:$0x3] %vm771_vm2, %v2793_v2  ;;  %v651_v8 = vld [vmem:[#allocation2 + $0x11] ss:$2 sm:$0xf] }
  0x21   : > { %v626_v9 = vld [vmem:[#allocation2 + $0x10] ss:$2 sm:$0xf]  ;;  %v701_v11 = vld [vmem:[#allocation2 + $0x3] ss:$2 sm:$0xff] }
  0x22   : > { %v675_v10 = vld [vmem:[#allocation2 + $0x2] ss:$2 sm:$0xff]  ;;  %v677_v13 = vld [vmem:[#allocation2 + $0x12] ss:$2 sm:$0xf] }
  0x23   : > { %v727_v12 = vld [vmem:[#allocation2 + $0x4] ss:$2 sm:$0xff]  ;;  %v703_v14 = vld [vmem:[#allocation2 + $0x13] ss:$2 sm:$0xf] }
  0x24   : > { %661 = vperm.xlu1 %2751, %v651_v8   ;;  %635 = vperm.xlu0 %2750, %v626_v9   ;;  %773 = vst.msk [vmem:[#allocation2 + $0xe] sm:$0x3] %vm771_vm2, %v2793_v2  ;;  %v729_v15 = vld [vmem:[#allocation2 + $0x14] ss:$2 sm:$0xf] }
  0x28   : > { %687 = vperm.xlu1 %2751, %v677_v13   ;;  %682 = vperm.xlu0 %2750, %v675_v10  }
  0x2c   : > { %713 = vperm.xlu1 %2751, %v703_v14   ;;  %708 = vperm.xlu0 %2750, %v701_v11  }
  0x30   : > { %739 = vperm.xlu1 %2751, %v729_v15   ;;  %734 = vperm.xlu0 %2750, %v727_v12  }
  0x9f   : > { %v657_v18 = vpop.permute.xlu1 %656  ;;  %v631_v19 = vpop.permute.xlu0 %630 }
  0xa0   : > { %v670_v27 = vmul.f32 %v2528_v22, %v657_v18  ;;  %v644_v28 = vmul.f32 %v2526_v23, %v631_v19 }
  0xa2   : > { %v672_v36 = vadd.f32 %v670_v27, %v644_v28 }
  0xa3   : > { %v662_v20 = vpop.permute.xlu1 %661  ;;  %v636_v21 = vpop.permute.xlu0 %635 }
  0xa4   : > { %v671_v29 = vmul.f32 %v2528_v22, %v662_v20  ;;  %v645_v30 = vmul.f32 %v2526_v23, %v636_v21  ;;  %v2554_v23 = vld [vmem:[%s3141_s3 + $0x10] sm:$0xff] }
  0xa6   : > { %v673_v37 = vadd.f32 %v671_v29, %v645_v30  ;;  %v2558_v30 = vld [vmem:[%s3141_s3 + $0x20] sm:$0xff] }
  0xa7   : > { %v688_v25 = vpop.permute.xlu1 %687  ;;  %v683_v26 = vpop.permute.xlu0 %682 }
  0xa8   : > { %v697_v32 = vmul.f32 %v2530_v24, %v688_v25  ;;  %v696_v33 = vmul.f32 %v2530_v24, %v683_v26  ;;  %v2556_v24 = vld [vmem:[%s3141_s3 + $0x18] sm:$0xff] }
  0xaa   : > { %v699_v41 = vadd.f32 %v697_v32, %v673_v37  ;;  %v698_v42 = vadd.f32 %v696_v33, %v672_v36  ;;  %v1591_v32 = vld [vmem:[%s3142_s4] sm:$0xff] }
  0xab   : > { %v714_v34 = vpop.permute.xlu1 %713  ;;  %v709_v35 = vpop.permute.xlu0 %708 }
  0xac   : > { %v723_v38 = vmul.f32 %v2532_v31, %v714_v34  ;;  %v722_v39 = vmul.f32 %v2532_v31, %v709_v35  ;;  %v2561_v31 = vld [vmem:[%s3142_s4 + $0x8] sm:$0xff] }
  0xae   : > { %v725_v45 = vadd.f32 %v723_v38, %v699_v41  ;;  %v724_v46 = vadd.f32 %v722_v39, %v698_v42 }
  0xaf   : > { %v740_v43 = vpop.permute.xlu1 %739  ;;  %v735_v44 = vpop.permute.xlu0 %734 }
  0xb0   : > { %v749_v47 = vmul.f32 %v2534_v40, %v740_v43  ;;  %v748_v48 = vmul.f32 %v2534_v40, %v735_v44 }
  0xb2   : > { %v751_v50 = vadd.f32 %v749_v47, %v725_v45  ;;  %v750_v51 = vadd.f32 %v748_v48, %v724_v46  ;;  %v2560_v45 = vld [vmem:[%s3146_s8] ss:$0 sm:$0xff] }
  0xb4   : > { %v760_v52 = vadd.f32 %v2535_v49, %v751_v50  ;;  %v759_v53 = vadd.f32 %v2535_v49, %v750_v51  ;;  %v2564_v51 = vld [vmem:[%s3142_s4 + $0x10] sm:$0xff] }
  0xb6   : > { %vm762_vm7 = vcmp.ge.f32.partialorder %v760_v52, 0.0  ;;  %v764_v54 = vmul.f32 0.1, %v760_v52  ;;  %vm761_vm8 = vcmp.ge.f32.partialorder %v759_v53, 0.0  ;;  %v763_v55 = vmul.f32 0.1, %v759_v53 }
  0xb8   : > { %v766_v56 = vsel %vm762_vm7, %v760_v52, %v764_v54  ;;  %v765_v57 = vsel %vm761_vm8, %v759_v53, %v763_v55  ;;  %v2566_v52 = vld [vmem:[%s3142_s4 + $0x18] sm:$0xff] }
  0xb9   : > { %770 = vst.msk [vmem:[%s581_s30 + $0x8] sm:$0xf] %vm769_vm5, %v766_v56  ;;  %775 = vst.msk [vmem:[#allocation2 + $0xa] sm:$0xf] %vm769_vm5, %v766_v56 }
  0xba   : > { %768 = vst.msk [vmem:[%s581_s30] sm:$0xff] %vm767_vm6, %v765_v57  ;;  %774 = vst.msk [vmem:[#allocation2 + $0x2] sm:$0xff] %vm767_vm6, %v765_v57 }
  0xc1   : > { %v778_v60 = vld [vmem:[#allocation2 + $0x1] ss:$2 sm:$0x3f]  ;;  %v776_v61 = vld [vmem:[#allocation2] ss:$2 sm:$0x3f] }
  0xc2   : > { %2618 = vmatmul.mubr.msk.f32.vlgmr.msra.gmra.mrb[0].mxu0 %vm767_vm6, %v778_v60  ;;  %2623 = vmatmul.mubr.msk.f32.vlgmr.msra.gmra.mrb[0].mxu1 %vm767_vm6, %v776_v61  ;;  %v934_v63 = vld [vmem:[#allocation2 + $0x2] ss:$2 sm:$0x3f]  ;;  %v1014_v0 = vld [vmem:[#allocation2 + $0x3] ss:$2 sm:$0x3f] }
  0xc3   : > { %2626 = vmatpush3.msk.msra.mxu0 %vm784_vm3, %v2541_v58  ;;  %2631 = vmatpush3.msk.msra.mxu1 %vm784_vm3, %v2544_v59  ;;  %v1094_v1 = vld [vmem:[#allocation2 + $0x4] ss:$2 sm:$0x3f]  ;;  %1188 = vst.msk [vmem:[#allocation2] sm:$0x3] %vm1187_vm9, %v2793_v2 }
  0xc4   : > { %2627 = vmatprep.mubr.msk.f32.mxu0 %vm2794_vm4, %v2793_v2  ;;  %2632 = vmatprep.mubr.msk.f32.mxu1 %vm2794_vm4, %v2793_v2  ;;  %1189 = vst.msk [vmem:[#allocation2 + $0x8] sm:$0x3] %vm1187_vm9, %v2793_v2  ;;  %v2568_v58 = vld [vmem:[%s3142_s4 + $0x20] sm:$0xff]  ;;  %v2571_v59 = vld [vmem:[%s3143_s5 + $0x8] sm:$0xff] }
  0xc5   : > { %2635 = vmatprep.subr.mxu0 %v2793_v2  ;;  %2640 = vmatprep.subr.mxu1 %v2793_v2  ;;  %v1989_v60 = vld [vmem:[%s3143_s5] sm:$0xff] }
  0xc6   : > { %2628 = vmatmul.mubr.msk.f32.vlgmr.msra.gmra.mrb[2].mxu0 %vm767_vm6, %v934_v63  ;;  %2633 = vmatmul.mubr.msk.f32.vlgmr.msra.gmra.mrb[2].mxu1 %vm767_vm6, %v1014_v0 }
  0xc7   : > { %2636 = vmatpush3.msk.msra.mxu0 %vm784_vm3, %v2547_v62  ;;  %2637 = vmatprep.mubr.msk.f32.mxu0 %vm2794_vm4, %v2793_v2 }
  0xc8   : > { %2645 = vmatprep.subr.mxu0 %v2793_v2  ;;  %2642 = vmatprep.mubr.msk.f32.mxu1 %vm2794_vm4, %v2793_v2 }
  0xc9   : > { %2641 = vmatpush3.msra.mxu1 %v2551_v3 }
  0xca   : > { %2638 = vmatmul.mubr.msk.f32.vlgmr.msra.gmra.mrb[4].mxu0 %vm767_vm6, %v1094_v1  ;;  %2650 = vmatprep.subr.mxu1 %v2793_v2 }
  0xcb   : > { %2647 = vmatprep.mubr.msk.f32.mxu0 %vm2794_vm4, %v2793_v2  ;;  %2646 = vmatpush3.msra.mxu0 %v1192_v4 }
  0xcc   : > { %2655 = vmatprep.subr.mxu0 %v2793_v2 }
 0x195   : > { %v854_v5 = vpop.f32.mrb[0].mxu0  ;;  %v930_v6 = vpop.f32.mrb[0].mxu1 }
 0x196   : > { %v931_v7 = vadd.f32 %v930_v6, %v854_v5  ;;  %v2619_v8 = vpop.f32.mrb[1].mxu0  ;;  %v2624_v9 = vpop.f32.mrb[1].mxu1 }
 0x199   : > { %v1009_v10 = vpop.f32.mrb[2].mxu0  ;;  %v1089_v11 = vpop.f32.mrb[2].mxu1 }
 0x19a   : > { %v1013_v12 = vadd.f32 %v1009_v10, %v931_v7  ;;  %v2629_v13 = vpop.f32.mrb[3].mxu0  ;;  %v2634_v14 = vpop.f32.mrb[3].mxu1  ;;  %v2570_v10 = vld [vmem:[%s3147_s9] ss:$0 sm:$0xff] }
 0x19c   : > { %v1093_v15 = vadd.f32 %v1089_v11, %v1013_v12 }
 0x19d   : > { %v1169_v16 = vpop.f32.mrb[4].mxu0 }
 0x19e   : > { %v1173_v18 = vadd.f32 %v1169_v16, %v1093_v15  ;;  %v2639_v19 = vpop.f32.mrb[5].mxu0  ;;  %v2574_v16 = vld [vmem:[%s3143_s5 + $0x10] sm:$0xff] }
 0x1a0   : > { %v1181_v20 = vadd.f32 %v2550_v17, %v1173_v18 }
 0x1a2   : > { %vm1182_vm10 = vcmp.ge.f32.partialorder %v1181_v20, 0.0  ;;  %v1183_v21 = vmul.f32 0.1, %v1181_v20 }
 0x1a4   : > { %v1184_v22 = vsel %vm1182_vm10, %v1181_v20, %v1183_v21 }
 0x1a5   : > { %1186 = vst.msk [vmem:[%s589_s21] sm:$0x3f] %vm1185_vm11, %v1184_v22  ;;  %1190 = vst.msk [vmem:[#allocation2 + $0x2] sm:$0x3f] %vm1185_vm11, %v1184_v22  ;;  %s605_s21 = scalar_lea.vmem %s3152_s14, %s3058_s27 }
 0x1ac   : > { %v1193_v25 = vld [vmem:[#allocation2 + $0x1] ss:$2 sm:$0x7]  ;;  %v1191_v26 = vld [vmem:[#allocation2] ss:$2 sm:$0x7] }
 0x1ad   : > { %2643 = vmatmul.mubr.msk.f32.vlgmr.msra.gmra.mrb[4].mxu1 %vm1196_vm12, %v1193_v25  ;;  %2648 = vmatmul.mubr.msk.f32.vlgmr.msra.gmra.mrb[6].mxu0 %vm1196_vm12, %v1191_v26  ;;  %1587 = vst.msk [vmem:[#allocation2] sm:$0x3] %vm1187_vm9, %v2793_v2  ;;  %v1343_v27 = vld [vmem:[#allocation2 + $0x2] ss:$2 sm:$0x7] }
 0x1ae   : > { %2651 = vmatpush3.msra.mxu1 %v2554_v23  ;;  %2656 = vmatpush3.msra.mxu0 %v2556_v24  ;;  %v1420_v28 = vld [vmem:[#allocation2 + $0x3] ss:$2 sm:$0x7]  ;;  %v1497_v29 = vld [vmem:[#allocation2 + $0x4] ss:$2 sm:$0x7] }
 0x1af   : > { %2652 = vmatprep.mubr.msk.f32.mxu1 %vm2794_vm4, %v2793_v2  ;;  %2657 = vmatprep.mubr.msk.f32.mxu0 %vm2794_vm4, %v2793_v2  ;;  %1588 = vst.msk [vmem:[#allocation2 + $0x5] sm:$0x3] %vm1187_vm9, %v2793_v2  ;;  %v2576_v26 = vld [vmem:[#allocation3] ss:$0 sm:$0xff] }
 0x1b0   : > { %2660 = vmatprep.subr.mxu1 %v2793_v2  ;;  %2665 = vmatprep.subr.mxu0 %v2793_v2 }
 0x1b1   : > { %2653 = vmatmul.mubr.msk.f32.vlgmr.msra.gmra.mrb[6].mxu1 %vm1196_vm12, %v1343_v27  ;;  %2658 = vmatmul.mubr.msk.f32.vlgmr.msra.gmra.mrb[8].mxu0 %vm1196_vm12, %v1420_v28 }
 0x1b2   : > { %2661 = vmatpush3.msra.mxu1 %v2558_v30  ;;  %2662 = vmatprep.mubr.msk.f32.mxu1 %vm2794_vm4, %v2793_v2 }
 0x1b3   : > { %2670 = vmatprep.subr.mxu1 %v2793_v2  ;;  %2667 = vmatprep.mubr.msk.f32.mxu0 %vm2794_vm4, %v2793_v2 }
 0x1b4   : > { %2666 = vmatpush3.msra.mxu0 %v2561_v31 }
 0x1b5   : > { %2663 = vmatmul.mubr.msk.f32.vlgmr.msra.gmra.mrb[8].mxu1 %vm1196_vm12, %v1497_v29  ;;  %2675 = vmatprep.subr.mxu0 %v2793_v2 }
 0x1b6   : > { %2672 = vmatprep.mubr.msk.f32.mxu1 %vm2794_vm4, %v2793_v2  ;;  %2671 = vmatpush3.msra.mxu1 %v1591_v32 }
 0x1b7   : > { %2680 = vmatprep.subr.mxu1 %v2793_v2 }
 0x280   : > { %v1266_v33 = vpop.f32.mrb[4].mxu1  ;;  %v1339_v34 = vpop.f32.mrb[6].mxu0 }
 0x281   : > { %v1340_v35 = vadd.f32 %v1339_v34, %v1266_v33  ;;  %v2644_v36 = vpop.f32.mrb[5].mxu1  ;;  %v2649_v37 = vpop.f32.mrb[7].mxu0 }
 0x284   : > { %v1415_v38 = vpop.f32.mrb[6].mxu1  ;;  %v1492_v39 = vpop.f32.mrb[8].mxu0 }
 0x285   : > { %v1419_v40 = vadd.f32 %v1415_v38, %v1340_v35  ;;  %v2654_v41 = vpop.f32.mrb[7].mxu1  ;;  %v2659_v42 = vpop.f32.mrb[9].mxu0 }
 0x287   : > { %v1496_v43 = vadd.f32 %v1492_v39, %v1419_v40 }
 0x288   : > { %v1569_v44 = vpop.f32.mrb[8].mxu1 }
 0x289   : > { %v1573_v46 = vadd.f32 %v1569_v44, %v1496_v43  ;;  %v2664_v47 = vpop.f32.mrb[9].mxu1 }
 0x28b   : > { %v1581_v48 = vadd.f32 %v2560_v45, %v1573_v46 }
 0x28d   : > { %vm1582_vm13 = vcmp.ge.f32.partialorder %v1581_v48, 0.0  ;;  %v1583_v49 = vmul.f32 0.1, %v1581_v48 }
 0x28f   : > { %v1584_v50 = vsel %vm1582_vm13, %v1581_v48, %v1583_v49 }
 0x290   : > { %1586 = vst.msk [vmem:[%s597_s18] sm:$0x7] %vm1585_vm14, %v1584_v50  ;;  %1589 = vst.msk [vmem:[#allocation2 + $0x2] sm:$0x7] %vm1585_vm14, %v1584_v50  ;;  %s613_s18 = scalar_lea.vmem %s3153_s15, %s3058_s27 }
 0x297   : > { %v1592_v53 = vld [vmem:[#allocation2 + $0x1] sm:$0x7]  ;;  %v1895_v57 = vld [vmem:[#allocation2 + $0x4] sm:$0x7] }
 0x298   : > { %v1590_v54 = vld [vmem:[#allocation2] sm:$0x7]  ;;  %2668 = vmatmul.mubr.msk.f32.vlgmr.msra.gmra.mrb[10].mxu0 %vm1196_vm12, %v1592_v53  ;;  %v1818_v56 = vld [vmem:[#allocation2 + $0x3] sm:$0x7] }
 0x299   : > { %2673 = vmatmul.mubr.msk.f32.vlgmr.msra.gmra.mrb[10].mxu1 %vm1196_vm12, %v1590_v54  ;;  %1985 = vst.msk [vmem:[#allocation2] sm:$0x1] %vm1984_vm15, %v2793_v2  ;;  %v1741_v55 = vld [vmem:[#allocation2 + $0x2] sm:$0x7]  ;;  %2676 = vmatpush3.msra.mxu0 %v2564_v51 }
 0x29a   : > { %2681 = vmatpush3.msra.mxu1 %v2566_v52  ;;  %1986 = vst.msk [vmem:[#allocation2 + $0x4] sm:$0x1] %vm1984_vm15, %v2793_v2  ;;  %2677 = vmatprep.mubr.msk.f32.mxu0 %vm2794_vm4, %v2793_v2 }
 0x29b   : > { %2682 = vmatprep.mubr.msk.f32.mxu1 %vm2794_vm4, %v2793_v2  ;;  %2685 = vmatprep.subr.mxu0 %v2793_v2 }
 0x29c   : > { %2690 = vmatprep.subr.mxu1 %v2793_v2  ;;  %2678 = vmatmul.mubr.msk.f32.vlgmr.msra.gmra.mrb[12].mxu0 %vm1196_vm12, %v1741_v55 }
 0x29d   : > { %2683 = vmatmul.mubr.msk.f32.vlgmr.msra.gmra.mrb[12].mxu1 %vm1196_vm12, %v1818_v56  ;;  %2686 = vmatpush3.msra.mxu0 %v2568_v58 }
 0x29e   : > { %2687 = vmatprep.mubr.msk.f32.mxu0 %vm2794_vm4, %v2793_v2  ;;  %2695 = vmatprep.subr.mxu0 %v2793_v2 }
 0x29f   : > { %2692 = vmatprep.mubr.msk.f32.mxu1 %vm2794_vm4, %v2793_v2  ;;  %2691 = vmatpush3.msra.mxu1 %v2571_v59 }
 0x2a0   : > { %2688 = vmatmul.mubr.msk.f32.vlgmr.msra.gmra.mrb[14].mxu0 %vm1196_vm12, %v1895_v57  ;;  %2700 = vmatprep.subr.mxu1 %v2793_v2 }
 0x2a1   : > { %2697 = vmatprep.mubr.msk.f32.mxu0 %vm2794_vm4, %v2793_v2  ;;  %2696 = vmatpush3.msra.mxu0 %v1989_v60 }
 0x36b   : > { %v1664_v61 = vpop.f32.mrb[10].mxu0 }
 0x36c   : > { %v1737_v62 = vpop.f32.mrb[10].mxu1  ;;  %v2669_v0 = vpop.f32.mrb[11].mxu0 }
 0x36d   : > { %v1738_v63 = vadd.f32 %v1737_v62, %v1664_v61  ;;  %v2674_v1 = vpop.f32.mrb[11].mxu1 }
 0x36f   : > { %v1813_v3 = vpop.f32.mrb[12].mxu0 }
 0x370   : > { %v1890_v4 = vpop.f32.mrb[12].mxu1  ;;  %v1817_v5 = vadd.f32 %v1813_v3, %v1738_v63  ;;  %v2679_v6 = vpop.f32.mrb[13].mxu0 }
 0x371   : > { %v2684_v7 = vpop.f32.mrb[13].mxu1 }
 0x372   : > { %v1894_v8 = vadd.f32 %v1890_v4, %v1817_v5 }
 0x373   : > { %v1967_v9 = vpop.f32.mrb[14].mxu0 }
 0x374   : > { %v1971_v11 = vadd.f32 %v1967_v9, %v1894_v8  ;;  %v2689_v12 = vpop.f32.mrb[15].mxu0 }
 0x376   : > { %v1979_v13 = vadd.f32 %v2570_v10, %v1971_v11 }
 0x378   : > { %vm1980_vm0 = vcmp.ge.f32.partialorder %v1979_v13, 0.0  ;;  %v1981_v14 = vmul.f32 0.1, %v1979_v13 }
 0x37a   : > { %v1982_v15 = vsel %vm1980_vm0, %v1979_v13, %v1981_v14 }
 0x37b   : > { %1983 = vst.msk [vmem:[%s605_s21] sm:$0x7] %vm1585_vm14, %v1982_v15  ;;  %1987 = vst.msk [vmem:[#allocation2 + $0x1] sm:$0x7] %vm1585_vm14, %v1982_v15 }
 0x382   : > { %v1990_v17 = vld [vmem:[#allocation2 + $0x1] sm:$0x7] }
 0x383   : > { %v1988_v18 = vld [vmem:[#allocation2] sm:$0x7]  ;;  %2693 = vmatmul.mubr.msk.f32.vlgmr.msra.gmra.mrb[14].mxu1 %vm1196_vm12, %v1990_v17 }
 0x384   : > { %2698 = vmatmul.mubr.msk.f32.vlgmr.msra.gmra.mrb[16].mxu0 %vm1196_vm12, %v1988_v18  ;;  %2701 = vmatpush3.msra.mxu1 %v2574_v16  ;;  %v2139_v19 = vld [vmem:[#allocation2 + $0x2] sm:$0x7] }
 0x385   : > { %2702 = vmatprep.mubr.msk.f32.mxu1 %vm2794_vm4, %v2793_v2 }
 0x387   : > { %2703 = vmatmul.mubr.msk.f32.vlgmr.msra.gmra.mrb[16].mxu1 %vm1196_vm12, %v2139_v19 }
 0x456   : > { %v2062_v20 = vpop.f32.mrb[14].mxu1 }
 0x457   : > { %v2135_v21 = vpop.f32.mrb[16].mxu0  ;;  %v2694_v23 = vpop.f32.mrb[15].mxu1 }
 0x458   : > { %v2136_v22 = vadd.f32 %v2135_v21, %v2062_v20  ;;  %v2699_v24 = vpop.f32.mrb[17].mxu0 }
 0x45a   : > { %v2211_v25 = vpop.f32.mrb[16].mxu1 }
 0x45b   : > { %v2215_v27 = vadd.f32 %v2211_v25, %v2136_v22  ;;  %v2704_v28 = vpop.f32.mrb[17].mxu1 }
 0x45d   : > { %v2223_v29 = vadd.f32 %v2576_v26, %v2215_v27 }
 0x45f   : > { %2225 = vst.msk [vmem:[%s613_s18] sm:$0x7] %vm2224_vm1, %v2223_v29 }
 0x460 PF: > { %s28_s24 = sadd.s32 1, %s2790_s24   ;;  %s3154_s20 = smov %s2782_s22 }
 0x461   : > { %p25_p7 = scmp.ge.s32.totalorder %s28_s24, 10   ;;  %s3155_s21 = smov %s2786_s23 }
 0x462   : > { %s3156_s22 = smov %s3159_s10  ;;  %s3157_s23 = smov %s3163_s25 }
 0x463   :  { %27 = sbr.rel (!%p25_p7) target bundleno = 3 (0x3), region = 169 }

// kernel: multi_period_discriminator.4
= control target key start
LH: loop header
LB: loop body
LE: loop exit
PB: predicated region body
PF: predicated region fallthrough
CT: control target
= control target key end

     0   :  { %s2809_s20 = smov 0   ;;  %s2811_s21 = smov 0   ;;  %s3069_s0 = inlined_call_operand.vmem [shape: f32[2,6,16,1], index: 0, kind: input, shape index: {}]   ;;  %s3070_s1 = inlined_call_operand.vmem [shape: f32[5,1,4], index: 1, kind: input, shape index: {}]   ;;  %s3071_s2 = inlined_call_operand.vmem [shape: f32[5,4,8], index: 2, kind: input, shape index: {}]   ;;  %s3072_s3 = inlined_call_operand.vmem [shape: f32[5,8,8], index: 3, kind: input, shape index: {}]   ;;  %s3073_s4 = inlined_call_operand.vmem [shape: f32[5,8,8], index: 4, kind: input, shape index: {}]   ;;  %s3074_s5 = inlined_call_operand.vmem [shape: f32[3,8,1], index: 5, kind: input, shape index: {}]   ;;  %s3075_s6 = inlined_call_operand.vmem [shape: f32[1,4], index: 6, kind: input, shape index: {}]   ;;  %s3076_s7 = inlined_call_operand.vmem [shape: f32[1,8], index: 7, kind: input, shape index: {}]   ;;  %s3077_s8 = inlined_call_operand.vmem [shape: f32[1,8], index: 8, kind: input, shape index: {}]   ;;  %s3078_s9 = inlined_call_operand.vmem [shape: f32[1,8], index: 9, kind: input, shape index: {}]   ;;  %s3079_s10 = inlined_call_operand.<no memory space> [shape: f32[1,1], index: 10, kind: input, shape index: {}]   ;;  %s3080_s11 = inlined_call_operand.vmem [shape: f32[2,6,8,4], index: 11, kind: output, shape index: {0}]   ;;  %s3081_s12 = inlined_call_operand.vmem [shape: f32[2,6,4,8], index: 12, kind: output, shape index: {1}]   ;;  %s3082_s13 = inlined_call_operand.vmem [shape: f32[2,6,2,8], index: 13, kind: output, shape index: {2}]   ;;  %s3083_s14 = inlined_call_operand.vmem [shape: f32[2,6,2,8], index: 14, kind: output, shape index: {3}]   ;;  %s3084_s15 = inlined_call_operand.vmem [shape: f32[2,6,2,1], index: 15, kind: output, shape index: {4}]  }
   0x1   :  { %v21_v0 = vstv %s3079_s10  ;;  %s2813_s22 = smov 0   ;;  %s2815_s23 = smov 0  }
   0x2   :  { %22 = vst [vmem:[#allocation3] sm:$0x1] %v21_v0  ;;  %s2817_s24 = smov 0  }
   0x3 LB: > { %s37_s10 = sadd.s32 1, %s2713_s22  ;;  %s40_s25 = sadd.s32 1, %s2717_s23  ;;  %s2721_s24 = sphi %s2817_s24, %s28_s24   ;;  %s2717_s23 = sphi %s2815_s23, %s3088_s23   ;;  %s2713_s22 = sphi %s2813_s22, %s3087_s22   ;;  %s2709_s21 = sphi %s2811_s21, %s3086_s21   ;;  %s2705_s20 = sphi %s2809_s20, %s3085_s20  }
   0x4   : > { %p38_p0 = scmp.ge.s32.totalorder %s37_s10, 6  ;;  %p2449_p1 = scmp.ge.s32.totalorder %s2721_s24, 1 }
   0x5   : > { %p476_p2 = scmp.lt.s32.totalorder %s2721_s24, 13 }
   0x6   : > { %s3090_s10 = smov (%p38_p0, %s37_s10), 0  ;;  %s3092_s25 = smov (!%p38_p0, %s40_s25), %s2717_s23 }
   0x7   : > { %p477_p3 = pnand %p2449_p1, %p476_p2  ;;  %p42_p4 = scmp.ge.s32.totalorder %s3092_s25, 2 }
   0x8   : > { %p563_p5 = scmp.lt.s32.totalorder (!%p477_p3), %s2709_s21, 1  ;;  %p565_p6 = scmp.lt.s32.totalorder (!%p477_p3), %s2705_s20, 5  ;;  %vm614_vm0 = vcmask (!%p477_p3), 1024   ;;  %v2723_v1 = vmov (!%p477_p3), 0   ;;  %v2724_v2 = vmov (!%p477_p3), 0.0   ;;  %vm617_vm1 = vcmask (!%p477_p3), 7168  }
   0x9   : > { %s3094_s25 = smov (%p42_p4, %s3092_s25), 0  ;;  %480 = sbr.rel (%p477_p3) target bundleno = 1113 (0x459), region = 64 }
   0xa   : > { %2682 = vset.pattern.permute.xlu1 (!%p477_p3), %v2723_v1  ;;  %2681 = vset.pattern.permute.xlu0 (!%p477_p3), %v2723_v1  ;;  %615 = vst.msk [vmem:[#allocation2] sm:$0x3] (!%p477_p3), %vm614_vm0, %v2724_v2  ;;  %616 = vst.msk [vmem:[#allocation2 + $0x12] sm:$0x3] (!%p477_p3), %vm614_vm0, %v2724_v2  ;;  %vm716_vm2 = vcmask (!%p477_p3), 25600   ;;  %vm728_vm3 = vcmask (!%p477_p3), 1043456  }
   0xb   : > { %2546 = vmatprep.subr.mxu0 (!%p477_p3), %v2724_v2  ;;  %2551 = vmatprep.subr.mxu1 (!%p477_p3), %v2724_v2  ;;  %v2467_v10 = vld [vmem:[%s3071_s2 + $0x4] sm:$0xf] (!%p477_p3)  ;;  %v721_v11 = vld [vmem:[%s3071_s2] sm:$0xf] (!%p477_p3)  ;;  %vm2725_vm4 = vmmov (!%p477_p3), 0   ;;  %vm714_vm5 = vcmask (!%p477_p3), 31744  }
   0xc   : > { %2547 = vmatpush3.msk.msra.mxu0 (!%p477_p3), %vm728_vm3, %v2467_v10  ;;  %2548 = vmatprep.mubr.msk.f32.mxu0 (!%p477_p3), %vm2725_vm4, %v2724_v2  ;;  %v2457_v14 = vld [vmem:[%s3070_s1] ss:$0 sm:$0xff] (!%p477_p3)  ;;  %v2459_v15 = vld [vmem:[%s3070_s1 + $0x1] ss:$0 sm:$0xff] (!%p477_p3)  ;;  %v2461_v16 = vld [vmem:[%s3070_s1 + $0x2] ss:$0 sm:$0xff] (!%p477_p3) }
   0xd   : > { %2552 = vmatpush3.msk.msra.mxu1 (!%p477_p3), %vm728_vm3, %v721_v11  ;;  %2553 = vmatprep.mubr.msk.f32.mxu1 (!%p477_p3), %vm2725_vm4, %v2724_v2  ;;  %v2463_v20 = vld [vmem:[%s3070_s1 + $0x3] ss:$0 sm:$0xff] (!%p477_p3)  ;;  %v2465_v24 = vld [vmem:[%s3070_s1 + $0x4] ss:$0 sm:$0xff] (!%p477_p3)  ;;  %v2466_v30 = vld [vmem:[%s3075_s6] ss:$0 sm:$0xff] (!%p477_p3) }
   0xe   : > { %2556 = vmatprep.subr.mxu0 (!%p477_p3), %v2724_v2  ;;  %2561 = vmatprep.subr.mxu1 (!%p477_p3), %v2724_v2  ;;  %v2472_v35 = vld [vmem:[%s3071_s2 + $0x8] sm:$0xf] (!%p477_p3)  ;;  %v2475_v36 = vld [vmem:[%s3071_s2 + $0xc] sm:$0xf] (!%p477_p3)  ;;  %v2478_v39 = vld [vmem:[%s3071_s2 + $0x10] sm:$0xf] (!%p477_p3) }
   0xf   : > { %v2482_v43 = vld [vmem:[%s3072_s3 + $0x8] sm:$0xff] (!%p477_p3)  ;;  %v1136_v44 = vld [vmem:[%s3072_s3] sm:$0xff] (!%p477_p3)  ;;  %vm1131_vm7 = vcmask (!%p477_p3), 58368   ;;  %vm1129_vm9 = vcmask (!%p477_p3), 60416   ;;  %vm1140_vm10 = vcmask (!%p477_p3), 64512   ;;  %v2485_v63 = vld [vmem:[%s3072_s3 + $0x10] sm:$0xff] (!%p477_p3) }
  0x10   : > { %s3096_s21 = smov (!%p563_p5, %s2709_s21), 1  ;;  %s3098_s20 = smov (!%p565_p6, %s2705_s20), 5  ;;  %v2481_v57 = vld [vmem:[%s3076_s7] ss:$0 sm:$0xff]  ;;  %v2487_v0 = vld [vmem:[%s3072_s3 + $0x18] sm:$0xff]  ;;  %vm1927_vm11 = vcmask 57344  }
  0x11   : > { %s2636_s26 = smul.u32 12, %s3096_s21  ;;  %s2450_s27 = sshll.u32 %s3098_s20, 1  ;;  %v2497_v11 = vld [vmem:[%s3073_s4 + $0x18] sm:$0xff] }
  0x12   : > { %s2637_s18 = smul.u32 6, %s3096_s21 }
  0x13   : > { %s569_s28 = sadd.s32 %s2636_s26, %s2450_s27 }
  0x14   : > { %s2451_s29 = sshll.u32 %s569_s28, 3  ;;  %s2854_s19 = sadd.s32 %s2637_s18, %s3098_s20 }
  0x15   : > { %s571_s17 = scalar_lea.vmem %s3069_s0, %s2451_s29  ;;  %s2452_s30 = sshll.u32 %s2854_s19, 3 }
  0x16   : > { %v612_v3 = vld [vmem:[%s571_s17] sm:$0xff]  ;;  %v613_v4 = vld [vmem:[%s571_s17 + $0x8] sm:$0xff]  ;;  %s579_s18 = scalar_lea.vmem %s3080_s11, %s2452_s30  ;;  %s2453_s28 = sshll.u32 %s2854_s19, 2 }
  0x17   : > { %618 = vst.msk [vmem:[#allocation2 + $0x2] sm:$0xff] %vm617_vm1, %v612_v3  ;;  %619 = vst.msk [vmem:[#allocation2 + $0xa] sm:$0xff] %vm617_vm1, %v613_v4  ;;  %s587_s21 = scalar_lea.vmem %s3081_s12, %s2453_s28  ;;  %s2995_s26 = sshll.u32 %s2854_s19, 1 }
  0x18   : > { %s595_s29 = scalar_lea.vmem %s3082_s13, %s2995_s26  ;;  %s603_s19 = scalar_lea.vmem %s3083_s14, %s2995_s26 }
  0x19   : > { %s611_s27 = scalar_lea.vmem %s3084_s15, %s2995_s26 }
  0x1e   : > { %v653_v5 = vld [vmem:[#allocation2 + $0x2] ss:$2 sm:$0xff]  ;;  %v670_v7 = vld [vmem:[#allocation2 + $0x3] ss:$2 sm:$0xff] }
  0x1f   : > { %v620_v6 = vld [vmem:[#allocation2] ss:$2 sm:$0xff]  ;;  %658 = vperm.xlu1 %2682, %v653_v5   ;;  %v636_v8 = vld [vmem:[#allocation2 + $0x1] ss:$2 sm:$0xff] }
  0x20   : > { %624 = vperm.xlu0 %2681, %v620_v6   ;;  %v687_v9 = vld [vmem:[#allocation2 + $0x4] ss:$2 sm:$0xff]  ;;  %717 = vst.msk [vmem:[#allocation2] sm:$0x3] %vm716_vm2, %v2724_v2 }
  0x21   : > { %718 = vst.msk [vmem:[#allocation2 + $0xa] sm:$0x3] %vm716_vm2, %v2724_v2 }
  0x23   : > { %675 = vperm.xlu1 %2682, %v670_v7   ;;  %v2489_v7 = vld [vmem:[%s3072_s3 + $0x20] sm:$0xff] }
  0x24   : > { %641 = vperm.xlu0 %2681, %v636_v8   ;;  %v1534_v8 = vld [vmem:[%s3073_s4] sm:$0xff] }
  0x28   : > { %692 = vperm.xlu0 %2681, %v687_v9   ;;  %v2492_v9 = vld [vmem:[%s3073_s4 + $0x8] sm:$0xff] }
  0x9e   : > { %v659_v12 = vpop.permute.xlu1 %658 }
  0x9f   : > { %v625_v13 = vpop.permute.xlu0 %624  ;;  %v667_v22 = vmul.f32 %v2461_v16, %v659_v12 }
  0xa0   : > { %v633_v18 = vmul.f32 %v2457_v14, %v625_v13 }
  0xa2   : > { %v676_v21 = vpop.permute.xlu1 %675 }
  0xa3   : > { %v642_v17 = vpop.permute.xlu0 %641  ;;  %v684_v26 = vmul.f32 %v2463_v20, %v676_v21 }
  0xa4   : > { %v650_v19 = vmul.f32 %v2459_v15, %v642_v17 }
  0xa6   : > { %v651_v23 = vadd.f32 %v650_v19, %v633_v18 }
  0xa7   : > { %v693_v25 = vpop.permute.xlu0 %692 }
  0xa8   : > { %v668_v27 = vadd.f32 %v667_v22, %v651_v23  ;;  %v701_v29 = vmul.f32 %v2465_v24, %v693_v25  ;;  %v2491_v24 = vld [vmem:[%s3077_s8] ss:$0 sm:$0xff] }
  0xaa   : > { %v685_v28 = vadd.f32 %v684_v26, %v668_v27 }
  0xac   : > { %v702_v31 = vadd.f32 %v701_v29, %v685_v28 }
  0xae   : > { %v710_v32 = vadd.f32 %v2466_v30, %v702_v31  ;;  %v2495_v30 = vld [vmem:[%s3073_s4 + $0x10] sm:$0xff] }
  0xb0   : > { %vm711_vm6 = vcmp.ge.f32.partialorder %v710_v32, 0.0  ;;  %v712_v33 = vmul.f32 0.1, %v710_v32 }
  0xb2   : > { %v713_v34 = vsel %vm711_vm6, %v710_v32, %v712_v33 }
  0xb3   : > { %715 = vst.msk [vmem:[%s579_s18] sm:$0xff] %vm714_vm5, %v713_v34  ;;  %719 = vst.msk [vmem:[#allocation2 + $0x2] sm:$0xff] %vm714_vm5, %v713_v34  ;;  %v2499_v34 = vld [vmem:[%s3073_s4 + $0x20] sm:$0xff] }
  0xba   : > { %v722_v37 = vld [vmem:[#allocation2 + $0x1] ss:$2 sm:$0xf]  ;;  %v720_v38 = vld [vmem:[#allocation2] ss:$2 sm:$0xf] }
  0xbb   : > { %2549 = vmatmul.mubr.msk.f32.vlgmr.msra.gmra.mrb[0].mxu0 %vm714_vm5, %v722_v37  ;;  %2554 = vmatmul.mubr.msk.f32.vlgmr.msra.gmra.mrb[0].mxu1 %vm714_vm5, %v720_v38  ;;  %v878_v40 = vld [vmem:[#allocation2 + $0x2] ss:$2 sm:$0xf]  ;;  %v958_v41 = vld [vmem:[#allocation2 + $0x3] ss:$2 sm:$0xf] }
  0xbc   : > { %2557 = vmatpush3.msk.msra.mxu0 %vm728_vm3, %v2472_v35  ;;  %2562 = vmatpush3.msk.msra.mxu1 %vm728_vm3, %v2475_v36  ;;  %v1038_v42 = vld [vmem:[#allocation2 + $0x4] ss:$2 sm:$0xf]  ;;  %1132 = vst.msk [vmem:[#allocation2] sm:$0x3] %vm1131_vm7, %v2724_v2 }
  0xbd   : > { %2558 = vmatprep.mubr.msk.f32.mxu0 %vm2725_vm4, %v2724_v2  ;;  %2563 = vmatprep.mubr.msk.f32.mxu1 %vm2725_vm4, %v2724_v2  ;;  %1133 = vst.msk [vmem:[#allocation2 + $0x6] sm:$0x3] %vm1131_vm7, %v2724_v2  ;;  %v2502_v38 = vld [vmem:[%s3074_s5 + $0x8] sm:$0xff] }
  0xbe   : > { %2566 = vmatprep.subr.mxu0 %v2724_v2  ;;  %2571 = vmatprep.subr.mxu1 %v2724_v2 }
  0xbf   : > { %2559 = vmatmul.mubr.msk.f32.vlgmr.msra.gmra.mrb[2].mxu0 %vm714_vm5, %v878_v40  ;;  %2564 = vmatmul.mubr.msk.f32.vlgmr.msra.gmra.mrb[2].mxu1 %vm714_vm5, %v958_v41 }
  0xc0   : > { %2567 = vmatpush3.msk.msra.mxu0 %vm728_vm3, %v2478_v39  ;;  %2568 = vmatprep.mubr.msk.f32.mxu0 %vm2725_vm4, %v2724_v2  ;;  %v1932_v39 = vld [vmem:[%s3074_s5] sm:$0xff] }
  0xc1   : > { %2576 = vmatprep.subr.mxu0 %v2724_v2  ;;  %2573 = vmatprep.mubr.msk.f32.mxu1 %vm2725_vm4, %v2724_v2 }
  0xc2   : > { %2572 = vmatpush3.msra.mxu1 %v2482_v43 }
  0xc3   : > { %2569 = vmatmul.mubr.msk.f32.vlgmr.msra.gmra.mrb[4].mxu0 %vm714_vm5, %v1038_v42  ;;  %2581 = vmatprep.subr.mxu1 %v2724_v2 }
  0xc4   : > { %2578 = vmatprep.mubr.msk.f32.mxu0 %vm2725_vm4, %v2724_v2  ;;  %2577 = vmatpush3.msra.mxu0 %v1136_v44 }
  0xc5   : > { %2586 = vmatprep.subr.mxu0 %v2724_v2 }
 0x18e   : > { %v798_v45 = vpop.f32.mrb[0].mxu0  ;;  %v874_v46 = vpop.f32.mrb[0].mxu1 }
 0x18f   : > { %v875_v47 = vadd.f32 %v874_v46, %v798_v45  ;;  %v2550_v48 = vpop.f32.mrb[1].mxu0  ;;  %v2555_v49 = vpop.f32.mrb[1].mxu1 }
 0x192   : > { %v953_v50 = vpop.f32.mrb[2].mxu0  ;;  %v1033_v51 = vpop.f32.mrb[2].mxu1 }
 0x193   : > { %v957_v52 = vadd.f32 %v953_v50, %v875_v47  ;;  %v2560_v53 = vpop.f32.mrb[3].mxu0  ;;  %v2565_v54 = vpop.f32.mrb[3].mxu1  ;;  %v2501_v50 = vld [vmem:[%s3078_s9] ss:$0 sm:$0xff] }
 0x195   : > { %v1037_v55 = vadd.f32 %v1033_v51, %v957_v52 }
 0x196   : > { %v1113_v56 = vpop.f32.mrb[4].mxu0 }
 0x197   : > { %v1117_v58 = vadd.f32 %v1113_v56, %v1037_v55  ;;  %v2570_v59 = vpop.f32.mrb[5].mxu0  ;;  %v2505_v56 = vld [vmem:[%s3074_s5 + $0x10] sm:$0xff] }
 0x199   : > { %v1125_v60 = vadd.f32 %v2481_v57, %v1117_v58 }
 0x19b   : > { %vm1126_vm8 = vcmp.ge.f32.partialorder %v1125_v60, 0.0  ;;  %v1127_v61 = vmul.f32 0.1, %v1125_v60 }
 0x19d   : > { %v1128_v62 = vsel %vm1126_vm8, %v1125_v60, %v1127_v61 }
 0x19e   : > { %1130 = vst.msk [vmem:[%s587_s21] sm:$0xf] %vm1129_vm9, %v1128_v62  ;;  %1134 = vst.msk [vmem:[#allocation2 + $0x2] sm:$0xf] %vm1129_vm9, %v1128_v62 }
 0x1a5   : > { %v1137_v1 = vld [vmem:[#allocation2 + $0x1] ss:$2 sm:$0x3]  ;;  %v1135_v3 = vld [vmem:[#allocation2] ss:$2 sm:$0x3] }
 0x1a6   : > { %2574 = vmatmul.mubr.msk.f32.vlgmr.msra.gmra.mrb[4].mxu1 %vm1140_vm10, %v1137_v1  ;;  %2579 = vmatmul.mubr.msk.f32.vlgmr.msra.gmra.mrb[6].mxu0 %vm1140_vm10, %v1135_v3  ;;  %1530 = vst.msk [vmem:[#allocation2] sm:$0x3] %vm1131_vm7, %v2724_v2  ;;  %v1287_v4 = vld [vmem:[#allocation2 + $0x2] ss:$2 sm:$0x3] }
 0x1a7   : > { %2582 = vmatpush3.msra.mxu1 %v2485_v63  ;;  %2587 = vmatpush3.msra.mxu0 %v2487_v0  ;;  %v1364_v5 = vld [vmem:[#allocation2 + $0x3] ss:$2 sm:$0x3]  ;;  %v1441_v6 = vld [vmem:[#allocation2 + $0x4] ss:$2 sm:$0x3] }
 0x1a8   : > { %2583 = vmatprep.mubr.msk.f32.mxu1 %vm2725_vm4, %v2724_v2  ;;  %2588 = vmatprep.mubr.msk.f32.mxu0 %vm2725_vm4, %v2724_v2  ;;  %1531 = vst.msk [vmem:[#allocation2 + $0x4] sm:$0x3] %vm1131_vm7, %v2724_v2  ;;  %v2507_v3 = vld [vmem:[#allocation3] ss:$0 sm:$0xff] }
 0x1a9   : > { %2591 = vmatprep.subr.mxu1 %v2724_v2  ;;  %2596 = vmatprep.subr.mxu0 %v2724_v2 }
 0x1aa   : > { %2584 = vmatmul.mubr.msk.f32.vlgmr.msra.gmra.mrb[6].mxu1 %vm1140_vm10, %v1287_v4  ;;  %2589 = vmatmul.mubr.msk.f32.vlgmr.msra.gmra.mrb[8].mxu0 %vm1140_vm10, %v1364_v5 }
 0x1ab   : > { %2592 = vmatpush3.msra.mxu1 %v2489_v7  ;;  %2593 = vmatprep.mubr.msk.f32.mxu1 %vm2725_vm4, %v2724_v2 }
 0x1ac   : > { %2601 = vmatprep.subr.mxu1 %v2724_v2  ;;  %2598 = vmatprep.mubr.msk.f32.mxu0 %vm2725_vm4, %v2724_v2 }
 0x1ad   : > { %v1533_v10 = vld [vmem:[#allocation2] sm:$0x3]  ;;  %2597 = vmatpush3.msra.mxu0 %v2492_v9 }
 0x1ae   : > { %2594 = vmatmul.mubr.msk.f32.vlgmr.msra.gmra.mrb[8].mxu1 %vm1140_vm10, %v1441_v6  ;;  %1928 = vst.msk [vmem:[#allocation2] sm:$0x1] %vm1927_vm11, %v2724_v2  ;;  %2606 = vmatprep.subr.mxu0 %v2724_v2 }
 0x1af   : > { %2603 = vmatprep.mubr.msk.f32.mxu1 %vm2725_vm4, %v2724_v2  ;;  %2602 = vmatpush3.msra.mxu1 %v1534_v8  ;;  %v1838_v35 = vld [vmem:[#allocation2 + $0x4] sm:$0x3] }
 0x1b0   : > { %2611 = vmatprep.subr.mxu1 %v2724_v2 }
 0x1b2   : > { %2604 = vmatmul.mubr.msk.f32.vlgmr.msra.gmra.mrb[10].mxu1 %vm1140_vm10, %v1533_v10 }
 0x1b3   : > { %2612 = vmatpush3.msra.mxu1 %v2497_v11  ;;  %2613 = vmatprep.mubr.msk.f32.mxu1 %vm2725_vm4, %v2724_v2 }
 0x1b4   : > { %2621 = vmatprep.subr.mxu1 %v2724_v2 }
 0x279   : > { %v1210_v12 = vpop.f32.mrb[4].mxu1  ;;  %v1283_v13 = vpop.f32.mrb[6].mxu0 }
 0x27a   : > { %v1284_v14 = vadd.f32 %v1283_v13, %v1210_v12  ;;  %v2575_v15 = vpop.f32.mrb[5].mxu1  ;;  %v2580_v16 = vpop.f32.mrb[7].mxu0 }
 0x27d   : > { %v1359_v17 = vpop.f32.mrb[6].mxu1  ;;  %v1436_v18 = vpop.f32.mrb[8].mxu0 }
 0x27e   : > { %v1363_v19 = vadd.f32 %v1359_v17, %v1284_v14  ;;  %v2585_v20 = vpop.f32.mrb[7].mxu1  ;;  %v2590_v21 = vpop.f32.mrb[9].mxu0 }
 0x280   : > { %v1440_v22 = vadd.f32 %v1436_v18, %v1363_v19 }
 0x281   : > { %v1513_v23 = vpop.f32.mrb[8].mxu1 }
 0x282   : > { %v1517_v25 = vadd.f32 %v1513_v23, %v1440_v22  ;;  %v2595_v26 = vpop.f32.mrb[9].mxu1 }
 0x284   : > { %v1525_v27 = vadd.f32 %v2491_v24, %v1517_v25 }
 0x285   : > { %v1680_v36 = vpop.f32.mrb[10].mxu1 }
 0x286   : > { %vm1526_vm12 = vcmp.ge.f32.partialorder %v1525_v27, 0.0  ;;  %v1527_v28 = vmul.f32 0.1, %v1525_v27  ;;  %v2605_v37 = vpop.f32.mrb[11].mxu1 }
 0x288   : > { %v1528_v29 = vsel %vm1526_vm12, %v1525_v27, %v1527_v28 }
 0x289   : > { %1529 = vst.msk [vmem:[%s595_s29] sm:$0x3] %vm1131_vm7, %v1528_v29  ;;  %1532 = vst.msk [vmem:[#allocation2 + $0x2] sm:$0x3] %vm1131_vm7, %v1528_v29 }
 0x290   : > { %v1535_v31 = vld [vmem:[#allocation2 + $0x1] sm:$0x3]  ;;  %v1761_v32 = vld [vmem:[#allocation2 + $0x3] sm:$0x3] }
 0x291   : > { %v1684_v33 = vld [vmem:[#allocation2 + $0x2] sm:$0x3]  ;;  %2599 = vmatmul.mubr.msk.f32.vlgmr.msra.gmra.mrb[10].mxu0 %vm1140_vm10, %v1535_v31  ;;  %2614 = vmatmul.mubr.msk.f32.vlgmr.msra.gmra.mrb[12].mxu1 %vm1140_vm10, %v1761_v32 }
 0x292   : > { %1929 = vst.msk [vmem:[#allocation2 + $0x3] sm:$0x1] %vm1927_vm11, %v2724_v2  ;;  %2607 = vmatpush3.msra.mxu0 %v2495_v30  ;;  %2608 = vmatprep.mubr.msk.f32.mxu0 %vm2725_vm4, %v2724_v2 }
 0x293   : > { %2616 = vmatprep.subr.mxu0 %v2724_v2  ;;  %2623 = vmatprep.mubr.msk.f32.mxu1 %vm2725_vm4, %v2724_v2 }
 0x294   : > { %2622 = vmatpush3.msra.mxu1 %v2502_v38 }
 0x295   : > { %2609 = vmatmul.mubr.msk.f32.vlgmr.msra.gmra.mrb[12].mxu0 %vm1140_vm10, %v1684_v33  ;;  %2631 = vmatprep.subr.mxu1 %v2724_v2 }
 0x296   : > { %2617 = vmatpush3.msra.mxu0 %v2499_v34  ;;  %2618 = vmatprep.mubr.msk.f32.mxu0 %vm2725_vm4, %v2724_v2 }
 0x297   : > { %2626 = vmatprep.subr.mxu0 %v2724_v2 }
 0x299   : > { %2619 = vmatmul.mubr.msk.f32.vlgmr.msra.gmra.mrb[14].mxu0 %vm1140_vm10, %v1838_v35 }
 0x29a   : > { %2628 = vmatprep.mubr.msk.f32.mxu0 %vm2725_vm4, %v2724_v2  ;;  %2627 = vmatpush3.msra.mxu0 %v1932_v39 }
 0x364   : > { %v1607_v40 = vpop.f32.mrb[10].mxu0  ;;  %v1833_v41 = vpop.f32.mrb[12].mxu1 }
 0x365   : > { %v1681_v42 = vadd.f32 %v1680_v36, %v1607_v40  ;;  %v2600_v43 = vpop.f32.mrb[11].mxu0  ;;  %v2615_v44 = vpop.f32.mrb[13].mxu1 }
 0x368   : > { %v1756_v45 = vpop.f32.mrb[12].mxu0 }
 0x369   : > { %v1760_v46 = vadd.f32 %v1756_v45, %v1681_v42  ;;  %v2610_v47 = vpop.f32.mrb[13].mxu0 }
 0x36b   : > { %v1837_v48 = vadd.f32 %v1833_v41, %v1760_v46 }
 0x36c   : > { %v1910_v49 = vpop.f32.mrb[14].mxu0 }
 0x36d   : > { %v1914_v51 = vadd.f32 %v1910_v49, %v1837_v48  ;;  %v2620_v52 = vpop.f32.mrb[15].mxu0 }
 0x36f   : > { %v1922_v53 = vadd.f32 %v2501_v50, %v1914_v51 }
 0x371   : > { %vm1923_vm13 = vcmp.ge.f32.partialorder %v1922_v53, 0.0  ;;  %v1924_v54 = vmul.f32 0.1, %v1922_v53 }
 0x373   : > { %v1925_v55 = vsel %vm1923_vm13, %v1922_v53, %v1924_v54 }
 0x374   : > { %1926 = vst.msk [vmem:[%s603_s19] sm:$0x3] %vm1131_vm7, %v1925_v55  ;;  %1930 = vst.msk [vmem:[#allocation2 + $0x1] sm:$0x3] %vm1131_vm7, %v1925_v55 }
 0x37b   : > { %v1933_v57 = vld [vmem:[#allocation2 + $0x1] sm:$0x3] }
 0x37c   : > { %v1931_v58 = vld [vmem:[#allocation2] sm:$0x3]  ;;  %2624 = vmatmul.mubr.msk.f32.vlgmr.msra.gmra.mrb[14].mxu1 %vm1140_vm10, %v1933_v57  ;;  %v2082_v59 = vld [vmem:[#allocation2 + $0x2] sm:$0x3] }
 0x37d   : > { %2629 = vmatmul.mubr.msk.f32.vlgmr.msra.gmra.mrb[16].mxu0 %vm1140_vm10, %v1931_v58  ;;  %2632 = vmatpush3.msra.mxu1 %v2505_v56 }
 0x37e   : > { %2633 = vmatprep.mubr.msk.f32.mxu1 %vm2725_vm4, %v2724_v2 }
 0x380   : > { %2634 = vmatmul.mubr.msk.f32.vlgmr.msra.gmra.mrb[16].mxu1 %vm1140_vm10, %v2082_v59 }
 0x44f   : > { %v2005_v60 = vpop.f32.mrb[14].mxu1 }
 0x450   : > { %v2078_v61 = vpop.f32.mrb[16].mxu0  ;;  %v2625_v63 = vpop.f32.mrb[15].mxu1 }
 0x451   : > { %v2079_v62 = vadd.f32 %v2078_v61, %v2005_v60  ;;  %v2630_v0 = vpop.f32.mrb[17].mxu0 }
 0x453   : > { %v2154_v1 = vpop.f32.mrb[16].mxu1 }
 0x454   : > { %v2158_v4 = vadd.f32 %v2154_v1, %v2079_v62  ;;  %v2635_v5 = vpop.f32.mrb[17].mxu1 }
 0x456   : > { %v2166_v6 = vadd.f32 %v2507_v3, %v2158_v4 }
 0x458   : > { %2167 = vst.msk [vmem:[%s611_s27] sm:$0x3] %vm614_vm0, %v2166_v6 }
 0x459 PF: > { %s28_s24 = sadd.s32 1, %s2721_s24   ;;  %s3085_s20 = smov %s2713_s22 }
 0x45a   : > { %p25_p7 = scmp.ge.s32.totalorder %s28_s24, 14   ;;  %s3086_s21 = smov %s2717_s23 }
 0x45b   : > { %s3087_s22 = smov %s3090_s10  ;;  %s3088_s23 = smov %s3094_s25 }
 0x45c   :  { %27 = sbr.rel (!%p25_p7) target bundleno = 3 (0x3), region = 164 }

// kernel: multi_period_discriminator.5
= control target key start
LH: loop header
LB: loop body
LE: loop exit
PB: predicated region body
PF: predicated region fallthrough
CT: control target
= control target key end

     0   :  { %s2810_s20 = smov 0   ;;  %s2812_s21 = smov 0   ;;  %s3069_s0 = inlined_call_operand.vmem [shape: f32[2,10,10,1], index: 0, kind: input, shape index: {}]   ;;  %s3070_s1 = inlined_call_operand.vmem [shape: f32[5,1,4], index: 1, kind: input, shape index: {}]   ;;  %s3071_s2 = inlined_call_operand.vmem [shape: f32[5,4,8], index: 2, kind: input, shape index: {}]   ;;  %s3072_s3 = inlined_call_operand.vmem [shape: f32[5,8,8], index: 3, kind: input, shape index: {}]   ;;  %s3073_s4 = inlined_call_operand.vmem [shape: f32[5,8,8], index: 4, kind: input, shape index: {}]   ;;  %s3074_s5 = inlined_call_operand.vmem [shape: f32[3,8,1], index: 5, kind: input, shape index: {}]   ;;  %s3075_s6 = inlined_call_operand.vmem [shape: f32[1,4], index: 6, kind: input, shape index: {}]   ;;  %s3076_s7 = inlined_call_operand.vmem [shape: f32[1,8], index: 7, kind: input, shape index: {}]   ;;  %s3077_s8 = inlined_call_operand.vmem [shape: f32[1,8], index: 8, kind: input, shape index: {}]   ;;  %s3078_s9 = inlined_call_operand.vmem [shape: f32[1,8], index: 9, kind: input, shape index: {}]   ;;  %s3079_s10 = inlined_call_operand.<no memory space> [shape: f32[1,1], index: 10, kind: input, shape index: {}]   ;;  %s3080_s11 = inlined_call_operand.vmem [shape: f32[2,10,5,4], index: 11, kind: output, shape index: {0}]   ;;  %s3081_s12 = inlined_call_operand.vmem [shape: f32[2,10,3,8], index: 12, kind: output, shape index: {1}]   ;;  %s3082_s13 = inlined_call_operand.vmem [shape: f32[2,10,2,8], index: 13, kind: output, shape index: {2}]   ;;  %s3083_s14 = inlined_call_operand.vmem [shape: f32[2,10,2,8], index: 14, kind: output, shape index: {3}]   ;;  %s3084_s15 = inlined_call_operand.vmem [shape: f32[2,10,2,1], index: 15, kind: output, shape index: {4}]  }
   0x1   :  { %v21_v0 = vstv %s3079_s10  ;;  %s2814_s22 = smov 0   ;;  %s2816_s23 = smov 0  }
   0x2   :  { %22 = vst [vmem:[#allocation3] sm:$0x1] %v21_v0  ;;  %s2818_s24 = smov 0  }
   0x3 LB: > { %s37_s10 = sadd.s32 1, %s2714_s22  ;;  %s40_s25 = sadd.s32 1, %s2718_s23  ;;  %s2722_s24 = sphi %s2818_s24, %s28_s24   ;;  %s2718_s23 = sphi %s2816_s23, %s3088_s23   ;;  %s2714_s22 = sphi %s2814_s22, %s3087_s22   ;;  %s2710_s21 = sphi %s2812_s21, %s3086_s21   ;;  %s2706_s20 = sphi %s2810_s20, %s3085_s20  }
   0x4   : > { %p38_p0 = scmp.ge.s32.totalorder %s37_s10, 10  ;;  %p2450_p1 = scmp.ge.s32.totalorder %s2722_s24, 1 }
   0x5   : > { %p476_p2 = scmp.lt.s32.totalorder %s2722_s24, 21 }
   0x6   : > { %s3090_s10 = smov (%p38_p0, %s37_s10), 0  ;;  %s3092_s25 = smov (!%p38_p0, %s40_s25), %s2718_s23 }
   0x7   : > { %p477_p3 = pnand %p2450_p1, %p476_p2  ;;  %p42_p4 = scmp.ge.s32.totalorder %s3092_s25, 2 }
   0x8   : > { %p563_p5 = scmp.lt.s32.totalorder (!%p477_p3), %s2710_s21, 1  ;;  %p565_p6 = scmp.lt.s32.totalorder (!%p477_p3), %s2706_s20, 9  ;;  %vm614_vm0 = vcmask (!%p477_p3), 1024   ;;  %v2724_v1 = vmov (!%p477_p3), 0   ;;  %v2725_v2 = vmov (!%p477_p3), 0.0   ;;  %vm617_vm1 = vcmask (!%p477_p3), 7168  }
   0x9   : > { %s3094_s25 = smov (%p42_p4, %s3092_s25), 0  ;;  %480 = sbr.rel (%p477_p3) target bundleno = 1112 (0x458), region = 64 }
   0xa   : > { %2683 = vset.pattern.permute.xlu1 (!%p477_p3), %v2724_v1  ;;  %2682 = vset.pattern.permute.xlu0 (!%p477_p3), %v2724_v1  ;;  %615 = vst.msk [vmem:[#allocation2] sm:$0x3] (!%p477_p3), %vm614_vm0, %v2725_v2  ;;  %616 = vst.msk [vmem:[#allocation2 + $0xc] sm:$0x3] (!%p477_p3), %vm614_vm0, %v2725_v2  ;;  %vm716_vm2 = vcmask (!%p477_p3), 25600   ;;  %vm729_vm3 = vcmask (!%p477_p3), 1043456  }
   0xb   : > { %2547 = vmatprep.subr.mxu0 (!%p477_p3), %v2725_v2  ;;  %2552 = vmatprep.subr.mxu1 (!%p477_p3), %v2725_v2  ;;  %v2468_v10 = vld [vmem:[%s3071_s2 + $0x4] sm:$0xf] (!%p477_p3)  ;;  %v721_v11 = vld [vmem:[%s3071_s2] sm:$0xf] (!%p477_p3)  ;;  %vm2726_vm4 = vmmov (!%p477_p3), 0   ;;  %vm714_vm5 = vcmask (!%p477_p3), 28672  }
   0xc   : > { %2548 = vmatpush3.msk.msra.mxu0 (!%p477_p3), %vm729_vm3, %v2468_v10  ;;  %2549 = vmatprep.mubr.msk.f32.mxu0 (!%p477_p3), %vm2726_vm4, %v2725_v2  ;;  %v2458_v14 = vld [vmem:[%s3070_s1] ss:$0 sm:$0xff] (!%p477_p3)  ;;  %v2460_v15 = vld [vmem:[%s3070_s1 + $0x1] ss:$0 sm:$0xff] (!%p477_p3)  ;;  %v2462_v16 = vld [vmem:[%s3070_s1 + $0x2] ss:$0 sm:$0xff] (!%p477_p3) }
   0xd   : > { %2553 = vmatpush3.msk.msra.mxu1 (!%p477_p3), %vm729_vm3, %v721_v11  ;;  %2554 = vmatprep.mubr.msk.f32.mxu1 (!%p477_p3), %vm2726_vm4, %v2725_v2  ;;  %v2464_v20 = vld [vmem:[%s3070_s1 + $0x3] ss:$0 sm:$0xff] (!%p477_p3)  ;;  %v2466_v24 = vld [vmem:[%s3070_s1 + $0x4] ss:$0 sm:$0xff] (!%p477_p3)  ;;  %v2467_v30 = vld [vmem:[%s3075_s6] ss:$0 sm:$0xff] (!%p477_p3) }
   0xe   : > { %2557 = vmatprep.subr.mxu0 (!%p477_p3), %v2725_v2  ;;  %2562 = vmatprep.subr.mxu1 (!%p477_p3), %v2725_v2  ;;  %vm725_vm7 = vcmask (!%p477_p3), 31744   ;;  %vm1132_vm8 = vcmask (!%p477_p3), 58368   ;;  %v2473_v35 = vld [vmem:[%s3071_s2 + $0x8] sm:$0xf] (!%p477_p3)  ;;  %v2476_v36 = vld [vmem:[%s3071_s2 + $0xc] sm:$0xf] (!%p477_p3) }
   0xf   : > { %v2479_v42 = vld [vmem:[%s3071_s2 + $0x10] sm:$0xf] (!%p477_p3)  ;;  %v2483_v43 = vld [vmem:[%s3072_s3 + $0x8] sm:$0xff] (!%p477_p3)  ;;  %v1137_v44 = vld [vmem:[%s3072_s3] sm:$0xff] (!%p477_p3)  ;;  %vm1130_vm10 = vcmask (!%p477_p3), 59392   ;;  %vm1141_vm11 = vcmask (!%p477_p3), 64512  }
  0x10   : > { %s3096_s21 = smov (!%p563_p5, %s2710_s21), 1  ;;  %s3098_s20 = smov (!%p565_p6, %s2706_s20), 9  ;;  %v2482_v57 = vld [vmem:[%s3076_s7] ss:$0 sm:$0xff]  ;;  %v2486_v63 = vld [vmem:[%s3072_s3 + $0x10] sm:$0xff]  ;;  %v2488_v0 = vld [vmem:[%s3072_s3 + $0x18] sm:$0xff] }
  0x11   : > { %s2637_s26 = smul.u32 20, %s3096_s21  ;;  %s2451_s27 = sshll.u32 %s3098_s20, 1  ;;  %vm1928_vm12 = vcmask 57344   ;;  %v2498_v11 = vld [vmem:[%s3073_s4 + $0x18] sm:$0xff] }
  0x12   : > { %s2638_s18 = smul.u32 10, %s3096_s21 }
  0x13   : > { %s569_s28 = sadd.s32 %s2637_s26, %s2451_s27 }
  0x14   : > { %s2452_s29 = sshll.u32 %s569_s28, 3  ;;  %s2856_s19 = sadd.s32 %s2638_s18, %s3098_s20 }
  0x15   : > { %s571_s17 = scalar_lea.vmem %s3069_s0, %s2452_s29  ;;  %s2453_s30 = sshll.u32 %s2856_s19, 3 }
  0x16   : > { %v612_v3 = vld [vmem:[%s571_s17] sm:$0xff]  ;;  %v613_v4 = vld [vmem:[%s571_s17 + $0x8] sm:$0x3]  ;;  %s579_s18 = scalar_lea.vmem %s3080_s11, %s2453_s30  ;;  %s2454_s28 = sshll.u32 %s2856_s19, 2 }
  0x17   : > { %618 = vst.msk [vmem:[#allocation2 + $0x2] sm:$0xff] %vm617_vm1, %v612_v3  ;;  %s587_s21 = scalar_lea.vmem %s3081_s12, %s2454_s28  ;;  %s2995_s26 = sshll.u32 %s2856_s19, 1 }
  0x18   : > { %619 = vst.msk [vmem:[#allocation2 + $0xa] sm:$0x3] %vm614_vm0, %v613_v4  ;;  %s595_s29 = scalar_lea.vmem %s3082_s13, %s2995_s26  ;;  %s603_s19 = scalar_lea.vmem %s3083_s14, %s2995_s26 }
  0x19   : > { %s611_s27 = scalar_lea.vmem %s3084_s15, %s2995_s26 }
  0x1e   : > { %v620_v6 = vld [vmem:[#allocation2] ss:$2 sm:$0x1f]  ;;  %v636_v7 = vld [vmem:[#allocation2 + $0x1] ss:$2 sm:$0x1f] }
  0x1f   : > { %v653_v5 = vld [vmem:[#allocation2 + $0x2] ss:$2 sm:$0x1f]  ;;  %624 = vperm.xlu0 %2682, %v620_v6   ;;  %v670_v8 = vld [vmem:[#allocation2 + $0x3] ss:$2 sm:$0x1f] }
  0x20   : > { %658 = vperm.xlu1 %2683, %v653_v5   ;;  %v687_v9 = vld [vmem:[#allocation2 + $0x4] ss:$2 sm:$0x1f]  ;;  %717 = vst.msk [vmem:[#allocation2] sm:$0x3] %vm716_vm2, %v2725_v2 }
  0x21   : > { %718 = vst.msk [vmem:[#allocation2 + $0x7] sm:$0x3] %vm716_vm2, %v2725_v2 }
  0x23   : > { %641 = vperm.xlu0 %2682, %v636_v7   ;;  %v2490_v7 = vld [vmem:[%s3072_s3 + $0x20] sm:$0xff] }
  0x24   : > { %675 = vperm.xlu1 %2683, %v670_v8   ;;  %v1535_v8 = vld [vmem:[%s3073_s4] sm:$0xff] }
  0x27   : > { %692 = vperm.xlu0 %2682, %v687_v9   ;;  %v2493_v9 = vld [vmem:[%s3073_s4 + $0x8] sm:$0xff] }
  0x9e   : > { %v625_v13 = vpop.permute.xlu0 %624 }
  0x9f   : > { %v659_v12 = vpop.permute.xlu1 %658  ;;  %v633_v18 = vmul.f32 %v2458_v14, %v625_v13 }
  0xa0   : > { %v667_v22 = vmul.f32 %v2462_v16, %v659_v12 }
  0xa2   : > { %v642_v17 = vpop.permute.xlu0 %641 }
  0xa3   : > { %v650_v19 = vmul.f32 %v2460_v15, %v642_v17  ;;  %v676_v21 = vpop.permute.xlu1 %675 }
  0xa4   : > { %v684_v26 = vmul.f32 %v2464_v20, %v676_v21 }
  0xa5   : > { %v651_v23 = vadd.f32 %v650_v19, %v633_v18 }
  0xa6   : > { %v693_v25 = vpop.permute.xlu0 %692 }
  0xa7   : > { %v668_v27 = vadd.f32 %v667_v22, %v651_v23  ;;  %v701_v29 = vmul.f32 %v2466_v24, %v693_v25  ;;  %v2492_v24 = vld [vmem:[%s3077_s8] ss:$0 sm:$0xff] }
  0xa9   : > { %v685_v28 = vadd.f32 %v684_v26, %v668_v27 }
  0xab   : > { %v702_v31 = vadd.f32 %v701_v29, %v685_v28 }
  0xad   : > { %v710_v32 = vadd.f32 %v2467_v30, %v702_v31  ;;  %v2496_v30 = vld [vmem:[%s3073_s4 + $0x10] sm:$0xff] }
  0xaf   : > { %vm711_vm6 = vcmp.ge.f32.partialorder %v710_v32, 0.0  ;;  %v712_v33 = vmul.f32 0.1, %v710_v32 }
  0xb1   : > { %v713_v34 = vsel %vm711_vm6, %v710_v32, %v712_v33 }
  0xb2   : > { %715 = vst.msk [vmem:[%s579_s18] sm:$0x1f] %vm714_vm5, %v713_v34  ;;  %719 = vst.msk [vmem:[#allocation2 + $0x2] sm:$0x1f] %vm714_vm5, %v713_v34  ;;  %v2500_v34 = vld [vmem:[%s3073_s4 + $0x20] sm:$0xff] }
  0xb9   : > { %v722_v37 = vld [vmem:[#allocation2 + $0x1] ss:$2 sm:$0x7]  ;;  %v720_v38 = vld [vmem:[#allocation2] ss:$2 sm:$0x7] }
  0xba   : > { %2550 = vmatmul.mubr.msk.f32.vlgmr.msra.gmra.mrb[0].mxu0 %vm725_vm7, %v722_v37  ;;  %2555 = vmatmul.mubr.msk.f32.vlgmr.msra.gmra.mrb[0].mxu1 %vm725_vm7, %v720_v38  ;;  %1133 = vst.msk [vmem:[#allocation2] sm:$0x3] %vm1132_vm8, %v2725_v2  ;;  %v879_v39 = vld [vmem:[#allocation2 + $0x2] ss:$2 sm:$0x7]  ;;  %v2503_v38 = vld [vmem:[%s3074_s5 + $0x8] sm:$0xff] }
  0xbb   : > { %2558 = vmatpush3.msk.msra.mxu0 %vm729_vm3, %v2473_v35  ;;  %2563 = vmatpush3.msk.msra.mxu1 %vm729_vm3, %v2476_v36  ;;  %v959_v40 = vld [vmem:[#allocation2 + $0x3] ss:$2 sm:$0x7]  ;;  %v1039_v41 = vld [vmem:[#allocation2 + $0x4] ss:$2 sm:$0x7] }
  0xbc   : > { %2559 = vmatprep.mubr.msk.f32.mxu0 %vm2726_vm4, %v2725_v2  ;;  %2564 = vmatprep.mubr.msk.f32.mxu1 %vm2726_vm4, %v2725_v2  ;;  %1134 = vst.msk [vmem:[#allocation2 + $0x5] sm:$0x3] %vm1132_vm8, %v2725_v2 }
  0xbd   : > { %2567 = vmatprep.subr.mxu0 %v2725_v2  ;;  %2572 = vmatprep.subr.mxu1 %v2725_v2 }
  0xbe   : > { %2560 = vmatmul.mubr.msk.f32.vlgmr.msra.gmra.mrb[2].mxu0 %vm725_vm7, %v879_v39  ;;  %2565 = vmatmul.mubr.msk.f32.vlgmr.msra.gmra.mrb[2].mxu1 %vm725_vm7, %v959_v40  ;;  %v1933_v39 = vld [vmem:[%s3074_s5] sm:$0xff] }
  0xbf   : > { %2568 = vmatpush3.msk.msra.mxu0 %vm729_vm3, %v2479_v42  ;;  %2569 = vmatprep.mubr.msk.f32.mxu0 %vm2726_vm4, %v2725_v2 }
  0xc0   : > { %2577 = vmatprep.subr.mxu0 %v2725_v2  ;;  %2574 = vmatprep.mubr.msk.f32.mxu1 %vm2726_vm4, %v2725_v2 }
  0xc1   : > { %2573 = vmatpush3.msra.mxu1 %v2483_v43 }
  0xc2   : > { %2570 = vmatmul.mubr.msk.f32.vlgmr.msra.gmra.mrb[4].mxu0 %vm725_vm7, %v1039_v41  ;;  %2582 = vmatprep.subr.mxu1 %v2725_v2 }
  0xc3   : > { %2579 = vmatprep.mubr.msk.f32.mxu0 %vm2726_vm4, %v2725_v2  ;;  %2578 = vmatpush3.msra.mxu0 %v1137_v44 }
  0xc4   : > { %2587 = vmatprep.subr.mxu0 %v2725_v2 }
 0x18d   : > { %v799_v45 = vpop.f32.mrb[0].mxu0  ;;  %v875_v46 = vpop.f32.mrb[0].mxu1 }
 0x18e   : > { %v876_v47 = vadd.f32 %v875_v46, %v799_v45  ;;  %v2551_v48 = vpop.f32.mrb[1].mxu0  ;;  %v2556_v49 = vpop.f32.mrb[1].mxu1 }
 0x191   : > { %v954_v50 = vpop.f32.mrb[2].mxu0  ;;  %v1034_v51 = vpop.f32.mrb[2].mxu1 }
 0x192   : > { %v958_v52 = vadd.f32 %v954_v50, %v876_v47  ;;  %v2561_v53 = vpop.f32.mrb[3].mxu0  ;;  %v2566_v54 = vpop.f32.mrb[3].mxu1  ;;  %v2502_v50 = vld [vmem:[%s3078_s9] ss:$0 sm:$0xff] }
 0x194   : > { %v1038_v55 = vadd.f32 %v1034_v51, %v958_v52 }
 0x195   : > { %v1114_v56 = vpop.f32.mrb[4].mxu0 }
 0x196   : > { %v1118_v58 = vadd.f32 %v1114_v56, %v1038_v55  ;;  %v2571_v59 = vpop.f32.mrb[5].mxu0  ;;  %v2506_v56 = vld [vmem:[%s3074_s5 + $0x10] sm:$0xff] }
 0x198   : > { %v1126_v60 = vadd.f32 %v2482_v57, %v1118_v58 }
 0x19a   : > { %vm1127_vm9 = vcmp.ge.f32.partialorder %v1126_v60, 0.0  ;;  %v1128_v61 = vmul.f32 0.1, %v1126_v60 }
 0x19c   : > { %v1129_v62 = vsel %vm1127_vm9, %v1126_v60, %v1128_v61 }
 0x19d   : > { %1131 = vst.msk [vmem:[%s587_s21] sm:$0x7] %vm1130_vm10, %v1129_v62  ;;  %1135 = vst.msk [vmem:[#allocation2 + $0x2] sm:$0x7] %vm1130_vm10, %v1129_v62 }
 0x1a4   : > { %v1138_v1 = vld [vmem:[#allocation2 + $0x1] ss:$2 sm:$0x3]  ;;  %v1136_v3 = vld [vmem:[#allocation2] ss:$2 sm:$0x3] }
 0x1a5   : > { %2575 = vmatmul.mubr.msk.f32.vlgmr.msra.gmra.mrb[4].mxu1 %vm1141_vm11, %v1138_v1  ;;  %2580 = vmatmul.mubr.msk.f32.vlgmr.msra.gmra.mrb[6].mxu0 %vm1141_vm11, %v1136_v3  ;;  %1531 = vst.msk [vmem:[#allocation2] sm:$0x3] %vm1132_vm8, %v2725_v2  ;;  %v1288_v4 = vld [vmem:[#allocation2 + $0x2] ss:$2 sm:$0x3] }
 0x1a6   : > { %2583 = vmatpush3.msra.mxu1 %v2486_v63  ;;  %2588 = vmatpush3.msra.mxu0 %v2488_v0  ;;  %v1365_v5 = vld [vmem:[#allocation2 + $0x3] ss:$2 sm:$0x3]  ;;  %v1442_v6 = vld [vmem:[#allocation2 + $0x4] ss:$2 sm:$0x3] }
 0x1a7   : > { %2584 = vmatprep.mubr.msk.f32.mxu1 %vm2726_vm4, %v2725_v2  ;;  %2589 = vmatprep.mubr.msk.f32.mxu0 %vm2726_vm4, %v2725_v2  ;;  %1532 = vst.msk [vmem:[#allocation2 + $0x4] sm:$0x3] %vm1132_vm8, %v2725_v2  ;;  %v2508_v3 = vld [vmem:[#allocation3] ss:$0 sm:$0xff] }
 0x1a8   : > { %2592 = vmatprep.subr.mxu1 %v2725_v2  ;;  %2597 = vmatprep.subr.mxu0 %v2725_v2 }
 0x1a9   : > { %2585 = vmatmul.mubr.msk.f32.vlgmr.msra.gmra.mrb[6].mxu1 %vm1141_vm11, %v1288_v4  ;;  %2590 = vmatmul.mubr.msk.f32.vlgmr.msra.gmra.mrb[8].mxu0 %vm1141_vm11, %v1365_v5 }
 0x1aa   : > { %2593 = vmatpush3.msra.mxu1 %v2490_v7  ;;  %2594 = vmatprep.mubr.msk.f32.mxu1 %vm2726_vm4, %v2725_v2 }
 0x1ab   : > { %2602 = vmatprep.subr.mxu1 %v2725_v2  ;;  %2599 = vmatprep.mubr.msk.f32.mxu0 %vm2726_vm4, %v2725_v2 }
 0x1ac   : > { %v1534_v10 = vld [vmem:[#allocation2] sm:$0x3]  ;;  %2598 = vmatpush3.msra.mxu0 %v2493_v9 }
 0x1ad   : > { %2595 = vmatmul.mubr.msk.f32.vlgmr.msra.gmra.mrb[8].mxu1 %vm1141_vm11, %v1442_v6  ;;  %1929 = vst.msk [vmem:[#allocation2] sm:$0x1] %vm1928_vm12, %v2725_v2  ;;  %2607 = vmatprep.subr.mxu0 %v2725_v2 }
 0x1ae   : > { %2604 = vmatprep.mubr.msk.f32.mxu1 %vm2726_vm4, %v2725_v2  ;;  %2603 = vmatpush3.msra.mxu1 %v1535_v8  ;;  %v1839_v35 = vld [vmem:[#allocation2 + $0x4] sm:$0x3] }
 0x1af   : > { %2612 = vmatprep.subr.mxu1 %v2725_v2 }
 0x1b1   : > { %2605 = vmatmul.mubr.msk.f32.vlgmr.msra.gmra.mrb[10].mxu1 %vm1141_vm11, %v1534_v10 }
 0x1b2   : > { %2613 = vmatpush3.msra.mxu1 %v2498_v11  ;;  %2614 = vmatprep.mubr.msk.f32.mxu1 %vm2726_vm4, %v2725_v2 }
 0x1b3   : > { %2622 = vmatprep.subr.mxu1 %v2725_v2 }
 0x278   : > { %v1211_v12 = vpop.f32.mrb[4].mxu1  ;;  %v1284_v13 = vpop.f32.mrb[6].mxu0 }
 0x279   : > { %v1285_v14 = vadd.f32 %v1284_v13, %v1211_v12  ;;  %v2576_v15 = vpop.f32.mrb[5].mxu1  ;;  %v2581_v16 = vpop.f32.mrb[7].mxu0 }
 0x27c   : > { %v1360_v17 = vpop.f32.mrb[6].mxu1  ;;  %v1437_v18 = vpop.f32.mrb[8].mxu0 }
 0x27d   : > { %v1364_v19 = vadd.f32 %v1360_v17, %v1285_v14  ;;  %v2586_v20 = vpop.f32.mrb[7].mxu1  ;;  %v2591_v21 = vpop.f32.mrb[9].mxu0 }
 0x27f   : > { %v1441_v22 = vadd.f32 %v1437_v18, %v1364_v19 }
 0x280   : > { %v1514_v23 = vpop.f32.mrb[8].mxu1 }
 0x281   : > { %v1518_v25 = vadd.f32 %v1514_v23, %v1441_v22  ;;  %v2596_v26 = vpop.f32.mrb[9].mxu1 }
 0x283   : > { %v1526_v27 = vadd.f32 %v2492_v24, %v1518_v25 }
 0x284   : > { %v1681_v36 = vpop.f32.mrb[10].mxu1 }
 0x285   : > { %vm1527_vm13 = vcmp.ge.f32.partialorder %v1526_v27, 0.0  ;;  %v1528_v28 = vmul.f32 0.1, %v1526_v27  ;;  %v2606_v37 = vpop.f32.mrb[11].mxu1 }
 0x287   : > { %v1529_v29 = vsel %vm1527_vm13, %v1526_v27, %v1528_v28 }
 0x288   : > { %1530 = vst.msk [vmem:[%s595_s29] sm:$0x3] %vm1132_vm8, %v1529_v29  ;;  %1533 = vst.msk [vmem:[#allocation2 + $0x2] sm:$0x3] %vm1132_vm8, %v1529_v29 }
 0x28f   : > { %v1536_v31 = vld [vmem:[#allocation2 + $0x1] sm:$0x3]  ;;  %v1762_v32 = vld [vmem:[#allocation2 + $0x3] sm:$0x3] }
 0x290   : > { %v1685_v33 = vld [vmem:[#allocation2 + $0x2] sm:$0x3]  ;;  %2600 = vmatmul.mubr.msk.f32.vlgmr.msra.gmra.mrb[10].mxu0 %vm1141_vm11, %v1536_v31  ;;  %2615 = vmatmul.mubr.msk.f32.vlgmr.msra.gmra.mrb[12].mxu1 %vm1141_vm11, %v1762_v32 }
 0x291   : > { %1930 = vst.msk [vmem:[#allocation2 + $0x3] sm:$0x1] %vm1928_vm12, %v2725_v2  ;;  %2608 = vmatpush3.msra.mxu0 %v2496_v30  ;;  %2609 = vmatprep.mubr.msk.f32.mxu0 %vm2726_vm4, %v2725_v2 }
 0x292   : > { %2617 = vmatprep.subr.mxu0 %v2725_v2  ;;  %2624 = vmatprep.mubr.msk.f32.mxu1 %vm2726_vm4, %v2725_v2 }
 0x293   : > { %2623 = vmatpush3.msra.mxu1 %v2503_v38 }
 0x294   : > { %2610 = vmatmul.mubr.msk.f32.vlgmr.msra.gmra.mrb[12].mxu0 %vm1141_vm11, %v1685_v33  ;;  %2632 = vmatprep.subr.mxu1 %v2725_v2 }
 0x295   : > { %2618 = vmatpush3.msra.mxu0 %v2500_v34  ;;  %2619 = vmatprep.mubr.msk.f32.mxu0 %vm2726_vm4, %v2725_v2 }
 0x296   : > { %2627 = vmatprep.subr.mxu0 %v2725_v2 }
 0x298   : > { %2620 = vmatmul.mubr.msk.f32.vlgmr.msra.gmra.mrb[14].mxu0 %vm1141_vm11, %v1839_v35 }
 0x299   : > { %2629 = vmatprep.mubr.msk.f32.mxu0 %vm2726_vm4, %v2725_v2  ;;  %2628 = vmatpush3.msra.mxu0 %v1933_v39 }
 0x363   : > { %v1608_v40 = vpop.f32.mrb[10].mxu0  ;;  %v1834_v41 = vpop.f32.mrb[12].mxu1 }
 0x364   : > { %v1682_v42 = vadd.f32 %v1681_v36, %v1608_v40  ;;  %v2601_v43 = vpop.f32.mrb[11].mxu0  ;;  %v2616_v44 = vpop.f32.mrb[13].mxu1 }
 0x367   : > { %v1757_v45 = vpop.f32.mrb[12].mxu0 }
 0x368   : > { %v1761_v46 = vadd.f32 %v1757_v45, %v1682_v42  ;;  %v2611_v47 = vpop.f32.mrb[13].mxu0 }
 0x36a   : > { %v1838_v48 = vadd.f32 %v1834_v41, %v1761_v46 }
 0x36b   : > { %v1911_v49 = vpop.f32.mrb[14].mxu0 }
 0x36c   : > { %v1915_v51 = vadd.f32 %v1911_v49, %v1838_v48  ;;  %v2621_v52 = vpop.f32.mrb[15].mxu0 }
 0x36e   : > { %v1923_v53 = vadd.f32 %v2502_v50, %v1915_v51 }
 0x370   : > { %vm1924_vm14 = vcmp.ge.f32.partialorder %v1923_v53, 0.0  ;;  %v1925_v54 = vmul.f32 0.1, %v1923_v53 }
 0x372   : > { %v1926_v55 = vsel %vm1924_vm14, %v1923_v53, %v1925_v54 }
 0x373   : > { %1927 = vst.msk [vmem:[%s603_s19] sm:$0x3] %vm1132_vm8, %v1926_v55  ;;  %1931 = vst.msk [vmem:[#allocation2 + $0x1] sm:$0x3] %vm1132_vm8, %v1926_v55 }
 0x37a   : > { %v1934_v57 = vld [vmem:[#allocation2 + $0x1] sm:$0x3] }
 0x37b   : > { %v1932_v58 = vld [vmem:[#allocation2] sm:$0x3]  ;;  %2625 = vmatmul.mubr.msk.f32.vlgmr.msra.gmra.mrb[14].mxu1 %vm1141_vm11, %v1934_v57  ;;  %v2083_v59 = vld [vmem:[#allocation2 + $0x2] sm:$0x3] }
 0x37c   : > { %2630 = vmatmul.mubr.msk.f32.vlgmr.msra.gmra.mrb[16].mxu0 %vm1141_vm11, %v1932_v58  ;;  %2633 = vmatpush3.msra.mxu1 %v2506_v56 }
 0x37d   : > { %2634 = vmatprep.mubr.msk.f32.mxu1 %vm2726_vm4, %v2725_v2 }
 0x37f   : > { %2635 = vmatmul.mubr.msk.f32.vlgmr.msra.gmra.mrb[16].mxu1 %vm1141_vm11, %v2083_v59 }
 0x44e   : > { %v2006_v60 = vpop.f32.mrb[14].mxu1 }
 0x44f   : > { %v2079_v61 = vpop.f32.mrb[16].mxu0  ;;  %v2626_v63 = vpop.f32.mrb[15].mxu1 }
 0x450   : > { %v2080_v62 = vadd.f32 %v2079_v61, %v2006_v60  ;;  %v2631_v0 = vpop.f32.mrb[17].mxu0 }
 0x452   : > { %v2155_v1 = vpop.f32.mrb[16].mxu1 }
 0x453   : > { %v2159_v4 = vadd.f32 %v2155_v1, %v2080_v62  ;;  %v2636_v5 = vpop.f32.mrb[17].mxu1 }
 0x455   : > { %v2167_v6 = vadd.f32 %v2508_v3, %v2159_v4 }
 0x457   : > { %2168 = vst.msk [vmem:[%s611_s27] sm:$0x3] %vm614_vm0, %v2167_v6 }
 0x458 PF: > { %s28_s24 = sadd.s32 1, %s2722_s24   ;;  %s3085_s20 = smov %s2714_s22 }
 0x459   : > { %p25_p7 = scmp.ge.s32.totalorder %s28_s24, 22   ;;  %s3086_s21 = smov %s2718_s23 }
 0x45a   : > { %s3087_s22 = smov %s3090_s10  ;;  %s3088_s23 = smov %s3094_s25 }
 0x45b   :  { %27 = sbr.rel (!%p25_p7) target bundleno = 3 (0x3), region = 164 }

</bundles_post_ra>
